<compile_context>
chip_gen: v6e
topology: v6e:2x2x1
jax: 0.10.0
libtpu: 0.0.40
codegen_flags: <defaults>
</compile_context>

<pallas_src>
import jax
import jax.numpy as jnp
from jax.experimental import pallas as pl
from jax.experimental.pallas import tpu as pltpu

EPS = 1e-5  # nn.BatchNorm2d default


def _round_up(x, m):
    return (x + m - 1) // m * m


def _choose_tile_h(H, W, Cp):
    """Largest divisor of H whose per-step working set stays well under scoped VMEM."""
    budget = 6 * 1024 * 1024  # rough per-step bytes, leaves headroom for double buffering
    best = 1
    for th in range(1, H + 1):
        if H % th != 0:
            continue
        per_step = (th * (W + 2) * Cp * 2) * 2 + (th * W * Cp * 4) * 2
        if per_step <= budget:
            best = th
    return best


def _conv_stats_kernel(xm_ref, xh1_ref, xh2_ref, w_ref,
                       conv_ref, sum_ref, ssq_ref, halo):
    # xm_ref : (1, TH,  W+2, Cp) bf16  -- padded-input rows [h0, h0+TH)
    # xh1/2  : (1, 1,   W+2, Cp) bf16  -- halo rows h0+TH, h0+TH+1
    # w_ref  : (9, Cp, Cp)       bf16  -- (kh*3+kw, cin, cout)
    # conv   : (1, TH*W, Cp)     f32
    # sum/ssq: (1, 1, 1, Cp)     f32   -- per-tile per-channel partials
    # halo   : VMEM scratch (TH+2, W+2, Cp) bf16
    th = xm_ref.shape[1]
    wp = xm_ref.shape[2]
    cp = xm_ref.shape[3]
    w_out = wp - 2

    # Assemble the haloed row tile in VMEM (pure VMEM copies, no extra HBM traffic).
    halo[0:th] = xm_ref[0]
    halo[th:th + 1] = xh1_ref[0]
    halo[th + 1:th + 2] = xh2_ref[0]

    # 3x3 conv as 9 accumulating matmuls on the MXU (bf16 in, f32 accumulate).
    acc = jnp.zeros((th * w_out, cp), jnp.float32)
    for kh in range(3):
        for kw in range(3):
            patch = halo[kh:kh + th, kw:kw + w_out, :].reshape(th * w_out, cp)
            acc = acc + jnp.dot(patch, w_ref[kh * 3 + kw],
                                preferred_element_type=jnp.float32)

    conv_ref[0] = acc
    # Per-channel partial statistics for BatchNorm (training mode).
    sum_ref[0, 0] = jnp.sum(acc, axis=0, keepdims=True)
    ssq_ref[0, 0] = jnp.sum(acc * acc, axis=0, keepdims=True)


def _bn_relu_res_kernel(conv_ref, xres_ref, scale_ref, shift_ref, o_ref):
    # Fused epilogue: out = xres + relu(scale * conv + shift)   (all f32)
    bn = conv_ref[...] * scale_ref[...] + shift_ref[...]
    o_ref[...] = xres_ref[...] + jnp.maximum(bn, 0.0)


@jax.jit
def resblock_forward(x_nchw, weight, bias, gamma, beta):
    """x_nchw: (N, C, H, W) f32; weight: (C, C, 3, 3). Returns NCHW f32."""
    del bias  # exactly cancelled by the BN batch-mean subtraction (training mode)
    N, C, H, W = x_nchw.shape
    Cp = _round_up(max(C, 128), 128)      # lane-dense channel dim
    TH = _choose_tile_h(H, W, Cp)
    n_h = H // TH
    Wp = W + 2
    THW = TH * W
    M = N * H * W

    # ---- layout prep (pure data movement) ----
    x_nhwc = jnp.transpose(x_nchw, (0, 2, 3, 1)).astype(jnp.float32)       # (N,H,W,C)
    x_cp = jnp.pad(x_nhwc, ((0, 0), (0, 0), (0, 0), (0, Cp - C)))          # (N,H,W,Cp) f32
    x_res = x_cp.reshape(N, H * W, Cp)                                     # residual, f32
    x_halo = jnp.pad(x_cp, ((0, 0), (1, 1), (1, 1), (0, 0))).astype(jnp.bfloat16)
    # x_halo: (N, H+2, W+2, Cp) bf16 -- the only activation copy fed to the conv pass

    w_t = jnp.transpose(weight, (2, 3, 1, 0))                              # (3,3,Cin,Cout)
    w_p = jnp.pad(w_t, ((0, 0), (0, 0), (0, Cp - C), (0, Cp - C)))
    w9 = w_p.reshape(9, Cp, Cp).astype(jnp.bfloat16)

    g_p = jnp.pad(gamma.astype(jnp.float32), (0, Cp - C))
    be_p = jnp.pad(beta.astype(jnp.float32), (0, Cp - C))

    cparams = pltpu.CompilerParams(
        dimension_semantics=("parallel", "parallel"),
        vmem_limit_bytes=32 * 1024 * 1024,
    )

    # ---- pass 1: conv (9 bf16 matmuls on halo tiles) + BN partial stats ----
    conv_flat, sums, ssqs = pl.pallas_call(
        _conv_stats_kernel,
        out_shape=(
            jax.ShapeDtypeStruct((N, H * W, Cp), jnp.float32),
            jax.ShapeDtypeStruct((N, n_h, 1, Cp), jnp.float32),
            jax.ShapeDtypeStruct((N, n_h, 1, Cp), jnp.float32),
        ),
        grid=(N, n_h),
        in_specs=[
            pl.BlockSpec((1, TH, Wp, Cp), lambda n, hi: (n, hi, 0, 0)),
            pl.BlockSpec((1, 1, Wp, Cp), lambda n, hi: (n, hi * TH + TH, 0, 0)),
            pl.BlockSpec((1, 1, Wp, Cp), lambda n, hi: (n, hi * TH + TH + 1, 0, 0)),
            pl.BlockSpec((9, Cp, Cp), lambda n, hi: (0, 0, 0)),
        ],
        out_specs=(
            pl.BlockSpec((1, THW, Cp), lambda n, hi: (n, hi, 0)),
            pl.BlockSpec((1, 1, 1, Cp), lambda n, hi: (n, hi, 0, 0)),
            pl.BlockSpec((1, 1, 1, Cp), lambda n, hi: (n, hi, 0, 0)),
        ),
        scratch_shapes=[pltpu.VMEM((TH + 2, Wp, Cp), jnp.bfloat16)],
        compiler_params=cparams,
    )(x_halo, x_halo, x_halo, w9)

    # ---- tiny per-channel finalize (Cp-sized, plain XLA) ----
    sum_c = jnp.sum(sums, axis=(0, 1, 2))
    ssq_c = jnp.sum(ssqs, axis=(0, 1, 2))
    mean = sum_c / M
    var = jnp.maximum(ssq_c / M - mean * mean, 0.0)
    scale = g_p * jax.lax.rsqrt(var + EPS)
    shift = be_p - scale * mean

    # ---- pass 2: fused BN apply + ReLU + residual add ----
    out_flat = pl.pallas_call(
        _bn_relu_res_kernel,
        out_shape=jax.ShapeDtypeStruct((N, H * W, Cp), jnp.float32),
        grid=(N, n_h),
        in_specs=[
            pl.BlockSpec((1, THW, Cp), lambda n, hi: (n, hi, 0)),
            pl.BlockSpec((1, THW, Cp), lambda n, hi: (n, hi, 0)),
            pl.BlockSpec((1, Cp), lambda n, hi: (0, 0)),
            pl.BlockSpec((1, Cp), lambda n, hi: (0, 0)),
        ],
        out_specs=pl.BlockSpec((1, THW, Cp), lambda n, hi: (n, hi, 0)),
        input_output_aliases={1: 0},   # write the output in place of the residual buffer
        compiler_params=cparams,
    )(conv_flat, x_res, scale.reshape(1, Cp), shift.reshape(1, Cp))

    out = out_flat.reshape(N, H, W, Cp)[:, :, :, :C]
    return jnp.transpose(out, (0, 3, 1, 2))                                # back to NCHW


def reference_forward(x_nchw, weight, bias, gamma, beta):
    """Pure-JAX f32 reference (lax conv + training-mode batch-norm)."""
    conv = jax.lax.conv_general_dilated(
        x_nchw, weight, window_strides=(1, 1), padding="SAME",
        dimension_numbers=("NCHW", "OIHW", "NCHW"),
    ) + bias.reshape(1, -1, 1, 1)
    mean = jnp.mean(conv, axis=(0, 2, 3), keepdims=True)
    var = jnp.mean((conv - mean) ** 2, axis=(0, 2, 3), keepdims=True)
    bn = gamma.reshape(1, -1, 1, 1) * (conv - mean) * jax.lax.rsqrt(var + EPS) \
        + beta.reshape(1, -1, 1, 1)
    return x_nchw + jnp.maximum(bn, 0.0)


if __name__ == "__main__":
    N, C, H, W = 2, 4, 16, 16
    key = jax.random.PRNGKey(0)
    kx, kw_, kb = jax.random.split(key, 3)

    x = jax.random.normal(kx, (N, C, H, W), dtype=jnp.float32)
    # deterministic synthetic params (shapes match nn.Conv2d(C, C, 3) / nn.BatchNorm2d(C))
    fan_in = C * 3 * 3
    bound = 1.0 / (fan_in ** 0.5)
    weight = jax.random.uniform(kw_, (C, C, 3, 3), jnp.float32, -bound, bound)
    bias = jax.random.uniform(kb, (C,), jnp.float32, -bound, bound)
    gamma = jnp.ones((C,), jnp.float32)   # BatchNorm2d default affine init
    beta = jnp.zeros((C,), jnp.float32)

    out = resblock_forward(x, weight, bias, gamma, beta)
    jax.block_until_ready(out)

    ref = reference_forward(x, weight, bias, gamma, beta)
    max_err = jnp.max(jnp.abs(out - ref))
    # bf16 matmul inputs vs f32 reference -> small rounding differences
    assert jnp.allclose(out, ref, atol=2e-2, rtol=2e-2), f"mismatch vs reference ({max_err})"

    print("KERNEL_OK")
</pallas_src>

<mosaic_0001>
module attributes {stable_mosaic.version = 11 : i64} {
  func.func @_conv_stats_kernel(%arg0: i32, %arg1: i32, %arg2: memref<1x16x18x128xbf16, #tpu.memory_space<vmem>>, %arg3: memref<1x1x18x128xbf16, #tpu.memory_space<vmem>>, %arg4: memref<1x1x18x128xbf16, #tpu.memory_space<vmem>>, %arg5: memref<9x128x128xbf16, #tpu.memory_space<vmem>>, %arg6: memref<1x256x128xf32, #tpu.memory_space<vmem>>, %arg7: memref<1x1x1x128xf32, #tpu.memory_space<vmem>>, %arg8: memref<1x1x1x128xf32, #tpu.memory_space<vmem>>, %arg9: memref<18x18x128xbf16, #tpu.memory_space<vmem>>) attributes {dimension_semantics = [#tpu.dimension_semantics<parallel>, #tpu.dimension_semantics<parallel>], iteration_bounds = array<i64: 2, 1>, scalar_prefetch = 0 : i64, scratch_operands = 1 : i64, tpu.core_type = #tpu.core_type<tc>, window_params = [{transform_indices = @transform_0, window_bounds = array<i64: 1, 16, 18, 128>}, {transform_indices = @transform_1, window_bounds = array<i64: 1, 1, 18, 128>}, {transform_indices = @transform_2, window_bounds = array<i64: 1, 1, 18, 128>}, {pipeline_mode = #tpu.pipeline_mode<synchronous>, transform_indices = @transform_3, window_bounds = array<i64: 9, 128, 128>}, {transform_indices = @transform_4, window_bounds = array<i64: 1, 256, 128>}, {transform_indices = @transform_5, window_bounds = array<i64: 1, 1, 1, 128>}, {transform_indices = @transform_6, window_bounds = array<i64: 1, 1, 1, 128>}]} {
    %c0 = arith.constant 0 : index
    %c0_0 = arith.constant 0 : index
    %c0_1 = arith.constant 0 : index
    %c0_2 = arith.constant 0 : index
    %0 = vector.load %arg2[%c0, %c0_0, %c0_1, %c0_2] : memref<1x16x18x128xbf16, #tpu.memory_space<vmem>>, vector<1x16x18x128xbf16>
    %1 = vector.shape_cast %0 : vector<1x16x18x128xbf16> to vector<16x18x128xbf16>
    %c0_3 = arith.constant 0 : index
    %c0_4 = arith.constant 0 : index
    %c0_5 = arith.constant 0 : index
    %2 = vector.load %arg9[%c0_3, %c0_4, %c0_5] : memref<18x18x128xbf16, #tpu.memory_space<vmem>>, vector<16x18x128xbf16>
    tpu.vector_store %arg9[%c0_3, %c0_4, %c0_5], %1 {strides = array<i32>} : memref<18x18x128xbf16, #tpu.memory_space<vmem>>, vector<16x18x128xbf16>,
    %c0_6 = arith.constant 0 : index
    %c0_7 = arith.constant 0 : index
    %c0_8 = arith.constant 0 : index
    %c0_9 = arith.constant 0 : index
    %3 = vector.load %arg3[%c0_6, %c0_7, %c0_8, %c0_9] : memref<1x1x18x128xbf16, #tpu.memory_space<vmem>>, vector<1x1x18x128xbf16>
    %4 = vector.shape_cast %3 : vector<1x1x18x128xbf16> to vector<1x18x128xbf16>
    %c16 = arith.constant 16 : index
    %c0_10 = arith.constant 0 : index
    %c0_11 = arith.constant 0 : index
    %5 = vector.load %arg9[%c16, %c0_10, %c0_11] : memref<18x18x128xbf16, #tpu.memory_space<vmem>>, vector<1x18x128xbf16>
    tpu.vector_store %arg9[%c16, %c0_10, %c0_11], %4 {strides = array<i32>} : memref<18x18x128xbf16, #tpu.memory_space<vmem>>, vector<1x18x128xbf16>,
    %c0_12 = arith.constant 0 : index
    %c0_13 = arith.constant 0 : index
    %c0_14 = arith.constant 0 : index
    %c0_15 = arith.constant 0 : index
    %6 = vector.load %arg4[%c0_12, %c0_13, %c0_14, %c0_15] : memref<1x1x18x128xbf16, #tpu.memory_space<vmem>>, vector<1x1x18x128xbf16>
    %7 = vector.shape_cast %6 : vector<1x1x18x128xbf16> to vector<1x18x128xbf16>
    %c17 = arith.constant 17 : index
    %c0_16 = arith.constant 0 : index
    %c0_17 = arith.constant 0 : index
    %8 = vector.load %arg9[%c17, %c0_16, %c0_17] : memref<18x18x128xbf16, #tpu.memory_space<vmem>>, vector<1x18x128xbf16>
    tpu.vector_store %arg9[%c17, %c0_16, %c0_17], %7 {strides = array<i32>} : memref<18x18x128xbf16, #tpu.memory_space<vmem>>, vector<1x18x128xbf16>,
    %cst = arith.constant 0.000000e+00 : f32
    %9 = vector.broadcast %cst : f32 to vector<256x128xf32>
    %c0_18 = arith.constant 0 : index
    %c0_19 = arith.constant 0 : index
    %c0_20 = arith.constant 0 : index
    %10 = vector.load %arg9[%c0_18, %c0_19, %c0_20] : memref<18x18x128xbf16, #tpu.memory_space<vmem>>, vector<16x16x128xbf16>
    %11 = vector.shape_cast %10 : vector<16x16x128xbf16> to vector<256x128xbf16>
    %c0_21 = arith.constant 0 : index
    %c0_22 = arith.constant 0 : index
    %c0_23 = arith.constant 0 : index
    %12 = vector.load %arg5[%c0_21, %c0_22, %c0_23] : memref<9x128x128xbf16, #tpu.memory_space<vmem>>, vector<1x128x128xbf16>
    %13 = vector.shape_cast %12 : vector<1x128x128xbf16> to vector<128x128xbf16>
    %cst_24 = arith.constant dense<0.000000e+00> : vector<256x128xf32>
    %14 = tpu.matmul %11, %13, %cst_24 {dimension_numbers = #tpu.dot_dimension_numbers<[1], [0], [0], [1], [0, 0, 1, 1], [], []>} : vector<256x128xbf16>, vector<128x128xbf16>, vector<256x128xf32> -> vector<256x128xf32>
    %15 = arith.addf %9, %14 : vector<256x128xf32>
    %c0_25 = arith.constant 0 : index
    %c1 = arith.constant 1 : index
    %c0_26 = arith.constant 0 : index
    %16 = vector.load %arg9[%c0_25, %c1, %c0_26] : memref<18x18x128xbf16, #tpu.memory_space<vmem>>, vector<16x16x128xbf16>
    %17 = vector.shape_cast %16 : vector<16x16x128xbf16> to vector<256x128xbf16>
    %c1_27 = arith.constant 1 : index
    %c0_28 = arith.constant 0 : index
    %c0_29 = arith.constant 0 : index
    %18 = vector.load %arg5[%c1_27, %c0_28, %c0_29] : memref<9x128x128xbf16, #tpu.memory_space<vmem>>, vector<1x128x128xbf16>
    %19 = vector.shape_cast %18 : vector<1x128x128xbf16> to vector<128x128xbf16>
    %cst_30 = arith.constant dense<0.000000e+00> : vector<256x128xf32>
    %20 = tpu.matmul %17, %19, %cst_30 {dimension_numbers = #tpu.dot_dimension_numbers<[1], [0], [0], [1], [0, 0, 1, 1], [], []>} : vector<256x128xbf16>, vector<128x128xbf16>, vector<256x128xf32> -> vector<256x128xf32>
    %21 = arith.addf %15, %20 : vector<256x128xf32>
    %c0_31 = arith.constant 0 : index
    %c2 = arith.constant 2 : index
    %c0_32 = arith.constant 0 : index
    %22 = vector.load %arg9[%c0_31, %c2, %c0_32] : memref<18x18x128xbf16, #tpu.memory_space<vmem>>, vector<16x16x128xbf16>
    %23 = vector.shape_cast %22 : vector<16x16x128xbf16> to vector<256x128xbf16>
    %c2_33 = arith.constant 2 : index
    %c0_34 = arith.constant 0 : index
    %c0_35 = arith.constant 0 : index
    %24 = vector.load %arg5[%c2_33, %c0_34, %c0_35] : memref<9x128x128xbf16, #tpu.memory_space<vmem>>, vector<1x128x128xbf16>
    %25 = vector.shape_cast %24 : vector<1x128x128xbf16> to vector<128x128xbf16>
    %cst_36 = arith.constant dense<0.000000e+00> : vector<256x128xf32>
    %26 = tpu.matmul %23, %25, %cst_36 {dimension_numbers = #tpu.dot_dimension_numbers<[1], [0], [0], [1], [0, 0, 1, 1], [], []>} : vector<256x128xbf16>, vector<128x128xbf16>, vector<256x128xf32> -> vector<256x128xf32>
    %27 = arith.addf %21, %26 : vector<256x128xf32>
    %c1_37 = arith.constant 1 : index
    %c0_38 = arith.constant 0 : index
    %c0_39 = arith.constant 0 : index
    %28 = vector.load %arg9[%c1_37, %c0_38, %c0_39] : memref<18x18x128xbf16, #tpu.memory_space<vmem>>, vector<16x16x128xbf16>
    %29 = vector.shape_cast %28 : vector<16x16x128xbf16> to vector<256x128xbf16>
    %c3 = arith.constant 3 : index
    %c0_40 = arith.constant 0 : index
    %c0_41 = arith.constant 0 : index
    %30 = vector.load %arg5[%c3, %c0_40, %c0_41] : memref<9x128x128xbf16, #tpu.memory_space<vmem>>, vector<1x128x128xbf16>
    %31 = vector.shape_cast %30 : vector<1x128x128xbf16> to vector<128x128xbf16>
    %cst_42 = arith.constant dense<0.000000e+00> : vector<256x128xf32>
    %32 = tpu.matmul %29, %31, %cst_42 {dimension_numbers = #tpu.dot_dimension_numbers<[1], [0], [0], [1], [0, 0, 1, 1], [], []>} : vector<256x128xbf16>, vector<128x128xbf16>, vector<256x128xf32> -> vector<256x128xf32>
    %33 = arith.addf %27, %32 : vector<256x128xf32>
    %c1_43 = arith.constant 1 : index
    %c1_44 = arith.constant 1 : index
    %c0_45 = arith.constant 0 : index
    %34 = vector.load %arg9[%c1_43, %c1_44, %c0_45] : memref<18x18x128xbf16, #tpu.memory_space<vmem>>, vector<16x16x128xbf16>
    %35 = vector.shape_cast %34 : vector<16x16x128xbf16> to vector<256x128xbf16>
    %c4 = arith.constant 4 : index
    %c0_46 = arith.constant 0 : index
    %c0_47 = arith.constant 0 : index
    %36 = vector.load %arg5[%c4, %c0_46, %c0_47] : memref<9x128x128xbf16, #tpu.memory_space<vmem>>, vector<1x128x128xbf16>
    %37 = vector.shape_cast %36 : vector<1x128x128xbf16> to vector<128x128xbf16>
    %cst_48 = arith.constant dense<0.000000e+00> : vector<256x128xf32>
    %38 = tpu.matmul %35, %37, %cst_48 {dimension_numbers = #tpu.dot_dimension_numbers<[1], [0], [0], [1], [0, 0, 1, 1], [], []>} : vector<256x128xbf16>, vector<128x128xbf16>, vector<256x128xf32> -> vector<256x128xf32>
    %39 = arith.addf %33, %38 : vector<256x128xf32>
    %c1_49 = arith.constant 1 : index
    %c2_50 = arith.constant 2 : index
    %c0_51 = arith.constant 0 : index
    %40 = vector.load %arg9[%c1_49, %c2_50, %c0_51] : memref<18x18x128xbf16, #tpu.memory_space<vmem>>, vector<16x16x128xbf16>
    %41 = vector.shape_cast %40 : vector<16x16x128xbf16> to vector<256x128xbf16>
    %c5 = arith.constant 5 : index
    %c0_52 = arith.constant 0 : index
    %c0_53 = arith.constant 0 : index
    %42 = vector.load %arg5[%c5, %c0_52, %c0_53] : memref<9x128x128xbf16, #tpu.memory_space<vmem>>, vector<1x128x128xbf16>
    %43 = vector.shape_cast %42 : vector<1x128x128xbf16> to vector<128x128xbf16>
    %cst_54 = arith.constant dense<0.000000e+00> : vector<256x128xf32>
    %44 = tpu.matmul %41, %43, %cst_54 {dimension_numbers = #tpu.dot_dimension_numbers<[1], [0], [0], [1], [0, 0, 1, 1], [], []>} : vector<256x128xbf16>, vector<128x128xbf16>, vector<256x128xf32> -> vector<256x128xf32>
    %45 = arith.addf %39, %44 : vector<256x128xf32>
    %c2_55 = arith.constant 2 : index
    %c0_56 = arith.constant 0 : index
    %c0_57 = arith.constant 0 : index
    %46 = vector.load %arg9[%c2_55, %c0_56, %c0_57] : memref<18x18x128xbf16, #tpu.memory_space<vmem>>, vector<16x16x128xbf16>
    %47 = vector.shape_cast %46 : vector<16x16x128xbf16> to vector<256x128xbf16>
    %c6 = arith.constant 6 : index
    %c0_58 = arith.constant 0 : index
    %c0_59 = arith.constant 0 : index
    %48 = vector.load %arg5[%c6, %c0_58, %c0_59] : memref<9x128x128xbf16, #tpu.memory_space<vmem>>, vector<1x128x128xbf16>
    %49 = vector.shape_cast %48 : vector<1x128x128xbf16> to vector<128x128xbf16>
    %cst_60 = arith.constant dense<0.000000e+00> : vector<256x128xf32>
    %50 = tpu.matmul %47, %49, %cst_60 {dimension_numbers = #tpu.dot_dimension_numbers<[1], [0], [0], [1], [0, 0, 1, 1], [], []>} : vector<256x128xbf16>, vector<128x128xbf16>, vector<256x128xf32> -> vector<256x128xf32>
    %51 = arith.addf %45, %50 : vector<256x128xf32>
    %c2_61 = arith.constant 2 : index
    %c1_62 = arith.constant 1 : index
    %c0_63 = arith.constant 0 : index
    %52 = vector.load %arg9[%c2_61, %c1_62, %c0_63] : memref<18x18x128xbf16, #tpu.memory_space<vmem>>, vector<16x16x128xbf16>
    %53 = vector.shape_cast %52 : vector<16x16x128xbf16> to vector<256x128xbf16>
    %c7 = arith.constant 7 : index
    %c0_64 = arith.constant 0 : index
    %c0_65 = arith.constant 0 : index
    %54 = vector.load %arg5[%c7, %c0_64, %c0_65] : memref<9x128x128xbf16, #tpu.memory_space<vmem>>, vector<1x128x128xbf16>
    %55 = vector.shape_cast %54 : vector<1x128x128xbf16> to vector<128x128xbf16>
    %cst_66 = arith.constant dense<0.000000e+00> : vector<256x128xf32>
    %56 = tpu.matmul %53, %55, %cst_66 {dimension_numbers = #tpu.dot_dimension_numbers<[1], [0], [0], [1], [0, 0, 1, 1], [], []>} : vector<256x128xbf16>, vector<128x128xbf16>, vector<256x128xf32> -> vector<256x128xf32>
    %57 = arith.addf %51, %56 : vector<256x128xf32>
    %c2_67 = arith.constant 2 : index
    %c2_68 = arith.constant 2 : index
    %c0_69 = arith.constant 0 : index
    %58 = vector.load %arg9[%c2_67, %c2_68, %c0_69] : memref<18x18x128xbf16, #tpu.memory_space<vmem>>, vector<16x16x128xbf16>
    %59 = vector.shape_cast %58 : vector<16x16x128xbf16> to vector<256x128xbf16>
    %c8 = arith.constant 8 : index
    %c0_70 = arith.constant 0 : index
    %c0_71 = arith.constant 0 : index
    %60 = vector.load %arg5[%c8, %c0_70, %c0_71] : memref<9x128x128xbf16, #tpu.memory_space<vmem>>, vector<1x128x128xbf16>
    %61 = vector.shape_cast %60 : vector<1x128x128xbf16> to vector<128x128xbf16>
    %cst_72 = arith.constant dense<0.000000e+00> : vector<256x128xf32>
    %62 = tpu.matmul %59, %61, %cst_72 {dimension_numbers = #tpu.dot_dimension_numbers<[1], [0], [0], [1], [0, 0, 1, 1], [], []>} : vector<256x128xbf16>, vector<128x128xbf16>, vector<256x128xf32> -> vector<256x128xf32>
    %63 = arith.addf %57, %62 : vector<256x128xf32>
    %c0_73 = arith.constant 0 : index
    %c0_74 = arith.constant 0 : index
    %c0_75 = arith.constant 0 : index
    %64 = vector.load %arg6[%c0_73, %c0_74, %c0_75] : memref<1x256x128xf32, #tpu.memory_space<vmem>>, vector<1x256x128xf32>
    %65 = vector.shape_cast %64 : vector<1x256x128xf32> to vector<256x128xf32>
    %66 = vector.shape_cast %63 : vector<256x128xf32> to vector<1x256x128xf32>
    tpu.vector_store %arg6[%c0_73, %c0_74, %c0_75], %66 {strides = array<i32>} : memref<1x256x128xf32, #tpu.memory_space<vmem>>, vector<1x256x128xf32>,
    %cst_76 = arith.constant dense<0.000000e+00> : vector<128xf32>
    %67 = vector.multi_reduction <add>, %63, %cst_76 [0] : vector<256x128xf32> to vector<128xf32>
    %68 = vector.shape_cast %67 : vector<128xf32> to vector<1x128xf32>
    %c0_77 = arith.constant 0 : index
    %c0_78 = arith.constant 0 : index
    %c0_79 = arith.constant 0 : index
    %c0_80 = arith.constant 0 : index
    %69 = vector.load %arg7[%c0_77, %c0_78, %c0_79, %c0_80] : memref<1x1x1x128xf32, #tpu.memory_space<vmem>>, vector<1x1x1x128xf32>
    %70 = vector.shape_cast %69 : vector<1x1x1x128xf32> to vector<1x128xf32>
    %71 = vector.shape_cast %68 : vector<1x128xf32> to vector<1x1x1x128xf32>
    tpu.vector_store %arg7[%c0_77, %c0_78, %c0_79, %c0_80], %71 {strides = array<i32>} : memref<1x1x1x128xf32, #tpu.memory_space<vmem>>, vector<1x1x1x128xf32>,
    %72 = arith.mulf %63, %63 : vector<256x128xf32>
    %cst_81 = arith.constant dense<0.000000e+00> : vector<128xf32>
    %73 = vector.multi_reduction <add>, %72, %cst_81 [0] : vector<256x128xf32> to vector<128xf32>
    %74 = vector.shape_cast %73 : vector<128xf32> to vector<1x128xf32>
    %c0_82 = arith.constant 0 : index
    %c0_83 = arith.constant 0 : index
    %c0_84 = arith.constant 0 : index
    %c0_85 = arith.constant 0 : index
    %75 = vector.load %arg8[%c0_82, %c0_83, %c0_84, %c0_85] : memref<1x1x1x128xf32, #tpu.memory_space<vmem>>, vector<1x1x1x128xf32>
    %76 = vector.shape_cast %75 : vector<1x1x1x128xf32> to vector<1x128xf32>
    %77 = vector.shape_cast %74 : vector<1x128xf32> to vector<1x1x1x128xf32>
    tpu.vector_store %arg8[%c0_82, %c0_83, %c0_84, %c0_85], %77 {strides = array<i32>} : memref<1x1x1x128xf32, #tpu.memory_space<vmem>>, vector<1x1x1x128xf32>,
    return
  }
  func.func @transform_0(%arg0: i32, %arg1: i32) -> (i32, i32, i32, i32) {
    %c0_i32 = arith.constant 0 : i32
    %c0_i32_0 = arith.constant 0 : i32
    %c0_i32_1 = arith.constant 0 : i32
    return %arg0, %arg1, %c0_i32, %c0_i32_0 : i32, i32, i32, i32
  }
  func.func @transform_1(%arg0: i32, %arg1: i32) -> (i32, i32, i32, i32) {
    %c16_i32 = arith.constant 16 : i32
    %0 = arith.muli %arg1, %c16_i32 : i32
    %c16_i32_0 = arith.constant 16 : i32
    %1 = arith.addi %0, %c16_i32_0 : i32
    %c0_i32 = arith.constant 0 : i32
    %c0_i32_1 = arith.constant 0 : i32
    %c0_i32_2 = arith.constant 0 : i32
    return %arg0, %1, %c0_i32, %c0_i32_1 : i32, i32, i32, i32
  }
  func.func @transform_2(%arg0: i32, %arg1: i32) -> (i32, i32, i32, i32) {
    %c16_i32 = arith.constant 16 : i32
    %0 = arith.muli %arg1, %c16_i32 : i32
    %c16_i32_0 = arith.constant 16 : i32
    %1 = arith.addi %0, %c16_i32_0 : i32
    %c1_i32 = arith.constant 1 : i32
    %2 = arith.addi %1, %c1_i32 : i32
    %c0_i32 = arith.constant 0 : i32
    %c0_i32_1 = arith.constant 0 : i32
    %c0_i32_2 = arith.constant 0 : i32
    return %arg0, %2, %c0_i32, %c0_i32_1 : i32, i32, i32, i32
  }
  func.func @transform_3(%arg0: i32, %arg1: i32) -> (i32, i32, i32) {
    %c0_i32 = arith.constant 0 : i32
    %c0_i32_0 = arith.constant 0 : i32
    %c0_i32_1 = arith.constant 0 : i32
    %c0_i32_2 = arith.constant 0 : i32
    return %c0_i32, %c0_i32_0, %c0_i32_1 : i32, i32, i32
  }
  func.func @transform_4(%arg0: i32, %arg1: i32) -> (i32, i32, i32) {
    %c0_i32 = arith.constant 0 : i32
    %c0_i32_0 = arith.constant 0 : i32
    return %arg0, %arg1, %c0_i32 : i32, i32, i32
  }
  func.func @transform_5(%arg0: i32, %arg1: i32) -> (i32, i32, i32, i32) {
    %c0_i32 = arith.constant 0 : i32
    %c0_i32_0 = arith.constant 0 : i32
    %c0_i32_1 = arith.constant 0 : i32
    return %arg0, %arg1, %c0_i32, %c0_i32_0 : i32, i32, i32, i32
  }
  func.func @transform_6(%arg0: i32, %arg1: i32) -> (i32, i32, i32, i32) {
    %c0_i32 = arith.constant 0 : i32
    %c0_i32_0 = arith.constant 0 : i32
    %c0_i32_1 = arith.constant 0 : i32
    return %arg0, %arg1, %c0_i32, %c0_i32_0 : i32, i32, i32, i32
  }
}

module attributes {stable_mosaic.version = 11 : i64} {
  func.func @_bn_relu_res_kernel(%arg0: i32, %arg1: i32, %arg2: memref<1x256x128xf32, #tpu.memory_space<vmem>>, %arg3: memref<1x256x128xf32, #tpu.memory_space<vmem>>, %arg4: memref<1x128xf32, #tpu.memory_space<vmem>>, %arg5: memref<1x128xf32, #tpu.memory_space<vmem>>, %arg6: memref<1x256x128xf32, #tpu.memory_space<vmem>>) attributes {dimension_semantics = [#tpu.dimension_semantics<parallel>, #tpu.dimension_semantics<parallel>], iteration_bounds = array<i64: 2, 1>, scalar_prefetch = 0 : i64, scratch_operands = 0 : i64, tpu.core_type = #tpu.core_type<tc>, window_params = [{transform_indices = @transform_0, window_bounds = array<i64: 1, 256, 128>}, {transform_indices = @transform_1, window_bounds = array<i64: 1, 256, 128>}, {pipeline_mode = #tpu.pipeline_mode<synchronous>, transform_indices = @transform_2, window_bounds = array<i64: 1, 128>}, {pipeline_mode = #tpu.pipeline_mode<synchronous>, transform_indices = @transform_3, window_bounds = array<i64: 1, 128>}, {transform_indices = @transform_4, window_bounds = array<i64: 1, 256, 128>}]} {
    %c0 = arith.constant 0 : index
    %c0_0 = arith.constant 0 : index
    %c0_1 = arith.constant 0 : index
    %0 = vector.load %arg2[%c0, %c0_0, %c0_1] : memref<1x256x128xf32, #tpu.memory_space<vmem>>, vector<1x256x128xf32>
    %c0_2 = arith.constant 0 : index
    %c0_3 = arith.constant 0 : index
    %1 = vector.load %arg4[%c0_2, %c0_3] : memref<1x128xf32, #tpu.memory_space<vmem>>, vector<1x128xf32>
    %2 = vector.shape_cast %1 : vector<1x128xf32> to vector<1x1x128xf32>
    %3 = vector.broadcast %2 : vector<1x1x128xf32> to vector<1x256x128xf32>
    %4 = arith.mulf %0, %3 : vector<1x256x128xf32>
    %c0_4 = arith.constant 0 : index
    %c0_5 = arith.constant 0 : index
    %5 = vector.load %arg5[%c0_4, %c0_5] : memref<1x128xf32, #tpu.memory_space<vmem>>, vector<1x128xf32>
    %6 = vector.shape_cast %5 : vector<1x128xf32> to vector<1x1x128xf32>
    %7 = vector.broadcast %6 : vector<1x1x128xf32> to vector<1x256x128xf32>
    %8 = arith.addf %4, %7 : vector<1x256x128xf32>
    %c0_6 = arith.constant 0 : index
    %c0_7 = arith.constant 0 : index
    %c0_8 = arith.constant 0 : index
    %9 = vector.load %arg3[%c0_6, %c0_7, %c0_8] : memref<1x256x128xf32, #tpu.memory_space<vmem>>, vector<1x256x128xf32>
    %cst = arith.constant 0.000000e+00 : f32
    %10 = vector.broadcast %cst : f32 to vector<1x256x128xf32>
    %11 = arith.maximumf %8, %10 : vector<1x256x128xf32>
    %12 = arith.addf %9, %11 : vector<1x256x128xf32>
    %c0_9 = arith.constant 0 : index
    %c0_10 = arith.constant 0 : index
    %c0_11 = arith.constant 0 : index
    %13 = vector.load %arg6[%c0_9, %c0_10, %c0_11] : memref<1x256x128xf32, #tpu.memory_space<vmem>>, vector<1x256x128xf32>
    tpu.vector_store %arg6[%c0_9, %c0_10, %c0_11], %12 {strides = array<i32>} : memref<1x256x128xf32, #tpu.memory_space<vmem>>, vector<1x256x128xf32>,
    return
  }
  func.func @transform_0(%arg0: i32, %arg1: i32) -> (i32, i32, i32) {
    %c0_i32 = arith.constant 0 : i32
    %c0_i32_0 = arith.constant 0 : i32
    return %arg0, %arg1, %c0_i32 : i32, i32, i32
  }
  func.func @transform_1(%arg0: i32, %arg1: i32) -> (i32, i32, i32) {
    %c0_i32 = arith.constant 0 : i32
    %c0_i32_0 = arith.constant 0 : i32
    return %arg0, %arg1, %c0_i32 : i32, i32, i32
  }
  func.func @transform_2(%arg0: i32, %arg1: i32) -> (i32, i32) {
    %c0_i32 = arith.constant 0 : i32
    %c0_i32_0 = arith.constant 0 : i32
    %c0_i32_1 = arith.constant 0 : i32
    return %c0_i32, %c0_i32_0 : i32, i32
  }
  func.func @transform_3(%arg0: i32, %arg1: i32) -> (i32, i32) {
    %c0_i32 = arith.constant 0 : i32
    %c0_i32_0 = arith.constant 0 : i32
    %c0_i32_1 = arith.constant 0 : i32
    return %c0_i32, %c0_i32_0 : i32, i32
  }
  func.func @transform_4(%arg0: i32, %arg1: i32) -> (i32, i32, i32) {
    %c0_i32 = arith.constant 0 : i32
    %c0_i32_0 = arith.constant 0 : i32
    return %arg0, %arg1, %c0_i32 : i32, i32, i32
  }
}

</mosaic_0001>

<bundles_post_ra>
// kernel: resblock_forward.3
= control target key start
LH: loop header
LB: loop body
LE: loop exit
PB: predicated region body
PF: predicated region fallthrough
CT: control target
= control target key end

     0   :  { %s707_s15 = smov 0   ;;  %s709_s16 = smov 0   ;;  %s1012_s0 = inlined_call_operand.vmem [shape: f32[2,256,128], index: 0, kind: input, shape index: {}]   ;;  %s1013_s1 = inlined_call_operand.vmem [shape: f32[2,256,128], index: 1, kind: input, shape index: {}, may-alias: {1,4}]   ;;  %s1014_s2 = inlined_call_operand.vmem [shape: f32[1,128], index: 2, kind: input, shape index: {}]   ;;  %s1015_s3 = inlined_call_operand.vmem [shape: f32[1,128], index: 3, kind: input, shape index: {}]   ;;  %s1016_s4 = inlined_call_operand.vmem [shape: f32[2,256,128], index: 4, kind: output, shape index: {}, may-alias: {1,4}]  }
   0x1   :  { %s711_s17 = smov 0  }
   0x2 LB: > { %s26_s18 = sadd.s32 1, %s676_s16  ;;  %p620_p0 = scmp.ge.s32.totalorder %s680_s17, 1  ;;  %s680_s17 = sphi %s711_s17, %s14_s17   ;;  %s676_s16 = sphi %s709_s16, %s1018_s16   ;;  %s672_s15 = sphi %s707_s15, %s1017_s15  }
   0x3   : > { %p28_p1 = scmp.ge.s32.totalorder %s26_s18, 2  ;;  %p200_p2 = scmp.lt.s32.totalorder %s680_s17, 3 }
   0x5   : > { %s1020_s18 = smov (%p28_p1, %s26_s18), 0  ;;  %p201_p3 = pnand %p620_p0, %p200_p2 }
   0x6   : > { %p244_p4 = scmp.lt.s32.totalorder (!%p201_p3), %s672_s15, 1 }
   0x7   : > { %204 = sbr.rel (%p201_p3) target bundleno = 65 (0x41), region = 36 }
   0xc   : > { %s1022_s15 = smov (!%p244_p4, %s672_s15), 1  ;;  %v728_v0 = vld [vmem:[%s1014_s2] ss:$0 sm:$0xff] }
   0xd   : > { %s631_s19 = sshll.u32 %s1022_s15, 8  ;;  %v739_v2 = vld [vmem:[%s1015_s3] ss:$0 sm:$0xff] }
   0xe   : > { %s733_s24 = scalar_lea.vmem %s1012_s0, %s631_s19  ;;  %s744_s29 = scalar_lea.vmem %s1013_s1, %s631_s19 }
   0xf   : > { %v273_v1 = vld [vmem:[%s733_s24] sm:$0xff]  ;;  %s752_s6 = scalar_lea.vmem %s1016_s4, %s631_s19  ;;  %v755_v8 = vld [vmem:[%s744_s29 + $0x8] sm:$0xff]  ;;  %v758_v9 = vld [vmem:[%s744_s29 + $0x10] sm:$0xff] }
  0x10   : > { %v312_v3 = vmul.f32 %v728_v0, %v273_v1  ;;  %v383_v5 = vld [vmem:[%s744_s29] sm:$0xff]  ;;  %v761_v10 = vld [vmem:[%s744_s29 + $0x18] sm:$0xff]  ;;  %v767_v12 = vld [vmem:[%s744_s29 + $0x28] sm:$0xff] }
  0x11   : > { %v764_v11 = vld [vmem:[%s744_s29 + $0x20] sm:$0xff]  ;;  %v770_v13 = vld [vmem:[%s744_s29 + $0x30] sm:$0xff]  ;;  %v773_v14 = vld [vmem:[%s744_s29 + $0x38] sm:$0xff] }
  0x12   : > { %v351_v4 = vadd.f32 %v739_v2, %v312_v3  ;;  %v776_v15 = vld [vmem:[%s744_s29 + $0x40] sm:$0xff]  ;;  %v779_v16 = vld [vmem:[%s744_s29 + $0x48] sm:$0xff]  ;;  %v782_v17 = vld [vmem:[%s744_s29 + $0x50] sm:$0xff] }
  0x13   : > { %v785_v18 = vld [vmem:[%s744_s29 + $0x58] sm:$0xff]  ;;  %v788_v19 = vld [vmem:[%s744_s29 + $0x60] sm:$0xff]  ;;  %v791_v20 = vld [vmem:[%s744_s29 + $0x68] sm:$0xff] }
  0x14   : > { %v415_v6 = vmax.f32 %v351_v4, 0.0  ;;  %v794_v21 = vld [vmem:[%s744_s29 + $0x70] sm:$0xff]  ;;  %v797_v22 = vld [vmem:[%s744_s29 + $0x78] sm:$0xff]  ;;  %v800_v23 = vld [vmem:[%s744_s29 + $0x80] sm:$0xff] }
  0x15   : > { %v803_v24 = vld [vmem:[%s744_s29 + $0x88] sm:$0xff]  ;;  %v806_v25 = vld [vmem:[%s744_s29 + $0x90] sm:$0xff]  ;;  %v809_v26 = vld [vmem:[%s744_s29 + $0x98] sm:$0xff] }
  0x16   : > { %v447_v7 = vadd.f32 %v415_v6, %v383_v5  ;;  %v812_v27 = vld [vmem:[%s744_s29 + $0xa0] sm:$0xff]  ;;  %v815_v28 = vld [vmem:[%s744_s29 + $0xa8] sm:$0xff]  ;;  %v818_v29 = vld [vmem:[%s744_s29 + $0xb0] sm:$0xff] }
  0x17   : > { %v821_v30 = vld [vmem:[%s744_s29 + $0xb8] sm:$0xff]  ;;  %v824_v31 = vld [vmem:[%s744_s29 + $0xc0] sm:$0xff]  ;;  %v827_v32 = vld [vmem:[%s744_s29 + $0xc8] sm:$0xff] }
  0x18   : > { %v830_v33 = vld [vmem:[%s744_s29 + $0xd0] sm:$0xff]  ;;  %v833_v34 = vld [vmem:[%s744_s29 + $0xd8] sm:$0xff]  ;;  %v836_v35 = vld [vmem:[%s744_s29 + $0xe0] sm:$0xff] }
  0x19   : > { %v839_v36 = vld [vmem:[%s744_s29 + $0xe8] sm:$0xff]  ;;  %v842_v37 = vld [vmem:[%s744_s29 + $0xf0] sm:$0xff]  ;;  %v845_v38 = vld [vmem:[%s744_s29 + $0xf8] sm:$0xff] }
  0x1a   : > { %479 = vst [vmem:[%s752_s6] sm:$0xff] %v447_v7  ;;  %v274_v39 = vld [vmem:[%s733_s24 + $0x8] sm:$0xff]  ;;  %v275_v40 = vld [vmem:[%s733_s24 + $0x10] sm:$0xff]  ;;  %v276_v41 = vld [vmem:[%s733_s24 + $0x18] sm:$0xff] }
  0x1b   : > { %v313_v42 = vmul.f32 %v728_v0, %v274_v39  ;;  %v314_v43 = vmul.f32 %v728_v0, %v275_v40  ;;  %v315_v44 = vmul.f32 %v728_v0, %v276_v41  ;;  %v277_v45 = vld [vmem:[%s733_s24 + $0x20] sm:$0xff]  ;;  %v278_v46 = vld [vmem:[%s733_s24 + $0x28] sm:$0xff]  ;;  %v279_v47 = vld [vmem:[%s733_s24 + $0x30] sm:$0xff] }
  0x1c   : > { %v316_v48 = vmul.f32 %v728_v0, %v277_v45  ;;  %v317_v49 = vmul.f32 %v728_v0, %v278_v46  ;;  %v318_v50 = vmul.f32 %v728_v0, %v279_v47  ;;  %v280_v51 = vld [vmem:[%s733_s24 + $0x38] sm:$0xff]  ;;  %v281_v52 = vld [vmem:[%s733_s24 + $0x40] sm:$0xff]  ;;  %v282_v7 = vld [vmem:[%s733_s24 + $0x48] sm:$0xff] }
  0x1d   : > { %v352_v53 = vadd.f32 %v739_v2, %v313_v42  ;;  %v353_v54 = vadd.f32 %v739_v2, %v314_v43  ;;  %v354_v55 = vadd.f32 %v739_v2, %v315_v44  ;;  %v319_v56 = vmul.f32 %v728_v0, %v280_v51  ;;  %v283_v39 = vld [vmem:[%s733_s24 + $0x50] sm:$0xff]  ;;  %v284_v40 = vld [vmem:[%s733_s24 + $0x58] sm:$0xff]  ;;  %v285_v45 = vld [vmem:[%s733_s24 + $0x60] sm:$0xff] }
  0x1e   : > { %v355_v57 = vadd.f32 %v739_v2, %v316_v48  ;;  %v356_v58 = vadd.f32 %v739_v2, %v317_v49  ;;  %v357_v59 = vadd.f32 %v739_v2, %v318_v50  ;;  %v320_v60 = vmul.f32 %v728_v0, %v281_v52  ;;  %v286_v46 = vld [vmem:[%s733_s24 + $0x68] sm:$0xff]  ;;  %v287_v47 = vld [vmem:[%s733_s24 + $0x70] sm:$0xff] }
  0x1f   : > { %v416_v61 = vmax.f32 %v352_v53, 0.0  ;;  %v417_v62 = vmax.f32 %v353_v54, 0.0  ;;  %v418_v63 = vmax.f32 %v354_v55, 0.0  ;;  %v358_v1 = vadd.f32 %v739_v2, %v319_v56 }
  0x20   : > { %v419_v3 = vmax.f32 %v355_v57, 0.0  ;;  %v420_v4 = vmax.f32 %v356_v58, 0.0  ;;  %v421_v5 = vmax.f32 %v357_v59, 0.0  ;;  %v359_v6 = vadd.f32 %v739_v2, %v320_v60 }
  0x21   : > { %v448_v41 = vadd.f32 %v416_v61, %v755_v8  ;;  %v449_v42 = vadd.f32 %v417_v62, %v758_v9  ;;  %v450_v43 = vadd.f32 %v418_v63, %v761_v10  ;;  %v422_v44 = vmax.f32 %v358_v1, 0.0  ;;  %v288_v8 = vld [vmem:[%s733_s24 + $0x78] sm:$0xff] }
  0x22   : > { %v451_v48 = vadd.f32 %v419_v3, %v764_v11  ;;  %v452_v49 = vadd.f32 %v420_v4, %v767_v12  ;;  %v453_v50 = vadd.f32 %v421_v5, %v770_v13  ;;  %v423_v51 = vmax.f32 %v359_v6, 0.0  ;;  %v289_v11 = vld [vmem:[%s733_s24 + $0x80] sm:$0xff] }
  0x23   : > { %480 = vst [vmem:[%s752_s6 + $0x8] sm:$0xff] %v448_v41  ;;  %481 = vst [vmem:[%s752_s6 + $0x10] sm:$0xff] %v449_v42  ;;  %v454_v9 = vadd.f32 %v422_v44, %v773_v14  ;;  %v321_v10 = vmul.f32 %v728_v0, %v282_v7  ;;  %v322_v52 = vmul.f32 %v728_v0, %v283_v39  ;;  %v290_v39 = vld [vmem:[%s733_s24 + $0x88] sm:$0xff]  ;;  %v292_v41 = vld [vmem:[%s733_s24 + $0x98] sm:$0xff] }
  0x24   : > { %482 = vst [vmem:[%s752_s6 + $0x18] sm:$0xff] %v450_v43  ;;  %v323_v53 = vmul.f32 %v728_v0, %v284_v40  ;;  %483 = vst [vmem:[%s752_s6 + $0x20] sm:$0xff] %v451_v48  ;;  %v455_v12 = vadd.f32 %v423_v51, %v776_v15  ;;  %v324_v13 = vmul.f32 %v728_v0, %v285_v45  ;;  %v291_v40 = vld [vmem:[%s733_s24 + $0x90] sm:$0xff] }
  0x25   : > { %484 = vst [vmem:[%s752_s6 + $0x28] sm:$0xff] %v452_v49  ;;  %485 = vst [vmem:[%s752_s6 + $0x30] sm:$0xff] %v453_v50  ;;  %v325_v54 = vmul.f32 %v728_v0, %v286_v46  ;;  %v326_v55 = vmul.f32 %v728_v0, %v287_v47  ;;  %v360_v14 = vadd.f32 %v739_v2, %v321_v10  ;;  %v293_v46 = vld [vmem:[%s733_s24 + $0xa0] sm:$0xff]  ;;  %v294_v47 = vld [vmem:[%s733_s24 + $0xa8] sm:$0xff] }
  0x26   : > { %486 = vst [vmem:[%s752_s6 + $0x38] sm:$0xff] %v454_v9  ;;  %v361_v56 = vadd.f32 %v739_v2, %v322_v52  ;;  %v362_v57 = vadd.f32 %v739_v2, %v323_v53  ;;  %v327_v58 = vmul.f32 %v728_v0, %v288_v8  ;;  %487 = vst [vmem:[%s752_s6 + $0x40] sm:$0xff] %v455_v12  ;;  %v295_v48 = vld [vmem:[%s733_s24 + $0xb0] sm:$0xff] }
  0x27   : > { %v363_v15 = vadd.f32 %v739_v2, %v324_v13  ;;  %v364_v59 = vadd.f32 %v739_v2, %v325_v54  ;;  %v365_v60 = vadd.f32 %v739_v2, %v326_v55  ;;  %v328_v61 = vmul.f32 %v728_v0, %v289_v11 }
  0x28   : > { %v424_v62 = vmax.f32 %v360_v14, 0.0  ;;  %v425_v63 = vmax.f32 %v361_v56, 0.0  ;;  %v426_v1 = vmax.f32 %v362_v57, 0.0  ;;  %v366_v3 = vadd.f32 %v739_v2, %v327_v58 }
  0x29   : > { %v427_v4 = vmax.f32 %v363_v15, 0.0  ;;  %v428_v5 = vmax.f32 %v364_v59, 0.0  ;;  %v429_v6 = vmax.f32 %v365_v60, 0.0  ;;  %v367_v7 = vadd.f32 %v739_v2, %v328_v61 }
  0x2a   : > { %v456_v42 = vadd.f32 %v424_v62, %v779_v16  ;;  %v457_v43 = vadd.f32 %v425_v63, %v782_v17  ;;  %v458_v44 = vadd.f32 %v426_v1, %v785_v18  ;;  %v430_v45 = vmax.f32 %v366_v3, 0.0  ;;  %v296_v16 = vld [vmem:[%s733_s24 + $0xb8] sm:$0xff]  ;;  %v298_v63 = vld [vmem:[%s733_s24 + $0xc8] sm:$0xff]  ;;  %v299_v1 = vld [vmem:[%s733_s24 + $0xd0] sm:$0xff] }
  0x2b   : > { %v459_v49 = vadd.f32 %v427_v4, %v788_v19  ;;  %v460_v50 = vadd.f32 %v428_v5, %v791_v20  ;;  %v461_v51 = vadd.f32 %v429_v6, %v794_v21  ;;  %v431_v8 = vmax.f32 %v367_v7, 0.0  ;;  %v297_v19 = vld [vmem:[%s733_s24 + $0xc0] sm:$0xff]  ;;  %v300_v3 = vld [vmem:[%s733_s24 + $0xd8] sm:$0xff] }
  0x2c   : > { %488 = vst [vmem:[%s752_s6 + $0x48] sm:$0xff] %v456_v42  ;;  %489 = vst [vmem:[%s752_s6 + $0x50] sm:$0xff] %v457_v43  ;;  %v462_v17 = vadd.f32 %v430_v45, %v797_v22  ;;  %v329_v18 = vmul.f32 %v728_v0, %v290_v39  ;;  %v330_v9 = vmul.f32 %v728_v0, %v291_v40  ;;  %v301_v39 = vld [vmem:[%s733_s24 + $0xe0] sm:$0xff]  ;;  %v302_v40 = vld [vmem:[%s733_s24 + $0xe8] sm:$0xff] }
  0x2d   : > { %490 = vst [vmem:[%s752_s6 + $0x58] sm:$0xff] %v458_v44  ;;  %v331_v10 = vmul.f32 %v728_v0, %v292_v41  ;;  %491 = vst [vmem:[%s752_s6 + $0x60] sm:$0xff] %v459_v49  ;;  %v463_v20 = vadd.f32 %v431_v8, %v800_v23  ;;  %v332_v21 = vmul.f32 %v728_v0, %v293_v46  ;;  %v303_v41 = vld [vmem:[%s733_s24 + $0xf0] sm:$0xff] }
  0x2e   : > { %492 = vst [vmem:[%s752_s6 + $0x68] sm:$0xff] %v460_v50  ;;  %493 = vst [vmem:[%s752_s6 + $0x70] sm:$0xff] %v461_v51  ;;  %v333_v52 = vmul.f32 %v728_v0, %v294_v47  ;;  %v334_v53 = vmul.f32 %v728_v0, %v295_v48  ;;  %v368_v22 = vadd.f32 %v739_v2, %v329_v18 }
  0x2f   : > { %494 = vst [vmem:[%s752_s6 + $0x78] sm:$0xff] %v462_v17  ;;  %v369_v11 = vadd.f32 %v739_v2, %v330_v9  ;;  %v370_v12 = vadd.f32 %v739_v2, %v331_v10  ;;  %v335_v13 = vmul.f32 %v728_v0, %v296_v16  ;;  %495 = vst [vmem:[%s752_s6 + $0x80] sm:$0xff] %v463_v20 }
  0x30   : > { %v371_v23 = vadd.f32 %v739_v2, %v332_v21  ;;  %v372_v54 = vadd.f32 %v739_v2, %v333_v52  ;;  %v373_v55 = vadd.f32 %v739_v2, %v334_v53  ;;  %v336_v14 = vmul.f32 %v728_v0, %v297_v19 }
  0x31   : > { %v432_v56 = vmax.f32 %v368_v22, 0.0  ;;  %v433_v57 = vmax.f32 %v369_v11, 0.0  ;;  %v434_v58 = vmax.f32 %v370_v12, 0.0  ;;  %v374_v15 = vadd.f32 %v739_v2, %v335_v13 }
  0x32   : > { %v435_v59 = vmax.f32 %v371_v23, 0.0  ;;  %v436_v60 = vmax.f32 %v372_v54, 0.0  ;;  %v437_v61 = vmax.f32 %v373_v55, 0.0  ;;  %v375_v62 = vadd.f32 %v739_v2, %v336_v14 }
  0x33   : > { %v464_v4 = vadd.f32 %v432_v56, %v803_v24  ;;  %v465_v5 = vadd.f32 %v433_v57, %v806_v25  ;;  %v466_v6 = vadd.f32 %v434_v58, %v809_v26  ;;  %v438_v7 = vmax.f32 %v374_v15, 0.0  ;;  %v304_v24 = vld [vmem:[%s733_s24 + $0xf8] sm:$0xff] }
  0x34   : > { %v467_v42 = vadd.f32 %v435_v59, %v812_v27  ;;  %v468_v43 = vadd.f32 %v436_v60, %v815_v28  ;;  %v469_v44 = vadd.f32 %v437_v61, %v818_v29  ;;  %v439_v45 = vmax.f32 %v375_v62, 0.0 }
  0x35   : > { %496 = vst [vmem:[%s752_s6 + $0x88] sm:$0xff] %v464_v4  ;;  %497 = vst [vmem:[%s752_s6 + $0x90] sm:$0xff] %v465_v5  ;;  %v470_v25 = vadd.f32 %v438_v7, %v821_v30  ;;  %v337_v26 = vmul.f32 %v728_v0, %v298_v63  ;;  %v338_v46 = vmul.f32 %v728_v0, %v299_v1 }
  0x36   : > { %498 = vst [vmem:[%s752_s6 + $0x98] sm:$0xff] %v466_v6  ;;  %v339_v47 = vmul.f32 %v728_v0, %v300_v3  ;;  %499 = vst [vmem:[%s752_s6 + $0xa0] sm:$0xff] %v467_v42  ;;  %v471_v27 = vadd.f32 %v439_v45, %v824_v31  ;;  %v340_v28 = vmul.f32 %v728_v0, %v301_v39 }
  0x37   : > { %500 = vst [vmem:[%s752_s6 + $0xa8] sm:$0xff] %v468_v43  ;;  %501 = vst [vmem:[%s752_s6 + $0xb0] sm:$0xff] %v469_v44  ;;  %v341_v29 = vmul.f32 %v728_v0, %v302_v40  ;;  %v342_v48 = vmul.f32 %v728_v0, %v303_v41  ;;  %v376_v30 = vadd.f32 %v739_v2, %v337_v26 }
  0x38   : > { %502 = vst [vmem:[%s752_s6 + $0xb8] sm:$0xff] %v470_v25  ;;  %v377_v49 = vadd.f32 %v739_v2, %v338_v46  ;;  %v378_v50 = vadd.f32 %v739_v2, %v339_v47  ;;  %v343_v51 = vmul.f32 %v728_v0, %v304_v24  ;;  %503 = vst [vmem:[%s752_s6 + $0xc0] sm:$0xff] %v471_v27 }
  0x39   : > { %v379_v8 = vadd.f32 %v739_v2, %v340_v28  ;;  %v380_v31 = vadd.f32 %v739_v2, %v341_v29  ;;  %v381_v16 = vadd.f32 %v739_v2, %v342_v48  ;;  %v440_v17 = vmax.f32 %v376_v30, 0.0 }
  0x3a   : > { %v441_v18 = vmax.f32 %v377_v49, 0.0  ;;  %v442_v9 = vmax.f32 %v378_v50, 0.0  ;;  %v382_v10 = vadd.f32 %v739_v2, %v343_v51 }
  0x3b   : > { %v443_v19 = vmax.f32 %v379_v8, 0.0  ;;  %v444_v0 = vmax.f32 %v380_v31, 0.0  ;;  %v445_v20 = vmax.f32 %v381_v16, 0.0  ;;  %v472_v21 = vadd.f32 %v440_v17, %v827_v32 }
  0x3c   : > { %v473_v52 = vadd.f32 %v441_v18, %v830_v33  ;;  %v474_v53 = vadd.f32 %v442_v9, %v833_v34  ;;  %v446_v22 = vmax.f32 %v382_v10, 0.0 }
  0x3d   : > { %v475_v11 = vadd.f32 %v443_v19, %v836_v35  ;;  %v476_v12 = vadd.f32 %v444_v0, %v839_v36  ;;  %v477_v13 = vadd.f32 %v445_v20, %v842_v37  ;;  %504 = vst [vmem:[%s752_s6 + $0xc8] sm:$0xff] %v472_v21 }
  0x3e   : > { %505 = vst [vmem:[%s752_s6 + $0xd0] sm:$0xff] %v473_v52  ;;  %506 = vst [vmem:[%s752_s6 + $0xd8] sm:$0xff] %v474_v53  ;;  %v478_v2 = vadd.f32 %v446_v22, %v845_v38 }
  0x3f   : > { %507 = vst [vmem:[%s752_s6 + $0xe0] sm:$0xff] %v475_v11  ;;  %508 = vst [vmem:[%s752_s6 + $0xe8] sm:$0xff] %v476_v12 }
  0x40   : > { %509 = vst [vmem:[%s752_s6 + $0xf0] sm:$0xff] %v477_v13  ;;  %510 = vst [vmem:[%s752_s6 + $0xf8] sm:$0xff] %v478_v2 }
  0x41 PF: > { %s14_s17 = sadd.s32 1, %s680_s17   ;;  %s1017_s15 = smov %s676_s16 }
  0x42   : > { %p11_p5 = scmp.ge.s32.totalorder %s14_s17, 4   ;;  %s1018_s16 = smov %s1020_s18 }
  0x44   :  { %13 = sbr.rel (!%p11_p5) target bundleno = 2 (0x2), region = 69 }

// kernel: resblock_forward.2
= control target key start
LH: loop header
LB: loop body
LE: loop exit
PB: predicated region body
PF: predicated region fallthrough
CT: control target
= control target key end

     0   :  { %s7002_s21 = smov 0   ;;  %s7004_s22 = smov 0   ;;  %s9486_s0 = inlined_call_operand.vmem [shape: bf16[2,18,18,128], index: 0, kind: input, shape index: {}, may-alias: {0,1,2}]   ;;  %s9487_s1 = inlined_call_operand.vmem [shape: bf16[2,18,18,128], index: 1, kind: input, shape index: {}, may-alias: {0,1,2}]   ;;  %s9488_s2 = inlined_call_operand.vmem [shape: bf16[2,18,18,128], index: 2, kind: input, shape index: {}, may-alias: {0,1,2}]   ;;  %s9489_s3 = inlined_call_operand.vmem [shape: bf16[9,128,128], index: 3, kind: input, shape index: {}]   ;;  %s9490_s4 = inlined_call_operand.vmem [shape: f32[2,256,128], index: 4, kind: output, shape index: {0}]   ;;  %s9491_s5 = inlined_call_operand.vmem [shape: f32[2,1,1,128], index: 5, kind: output, shape index: {1}]   ;;  %s9492_s6 = inlined_call_operand.vmem [shape: f32[2,1,1,128], index: 6, kind: output, shape index: {2}]  }
   0x1   :  { %s7006_s23 = smov 0  }
   0x2 LB: > { %s29_s24 = sadd.s32 1, %s6961_s22  ;;  %p5714_p0 = scmp.ge.s32.totalorder %s6965_s23, 1  ;;  %s6965_s23 = sphi %s7006_s23, %s17_s23   ;;  %s6961_s22 = sphi %s7004_s22, %s9703_s22   ;;  %s6957_s21 = sphi %s7002_s21, %s9702_s21  }
   0x3   : > { %p31_p1 = scmp.ge.s32.totalorder %s29_s24, 2  ;;  %p301_p2 = scmp.lt.s32.totalorder %s6965_s23, 3 }
   0x5   : > { %s9705_s24 = smov (%p31_p1, %s29_s24), 0  ;;  %p302_p3 = pnand %p5714_p0, %p301_p2 }
   0x7   : > { %305 = sbr.rel (%p302_p3) target bundleno = 584 (0x248), region = 36 }
   0xc   : > { %v6810_v0 = vld [vmem:[%s9489_s3 + $0x78] sm:$0xff]   ;;  %p385_p4 = scmp.lt.s32.totalorder %s6957_s21, 1  ;;  %v6811_v1 = vld [vmem:[%s9489_s3 + $0x70] sm:$0xff]   ;;  %v6812_v2 = vld [vmem:[%s9489_s3 + $0x68] sm:$0xff]   ;;  %vm623_vm0 = vsmask.f32 3328 }
   0xd   : > { %6335 = vmatprep.subr.bf16.mxu0 %v6810_v0  ;;  %6767 = vmatprep.subr.bf16.mxu1 %v6810_v0  ;;  %v6813_v3 = vld [vmem:[%s9489_s3 + $0x60] sm:$0xff]   ;;  %v6814_v12 = vld [vmem:[%s9489_s3 + $0x58] sm:$0xff]   ;;  %v6815_v13 = vld [vmem:[%s9489_s3 + $0x50] sm:$0xff]   ;;  %vm624_vm1 = vsmask.f32 7440  ;;  %vm1653_vm3 = vcmask 1042432  }
   0xe   : > { %s9707_s21 = smov (!%p385_p4, %s6957_s21), 1  ;;  %6336 = vmatpush3.bf16.msra.mxu0 %v6810_v0  ;;  %6775 = vmatpush3.bf16.msra.mxu1 %v6810_v0  ;;  %v6816_v32 = vld [vmem:[%s9489_s3 + $0x48] sm:$0xff]   ;;  %vm7080_vm2 = vmor %vm623_vm0, %vm624_vm1  ;;  %v6817_v47 = vld [vmem:[%s9489_s3 + $0x40] sm:$0xff]   ;;  %vm1654_vm4 = vcmask 1046532  }
   0xf   : > { %6337 = vmatprep.subr.bf16.mxu0 %v6811_v1  ;;  %6768 = vmatprep.subr.bf16.mxu1 %v6811_v1  ;;  %s7032_s7 = smul.u32 216, %s9707_s21  ;;  %vm7375_vm5 = vmor %vm1653_vm3, %vm1654_vm4  ;;  %s447_s13 = scalar_lea.vmem %s9492_s6, %s9707_s21 }
  0x11   : > { %s7038_s10 = scalar_lea.vmem %s9486_s0, %s7032_s7  ;;  %s6115_s16 = sadd.s32 192, %s7032_s7 }
  0x12   : > { %6338 = vmatpush3.bf16.msra.mxu0 %v6811_v1  ;;  %6776 = vmatpush3.bf16.msra.mxu1 %v6811_v1  ;;  %v449_v4 = vld [vmem:[%s7038_s10] sm:$0xff]   ;;  %v451_v5 = vld [vmem:[%s7038_s10 + $0x8] sm:$0x1]  ;;  %v452_v8 = vld [vmem:[%s7038_s10 + $0xc] sm:$0xff]   ;;  %s7909_s27 = scalar_lea.vmem %s9487_s1, %s6115_s16  ;;  %s6117_s14 = sadd.s32 204, %s7032_s7 }
  0x13   : > { %6339 = vmatprep.subr.bf16.mxu0 %v6812_v2  ;;  %6769 = vmatprep.subr.bf16.mxu1 %v6812_v2  ;;  %v473_v6 = vld [vmem:[%s7038_s10 + $0x60] sm:$0xff]   ;;  %497 = vst [vmem:[#allocation2] sm:$0xff] %v449_v4   ;;  %499 = vst [vmem:[#allocation2 + $0x8] sm:$0x1] %v451_v5  ;;  %v475_v7 = vld [vmem:[%s7038_s10 + $0x68] sm:$0x1]  ;;  %s423_s17 = scalar_lea.vmem %s9488_s2, %s6117_s14 }
  0x14   : > { %521 = vst [vmem:[#allocation2 + $0x60] sm:$0xff] %v473_v6   ;;  %v476_v9 = vld [vmem:[%s7038_s10 + $0x6c] sm:$0xff]   ;;  %523 = vst [vmem:[#allocation2 + $0x68] sm:$0x1] %v475_v7  ;;  %v454_v10 = vld [vmem:[%s7038_s10 + $0x14] sm:$0x1] }
  0x15   : > { %500 = vst [vmem:[#allocation2 + $0xc] sm:$0xff] %v452_v8   ;;  %v478_v11 = vld [vmem:[%s7038_s10 + $0x74] sm:$0x1]  ;;  %524 = vst [vmem:[#allocation2 + $0x6c] sm:$0xff] %v476_v9   ;;  %v455_v14 = vld [vmem:[%s7038_s10 + $0x18] sm:$0xff]  }
  0x16   : > { %6340 = vmatpush3.bf16.msra.mxu0 %v6812_v2  ;;  %6777 = vmatpush3.bf16.msra.mxu1 %v6812_v2  ;;  %502 = vst [vmem:[#allocation2 + $0x14] sm:$0x1] %v454_v10  ;;  %526 = vst [vmem:[#allocation2 + $0x74] sm:$0x1] %v478_v11  ;;  %v457_v15 = vld [vmem:[%s7038_s10 + $0x20] sm:$0x1] }
  0x17   : > { %6341 = vmatprep.subr.bf16.mxu0 %v6813_v3  ;;  %6770 = vmatprep.subr.bf16.mxu1 %v6813_v3  ;;  %v479_v16 = vld [vmem:[%s7038_s10 + $0x78] sm:$0xff]   ;;  %503 = vst [vmem:[#allocation2 + $0x18] sm:$0xff] %v455_v14   ;;  %505 = vst [vmem:[#allocation2 + $0x20] sm:$0x1] %v457_v15  ;;  %v458_v57 = vld [vmem:[%s7038_s10 + $0x24] sm:$0xff]  }
  0x18   : > { %527 = vst [vmem:[#allocation2 + $0x78] sm:$0xff] %v479_v16   ;;  %506 = vst [vmem:[#allocation2 + $0x24] sm:$0xff] %v458_v57   ;;  %v482_v0 = vld [vmem:[%s7038_s10 + $0x84] sm:$0xff]   ;;  %v7102_v5 = vld [vmem:[%s9489_s3 + $0x38] sm:$0xff]  }
  0x19   : > { %v481_v6 = vld [vmem:[%s7038_s10 + $0x80] sm:$0x1]  ;;  %530 = vst [vmem:[#allocation2 + $0x84] sm:$0xff] %v482_v0  }
  0x1a   : > { %6342 = vmatpush3.bf16.msra.mxu0 %v6813_v3  ;;  %6778 = vmatpush3.bf16.msra.mxu1 %v6813_v3  ;;  %v7060_v17 = vld [vmem:[#allocation2] sm:$0xf]  ;;  %v7062_v18 = vld [vmem:[#allocation2 + $0x4] sm:$0xf]  ;;  %v7064_v19 = vld [vmem:[#allocation2 + $0x8] sm:$0x1] }
  0x1b   : > { %6343 = vmatprep.subr.bf16.mxu0 %v6814_v12  ;;  %6771 = vmatprep.subr.bf16.mxu1 %v6814_v12  ;;  %v627_v20 = vshrl.u32 %v7060_v17, 16  ;;  %v630_v21 = vshll.u32 %v7060_v17, 16  ;;  %v636_v22 = vshll.u32 %v7062_v18, 16  ;;  %v640_v23 = vshrl.u32 %v7062_v18, 16  ;;  %v575_v24 = vld [vmem:[#allocation2 + $0x60] sm:$0xf] }
  0x1c   : > { %v646_v25 = vshll.u32 %v7064_v19, 16  ;;  %v576_v26 = vld [vmem:[#allocation2 + $0x64] sm:$0xf]  ;;  %v615_v27 = vld [vmem:[#allocation2 + $0x68] sm:$0x1]  ;;  %v819_v34 = vshrl.u32 %v575_v24, 16 }
  0x1d   : > { %v629_v28 = vrot.slane %v627_v20, 4  ;;  %v632_v29 = vrot.slane %v630_v21, 5  ;;  %v638_v30 = vrot.slane %v636_v22, 5  ;;  %v642_v31 = vrot.slane %v640_v23, 4  ;;  %v7074_v41 = vld [vmem:[#allocation2 + $0xc] sm:$0xf] }
  0x1e   : > { %6344 = vmatpush3.bf16.msra.mxu0 %v6814_v12  ;;  %6779 = vmatpush3.bf16.msra.mxu1 %v6814_v12  ;;  %v648_v33 = vrot.slane %v646_v25, 5  ;;  %v822_v35 = vshll.u32 %v575_v24, 16  ;;  %v828_v36 = vshll.u32 %v576_v26, 16  ;;  %v832_v39 = vshrl.u32 %v576_v26, 16  ;;  %v7076_v42 = vld [vmem:[#allocation2 + $0x10] sm:$0xf] }
  0x1f   : > { %6345 = vmatprep.subr.bf16.mxu0 %v6815_v13  ;;  %6772 = vmatprep.subr.bf16.mxu1 %v6815_v13  ;;  %v633_v37 = vor.u32 %v632_v29, %v629_v28  ;;  %v643_v38 = vor.u32 %v642_v31, %v638_v30  ;;  %v838_v40 = vshll.u32 %v615_v27, 16  ;;  %v821_v44 = vrot.slane %v819_v34, 4  ;;  %v7087_v53 = vld [vmem:[#allocation2 + $0x14] sm:$0x1]  ;;  %v577_v62 = vld [vmem:[#allocation2 + $0x6c] sm:$0xf] }
  0x20   : > { %v824_v45 = vrot.slane %v822_v35, 5  ;;  %v830_v46 = vrot.slane %v828_v36, 5  ;;  %v834_v50 = vrot.slane %v832_v39, 4  ;;  %v651_v54 = vshrl.u32 %v7074_v41, 16  ;;  %v578_v63 = vld [vmem:[#allocation2 + $0x70] sm:$0xf] }
  0x21   : > { %v634_v48 = vrot.slane %v633_v37, 4  ;;  %v644_v49 = vrot.slane %v643_v38, 4  ;;  %v840_v51 = vrot.slane %v838_v40, 5  ;;  %v654_v55 = vshll.u32 %v7074_v41, 16  ;;  %v616_v11 = vld [vmem:[#allocation2 + $0x74] sm:$0x1] }
  0x22   : > { %6346 = vmatpush3.bf16.msra.mxu0 %v6815_v13  ;;  %6780 = vmatpush3.bf16.msra.mxu1 %v6815_v13  ;;  %v825_v52 = vor.u32 %v824_v45, %v821_v44  ;;  %v660_v56 = vshll.u32 %v7076_v42, 16  ;;  %v835_v60 = vor.u32 %v834_v50, %v830_v46  ;;  %v664_v61 = vshrl.u32 %v7076_v42, 16  ;;  %v7109_v12 = vld [vmem:[%s9489_s3 + $0xb8] sm:$0xff]   ;;  %529 = vst [vmem:[#allocation2 + $0x80] sm:$0x1] %v481_v6  ;;  %v6821_v50 = vld [vmem:[%s9489_s3 + $0xb0] sm:$0xff]  }
  0x23   : > { %6347 = vmatprep.subr.bf16.mxu0 %v6816_v32  ;;  %6773 = vmatprep.subr.bf16.mxu1 %v6816_v32  ;;  %v639_v58 = vsel %vm7080_vm2, %v634_v48, %v638_v30  ;;  %v649_v59 = vsel %vm7080_vm2, %v644_v49, %v648_v33  ;;  %v653_v3 = vrot.slane %v651_v54, 4  ;;  %v656_v4 = vrot.slane %v654_v55, 5  ;;  %v7114_v20 = vld [vmem:[#allocation2 + $0x18] sm:$0xf]  ;;  %v460_v21 = vld [vmem:[%s7038_s10 + $0x2c] sm:$0x1] }
  0x24   : > { %v5736_v1 = vcombine.low %v639_v58, %v649_v59  ;;  %v826_v2 = vrot.slane %v825_v52, 4  ;;  %v836_v7 = vrot.slane %v835_v60, 4  ;;  %v662_v8 = vrot.slane %v660_v56, 5  ;;  %v7119_v26 = vld [vmem:[#allocation2 + $0x1c] sm:$0xf]  ;;  %v461_v60 = vld [vmem:[%s7038_s10 + $0x30] sm:$0xff]  }
  0x25   : > { %v666_v9 = vrot.slane %v664_v61, 4  ;;  %v670_v10 = vshll.u32 %v7087_v53, 16  ;;  %v657_v15 = vor.u32 %v656_v4, %v653_v3  ;;  %v843_v16 = vshrl.u32 %v577_v62, 16  ;;  %508 = vst [vmem:[#allocation2 + $0x2c] sm:$0x1] %v460_v21  ;;  %v6823_v3 = vld [vmem:[%s9489_s3 + $0xa8] sm:$0xff]  }
  0x26   : > { %6348 = vmatpush3.bf16.msra.mxu0 %v6816_v32  ;;  %6781 = vmatpush3.bf16.msra.mxu1 %v6816_v32  ;;  %v831_v14 = vsel %vm7080_vm2, %v826_v2, %v830_v46  ;;  %v841_v22 = vsel %vm7080_vm2, %v836_v7, %v840_v51  ;;  %v846_v25 = vshll.u32 %v577_v62, 16  ;;  %v484_v27 = vld [vmem:[%s7038_s10 + $0x8c] sm:$0x1]  ;;  %v852_v31 = vshll.u32 %v578_v63, 16  ;;  %v7125_v38 = vld [vmem:[#allocation2 + $0x20] sm:$0x1] }
  0x27   : > { %6349 = vmatprep.subr.bf16.mxu0 %v6817_v47  ;;  %6774 = vmatprep.subr.bf16.mxu1 %v6817_v47  ;;  %v667_v23 = vor.u32 %v666_v9, %v662_v8  ;;  %v672_v24 = vrot.slane %v670_v10, 5  ;;  %v5744_v28 = vcombine.low %v831_v14, %v841_v22  ;;  %v658_v29 = vrot.slane %v657_v15, 4  ;;  %532 = vst [vmem:[#allocation2 + $0x8c] sm:$0x1] %v484_v27  ;;  %v579_v48 = vld [vmem:[#allocation2 + $0x78] sm:$0xf] }
  0x28   : > { %6351 = vmatprep.mubr.bf16.mxu0 %v5736_v1  ;;  %v845_v30 = vrot.slane %v843_v16, 4  ;;  %v848_v33 = vrot.slane %v846_v25, 5  ;;  %v856_v34 = vshrl.u32 %v578_v63, 16  ;;  %v862_v35 = vshll.u32 %v616_v11, 16  ;;  %v580_v59 = vld [vmem:[#allocation2 + $0x7c] sm:$0xf] }
  0x29   : > { %v668_v32 = vrot.slane %v667_v23, 4  ;;  %6367 = vmatprep.mubr.bf16.mxu1 %v5744_v28  ;;  %v663_v36 = vsel %vm7080_vm2, %v658_v29, %v662_v8  ;;  %v854_v37 = vrot.slane %v852_v31, 5  ;;  %v675_v39 = vshrl.u32 %v7114_v20, 16  ;;  %v617_v63 = vld [vmem:[#allocation2 + $0x80] sm:$0x1]  ;;  %509 = vst [vmem:[#allocation2 + $0x30] sm:$0xff] %v461_v60  }
  0x2a   : > { %6350 = vmatpush3.bf16.msra.mxu0 %v6817_v47  ;;  %6782 = vmatpush3.bf16.msra.mxu1 %v6817_v47  ;;  %v678_v40 = vshll.u32 %v7114_v20, 16  ;;  %v849_v45 = vor.u32 %v848_v33, %v845_v30  ;;  %v858_v46 = vrot.slane %v856_v34, 4  ;;  %v864_v47 = vrot.slane %v862_v35, 5  ;;  %v7139_v2 = vld [vmem:[#allocation2 + $0x24] sm:$0xf]  ;;  %v485_v4 = vld [vmem:[%s7038_s10 + $0x90] sm:$0xff]  }
  0x2b   : > { %6383 = vmatprep.subr.bf16.mxu1 %v7102_v5  ;;  %v673_v44 = vsel %vm7080_vm2, %v668_v32, %v672_v24  ;;  %6431 = vmatprep.subr.bf16.mxu0 %v7109_v12  ;;  %v677_v51 = vrot.slane %v675_v39, 4  ;;  %v684_v54 = vshll.u32 %v7119_v26, 16  ;;  %v688_v57 = vshrl.u32 %v7119_v26, 16  ;;  %v7148_v10 = vld [vmem:[#allocation2 + $0x28] sm:$0xf]  ;;  %533 = vst [vmem:[#allocation2 + $0x90] sm:$0xff] %v485_v4  }
  0x2c   : > { %v5737_v49 = vcombine.low %v663_v36, %v673_v44  ;;  %v680_v52 = vrot.slane %v678_v40, 5  ;;  %v850_v55 = vrot.slane %v849_v45, 4  ;;  %v859_v56 = vor.u32 %v858_v46, %v854_v37  ;;  %v464_v11 = vld [vmem:[%s7038_s10 + $0x3c] sm:$0xff]   ;;  %v6820_v14 = vld [vmem:[%s9489_s3 + $0x30] sm:$0xff]   ;;  %v7154_v23 = vld [vmem:[#allocation2 + $0x2c] sm:$0x1] }
  0x2d   : > { %v694_v58 = vshll.u32 %v7125_v38, 16  ;;  %v686_v62 = vrot.slane %v684_v54, 5  ;;  %v867_v0 = vshrl.u32 %v579_v48, 16  ;;  %v870_v1 = vshll.u32 %v579_v48, 16  ;;  %512 = vst [vmem:[#allocation2 + $0x3c] sm:$0xff] %v464_v11   ;;  %v6825_v33 = vld [vmem:[%s9489_s3 + $0xa0] sm:$0xff]  }
  0x2e   : > { %6352 = vmatmul.mubr.bf16.vlgmr.msra.gmra.mxu0 %v5737_v49  ;;  %v681_v61 = vor.u32 %v680_v52, %v677_v51  ;;  %v855_v6 = vsel %vm7080_vm2, %v850_v55, %v854_v37  ;;  %v860_v7 = vrot.slane %v859_v56, 4  ;;  %v690_v8 = vrot.slane %v688_v57, 4  ;;  %v7160_v32 = vld [vmem:[#allocation2 + $0x84] sm:$0xf]  ;;  %v488_v34 = vld [vmem:[%s7038_s10 + $0x9c] sm:$0xff]  }
  0x2f   : > { %6432 = vmatpush3.bf16.msra.mxu0 %v7109_v12  ;;  %v696_v9 = vrot.slane %v694_v58, 5  ;;  %v869_v16 = vrot.slane %v867_v0, 4  ;;  %v872_v21 = vrot.slane %v870_v1, 5  ;;  %v876_v22 = vshll.u32 %v580_v59, 16  ;;  %v463_v40 = vld [vmem:[%s7038_s10 + $0x38] sm:$0x1] }
  0x30   : > { %6433 = vmatprep.subr.bf16.mxu0 %v6821_v50  ;;  %v682_v15 = vrot.slane %v681_v61, 4  ;;  %v865_v12 = vsel %vm7080_vm2, %v860_v7, %v864_v47  ;;  %v691_v24 = vor.u32 %v690_v8, %v686_v62  ;;  %v880_v25 = vshrl.u32 %v580_v59, 16  ;;  %536 = vst [vmem:[#allocation2 + $0x9c] sm:$0xff] %v488_v34   ;;  %511 = vst [vmem:[#allocation2 + $0x38] sm:$0x1] %v463_v40 }
  0x31   : > { %v886_v27 = vshll.u32 %v617_v63, 16  ;;  %v5745_v28 = vcombine.low %v855_v6, %v865_v12  ;;  %v873_v30 = vor.u32 %v872_v21, %v869_v16  ;;  %v878_v31 = vrot.slane %v876_v22, 5  ;;  %v487_v48 = vld [vmem:[%s7038_s10 + $0x98] sm:$0x1]  ;;  %v7176_v54 = vld [vmem:[#allocation2 + $0x88] sm:$0xf] }
  0x32   : > { %v687_v29 = vsel %vm7080_vm2, %v682_v15, %v686_v62  ;;  %v692_v35 = vrot.slane %v691_v24, 4  ;;  %v882_v36 = vrot.slane %v880_v25, 4  ;;  %v699_v39 = vshrl.u32 %v7139_v2, 16  ;;  %535 = vst [vmem:[#allocation2 + $0x98] sm:$0x1] %v487_v48 }
  0x33   : > { %6434 = vmatpush3.bf16.msra.mxu0 %v6821_v50  ;;  %v888_v37 = vrot.slane %v886_v27, 5  ;;  %6368 = vmatmul.mubr.bf16.vlgmr.msra.gmra.mxu1 %v5745_v28  ;;  %v874_v44 = vrot.slane %v873_v30, 4  ;;  %v702_v45 = vshll.u32 %v7139_v2, 16  ;;  %v708_v46 = vshll.u32 %v7148_v10, 16  ;;  %v7180_v59 = vld [vmem:[#allocation2 + $0x8c] sm:$0x1] }
  0x34   : > { %v712_v47 = vshrl.u32 %v7148_v10, 16  ;;  %6435 = vmatprep.subr.bf16.mxu0 %v6823_v3  ;;  %6384 = vmatpush3.bf16.msra.mxu1 %v7102_v5  ;;  %v697_v49 = vsel %vm7080_vm2, %v692_v35, %v696_v9  ;;  %v883_v50 = vor.u32 %v882_v36, %v878_v31  ;;  %v701_v51 = vrot.slane %v699_v39, 4  ;;  %v6822_v5 = vld [vmem:[%s9489_s3 + $0x28] sm:$0xff]   ;;  %v466_v0 = vld [vmem:[%s7038_s10 + $0x44] sm:$0x1] }
  0x35   : > { %v718_v52 = vshll.u32 %v7154_v23, 16  ;;  %6385 = vmatprep.subr.bf16.mxu1 %v6820_v14  ;;  %v5738_v55 = vcombine.low %v687_v29, %v697_v49  ;;  %v879_v56 = vsel %vm7080_vm2, %v874_v44, %v878_v31  ;;  %v704_v57 = vrot.slane %v702_v45, 5  ;;  %v7190_v8 = vld [vmem:[#allocation2 + $0x30] sm:$0xf]  ;;  %514 = vst [vmem:[#allocation2 + $0x44] sm:$0x1] %v466_v0 }
  0x36   : > { %v710_v58 = vrot.slane %v708_v46, 5  ;;  %v884_v60 = vrot.slane %v883_v50, 4  ;;  %v714_v61 = vrot.slane %v712_v47, 4  ;;  %v891_v63 = vshrl.u32 %v7160_v32, 16  ;;  %v7195_v16 = vld [vmem:[#allocation2 + $0x34] sm:$0xf] }
  0x37   : > { %v720_v62 = vrot.slane %v718_v52, 5  ;;  %6436 = vmatpush3.bf16.msra.mxu0 %v6823_v3  ;;  %6355 = vmatprep.mubr.bf16.mxu0 %v5738_v55  ;;  %v705_v1 = vor.u32 %v704_v57, %v701_v51  ;;  %v894_v4 = vshll.u32 %v7160_v32, 16  ;;  %v900_v6 = vshll.u32 %v7176_v54, 16  ;;  %v490_v21 = vld [vmem:[%s7038_s10 + $0xa4] sm:$0x1]  ;;  %v6826_v55 = vld [vmem:[%s9489_s3 + $0x18] sm:$0xff]  }
  0x38   : > { %v904_v7 = vshrl.u32 %v7176_v54, 16  ;;  %6437 = vmatprep.subr.bf16.mxu0 %v6825_v33  ;;  %6386 = vmatpush3.bf16.msra.mxu1 %v6820_v14  ;;  %v889_v9 = vsel %vm7080_vm2, %v884_v60, %v888_v37  ;;  %v715_v11 = vor.u32 %v714_v61, %v710_v58  ;;  %v893_v3 = vrot.slane %v891_v63, 4  ;;  %v6824_v27 = vld [vmem:[%s9489_s3 + $0x20] sm:$0xff]   ;;  %538 = vst [vmem:[#allocation2 + $0xa4] sm:$0x1] %v490_v21  ;;  %v6827_v14 = vld [vmem:[%s9489_s3 + $0x98] sm:$0xff]  }
  0x39   : > { %v910_v15 = vshll.u32 %v7180_v59, 16  ;;  %v5746_v22 = vcombine.low %v879_v56, %v889_v9  ;;  %v706_v12 = vrot.slane %v705_v1, 4  ;;  %v896_v24 = vrot.slane %v894_v4, 5  ;;  %6387 = vmatprep.subr.bf16.mxu1 %v6822_v5  ;;  %v7205_v34 = vld [vmem:[#allocation2 + $0x90] sm:$0xf] }
  0x3a   : > { %v902_v25 = vrot.slane %v900_v6, 5  ;;  %v716_v28 = vrot.slane %v715_v11, 4  ;;  %v906_v29 = vrot.slane %v904_v7, 4  ;;  %v723_v31 = vshrl.u32 %v7190_v8, 16  ;;  %v7209_v37 = vld [vmem:[#allocation2 + $0x38] sm:$0x1] }
  0x3b   : > { %v912_v30 = vrot.slane %v910_v15, 5  ;;  %6438 = vmatpush3.bf16.msra.mxu0 %v6825_v33  ;;  %6371 = vmatprep.mubr.bf16.mxu1 %v5746_v22  ;;  %v711_v35 = vsel %vm7080_vm2, %v706_v12, %v710_v58  ;;  %v897_v36 = vor.u32 %v896_v24, %v893_v3  ;;  %v726_v39 = vshll.u32 %v7190_v8, 16  ;;  %v7213_v44 = vld [vmem:[#allocation2 + $0x94] sm:$0xf]  ;;  %v7218_v52 = vld [vmem:[#allocation2 + $0x3c] sm:$0xf] }
  0x3c   : > { %v732_v40 = vshll.u32 %v7195_v16, 16  ;;  %6439 = vmatprep.subr.bf16.mxu0 %v6827_v14  ;;  %v721_v33 = vsel %vm7080_vm2, %v716_v28, %v720_v62  ;;  %v907_v45 = vor.u32 %v906_v29, %v902_v25  ;;  %6388 = vmatpush3.bf16.msra.mxu1 %v6822_v5  ;;  %v725_v46 = vrot.slane %v723_v31, 4  ;;  %v7224_v60 = vld [vmem:[#allocation2 + $0x98] sm:$0x1]  ;;  %v7227_v61 = vld [vmem:[#allocation2 + $0x40] sm:$0xf] }
  0x3d   : > { %v736_v47 = vshrl.u32 %v7195_v16, 16  ;;  %v5739_v48 = vcombine.low %v711_v35, %v721_v33  ;;  %v898_v49 = vrot.slane %v897_v36, 4  ;;  %6389 = vmatprep.subr.bf16.mxu1 %v6824_v27  ;;  %v728_v50 = vrot.slane %v726_v39, 5  ;;  %v6828_v11 = vld [vmem:[%s9489_s3 + $0x10] sm:$0xff]   ;;  %v7240_v12 = vld [vmem:[#allocation2 + $0x44] sm:$0x1] }
  0x3e   : > { %v734_v51 = vrot.slane %v732_v40, 5  ;;  %v908_v56 = vrot.slane %v907_v45, 4  ;;  %v742_v58 = vshll.u32 %v7209_v37, 16  ;;  %v915_v5 = vshrl.u32 %v7205_v34, 16  ;;  %v7242_v24 = vld [vmem:[#allocation2 + $0x9c] sm:$0xf] }
  0x3f   : > { %v738_v57 = vrot.slane %v736_v47, 4  ;;  %6440 = vmatpush3.bf16.msra.mxu0 %v6827_v14  ;;  %v903_v62 = vsel %vm7080_vm2, %v898_v49, %v902_v25  ;;  %v729_v63 = vor.u32 %v728_v50, %v725_v46  ;;  %v918_v0 = vshll.u32 %v7205_v34, 16  ;;  %v6829_v25 = vld [vmem:[%s9489_s3 + $0x90] sm:$0xff]   ;;  %v467_v40 = vld [vmem:[%s7038_s10 + $0x48] sm:$0xff]  }
  0x40   : > { %6356 = vmatmul.mubr.bf16.gmra.mxu0 %v5739_v48  ;;  %v924_v1 = vshll.u32 %v7213_v44, 16  ;;  %v913_v4 = vsel %vm7080_vm2, %v908_v56, %v912_v30  ;;  %6390 = vmatpush3.bf16.msra.mxu1 %v6824_v27  ;;  %v744_v7 = vrot.slane %v742_v58, 5  ;;  %v917_v9 = vrot.slane %v915_v5, 4  ;;  %v7250_v30 = vld [vmem:[#allocation2 + $0xa0] sm:$0xf]  ;;  %v491_v45 = vld [vmem:[%s7038_s10 + $0xa8] sm:$0xff]  }
  0x41   : > { %v739_v6 = vor.u32 %v738_v57, %v734_v51  ;;  %v5747_v3 = vcombine.low %v903_v62, %v913_v4  ;;  %v730_v15 = vrot.slane %v729_v63, 4  ;;  %v920_v21 = vrot.slane %v918_v0, 5  ;;  %6391 = vmatprep.subr.bf16.mxu1 %v6826_v55  ;;  %6441 = vmatprep.subr.bf16.mxu0 %v6829_v25  ;;  %v469_v33 = vld [vmem:[%s7038_s10 + $0x50] sm:$0x1]  ;;  %515 = vst [vmem:[#allocation2 + $0x48] sm:$0xff] %v467_v40  }
  0x42   : > { %v7238_v22 = vrot.slane %v924_v1, 5  ;;  %v928_v14 = vshrl.u32 %v7213_v44, 16  ;;  %v934_v28 = vshll.u32 %v7224_v60, 16  ;;  %v747_v29 = vshrl.u32 %v7218_v52, 16  ;;  %517 = vst [vmem:[#allocation2 + $0x50] sm:$0x1] %v469_v33 }
  0x43   : > { %v740_v27 = vrot.slane %v739_v6, 4  ;;  %6372 = vmatmul.mubr.bf16.gmra.mxu1 %v5747_v3  ;;  %v735_v31 = vsel %vm7080_vm2, %v730_v15, %v734_v51  ;;  %v921_v35 = vor.u32 %v920_v21, %v917_v9  ;;  %v750_v36 = vshll.u32 %v7218_v52, 16  ;;  %6442 = vmatpush3.bf16.msra.mxu0 %v6829_v25  ;;  %v493_v50 = vld [vmem:[%s7038_s10 + $0xb0] sm:$0x1]  ;;  %539 = vst [vmem:[#allocation2 + $0xa8] sm:$0xff] %v491_v45   ;;  %v470_v51 = vld [vmem:[%s7038_s10 + $0x54] sm:$0xff]  }
  0x44   : > { %v756_v39 = vshll.u32 %v7227_v61, 16  ;;  %v930_v47 = vrot.slane %v928_v14, 4  ;;  %v936_v48 = vrot.slane %v934_v28, 5  ;;  %v749_v49 = vrot.slane %v747_v29, 4  ;;  %6392 = vmatpush3.bf16.msra.mxu1 %v6826_v55  ;;  %v7265_v62 = vld [vmem:[#allocation2 + $0xa4] sm:$0x1] }
  0x45   : > { %v745_v46 = vsel %vm7080_vm2, %v740_v27, %v744_v7  ;;  %v922_v57 = vrot.slane %v921_v35, 4  ;;  %v752_v58 = vrot.slane %v750_v36, 5  ;;  %6393 = vmatprep.subr.bf16.mxu1 %v6828_v11  ;;  %541 = vst [vmem:[#allocation2 + $0xb0] sm:$0x1] %v493_v50  ;;  %v472_v63 = vld [vmem:[%s7038_s10 + $0x5c] sm:$0x1] }
  0x46   : > { %v5740_v56 = vcombine.low %v735_v31, %v745_v46  ;;  %v7263_v5 = vrot.slane %v756_v39, 5  ;;  %518 = vst [vmem:[#allocation2 + $0x54] sm:$0xff] %v470_v51   ;;  %v494_v55 = vld [vmem:[%s7038_s10 + $0xb4] sm:$0xff]   ;;  %v931_v0 = vor.u32 %v930_v47, %v7238_v22  ;;  %v760_v1 = vshrl.u32 %v7227_v61, 16  ;;  %520 = vst [vmem:[#allocation2 + $0x5c] sm:$0x1] %v472_v63 }
  0x47   : > { %v766_v4 = vshll.u32 %v7240_v12, 16  ;;  %v939_v6 = vshrl.u32 %v7242_v24, 16  ;;  %v496_v7 = vld [vmem:[%s7038_s10 + $0xbc] sm:$0x1]  ;;  %542 = vst [vmem:[#allocation2 + $0xb4] sm:$0xff] %v494_v55   ;;  %v6830_v9 = vld [vmem:[%s9489_s3 + $0x8] sm:$0xff]   ;;  %v927_v3 = vsel %vm7080_vm2, %v922_v57, %v7238_v22  ;;  %v753_v15 = vor.u32 %v752_v58, %v749_v49  ;;  %s441_s10 = scalar_lea.vmem %s9491_s5, %s9707_s21 }
  0x48   : > { %6359 = vmatprep.mubr.bf16.mxu0 %v5740_v56  ;;  %v942_v21 = vshll.u32 %v7242_v24, 16  ;;  %v948_v25 = vshll.u32 %v7250_v30, 16  ;;  %544 = vst [vmem:[#allocation2 + $0xbc] sm:$0x1] %v496_v7  ;;  %v932_v27 = vrot.slane %v931_v0, 4  ;;  %v762_v14 = vrot.slane %v760_v1, 4  ;;  %6394 = vmatpush3.bf16.msra.mxu1 %v6828_v11 }
  0x49   : > { %v768_v28 = vrot.slane %v766_v4, 5  ;;  %v941_v29 = vrot.slane %v939_v6, 4  ;;  %v754_v31 = vrot.slane %v753_v15, 4  ;;  %v952_v39 = vshrl.u32 %v7250_v30, 16  ;;  %6395 = vmatprep.subr.bf16.mxu1 %v6830_v9  ;;  %v6831_v45 = vld [vmem:[%s9489_s3 + $0x88] sm:$0xff]   ;;  %v6832_v56 = vld [vmem:[%s9489_s3] sm:$0xff]  }
  0x4a   : > { %v944_v35 = vrot.slane %v942_v21, 5  ;;  %v950_v36 = vrot.slane %v948_v25, 5  ;;  %v937_v22 = vsel %vm7080_vm2, %v932_v27, %v936_v48  ;;  %v763_v40 = vor.u32 %v762_v14, %v7263_v5  ;;  %v7295_v51 = vld [vmem:[#allocation2 + $0x48] sm:$0xf]  ;;  %v7297_v48 = vld [vmem:[#allocation2 + $0x4c] sm:$0xf]  ;;  %6443 = vmatprep.subr.bf16.mxu0 %v6831_v45 }
  0x4b   : > { %v958_v33 = vshll.u32 %v7265_v62, 16  ;;  %v5748_v46 = vcombine.low %v927_v3, %v937_v22  ;;  %v759_v47 = vsel %vm7080_vm2, %v754_v31, %v7263_v5  ;;  %v954_v50 = vrot.slane %v952_v39, 4  ;;  %v7302_v63 = vld [vmem:[#allocation2 + $0x50] sm:$0x1]  ;;  %v7308_v7 = vld [vmem:[#allocation2 + $0xa8] sm:$0xf]  ;;  %6444 = vmatpush3.bf16.msra.mxu0 %v6831_v45 }
  0x4c   : > { %v945_v49 = vor.u32 %v944_v35, %v941_v29  ;;  %v764_v57 = vrot.slane %v763_v40, 4  ;;  %v771_v55 = vshrl.u32 %v7295_v51, 16  ;;  %v774_v0 = vshll.u32 %v7295_v51, 16  ;;  %6396 = vmatpush3.bf16.msra.mxu1 %v6830_v9  ;;  %v6833_v3 = vld [vmem:[%s9489_s3 + $0x80] sm:$0xff]   ;;  %v7316_v27 = vld [vmem:[#allocation2 + $0xac] sm:$0xf] }
  0x4d   : > { %v960_v58 = vrot.slane %v958_v33, 5  ;;  %6375 = vmatprep.mubr.bf16.mxu1 %v5748_v46  ;;  %v955_v1 = vor.u32 %v954_v50, %v950_v36  ;;  %v780_v4 = vshll.u32 %v7297_v48, 16  ;;  %v784_v6 = vshrl.u32 %v7297_v48, 16  ;;  %6397 = vmatprep.subr.bf16.mxu1 %v6832_v56  ;;  %v7321_v14 = vld [vmem:[%s9489_s3 + $0xf8] sm:$0xff]   ;;  %v7325_v33 = vld [vmem:[#allocation2 + $0xb0] sm:$0x1] }
  0x4e   : > { %v946_v5 = vrot.slane %v945_v49, 4  ;;  %v769_v15 = vsel %vm7080_vm2, %v764_v57, %v768_v28  ;;  %v773_v21 = vrot.slane %v771_v55, 4  ;;  %v776_v25 = vrot.slane %v774_v0, 5  ;;  %6445 = vmatprep.subr.bf16.mxu0 %v6833_v3  ;;  %9508 = vst [vmem:[#allocation3_spill] sm:$0xff] %v7325_v33  ;;  %v7331_v46 = vld [vmem:[%s9489_s3 + $0x138] sm:$0xff]  }
  0x4f   : > { %v790_v9 = vshll.u32 %v7302_v63, 16  ;;  %v5741_v29 = vcombine.low %v759_v47, %v769_v15  ;;  %v956_v35 = vrot.slane %v955_v1, 4  ;;  %v782_v39 = vrot.slane %v780_v4, 5  ;;  %v7338_v57 = vld [vmem:[#allocation2 + $0x54] sm:$0xf]  ;;  %6446 = vmatpush3.bf16.msra.mxu0 %v6833_v3 }
  0x50   : > { %v951_v31 = vsel %vm7080_vm2, %v946_v5, %v950_v36  ;;  %v777_v28 = vor.u32 %v776_v25, %v773_v21  ;;  %v786_v22 = vrot.slane %v784_v6, 4  ;;  %v963_v45 = vshrl.u32 %v7308_v7, 16  ;;  %6398 = vmatpush3.bf16.msra.mxu1 %v6832_v56  ;;  %9509 = vst [vmem:[#allocation4_spill] sm:$0xff] %v7338_v57  ;;  %v7341_v1 = vld [vmem:[#allocation2 + $0x58] sm:$0xf]  ;;  %6527 = vmatprep.subr.bf16.mxu0 %v7331_v46 }
  0x51   : > { %v792_v40 = vrot.slane %v790_v9, 5  ;;  %6360 = vmatmul.mubr.bf16.gmra.mxu0 %v5741_v29  ;;  %v961_v36 = vsel %vm7080_vm2, %v956_v35, %v960_v58  ;;  %v966_v47 = vshll.u32 %v7308_v7, 16  ;;  %v972_v49 = vshll.u32 %v7316_v27, 16  ;;  %6479 = vmatprep.subr.bf16.mxu1 %v7321_v14  ;;  %v7344_v21 = vld [vmem:[#allocation2 + $0x5c] sm:$0x1] }
  0x52   : > { %v976_v50 = vshrl.u32 %v7316_v27, 16  ;;  %v5749_v56 = vcombine.low %v951_v31, %v961_v36  ;;  %v778_v55 = vrot.slane %v777_v28, 4  ;;  %v787_v0 = vor.u32 %v786_v22, %v782_v39 }
  0x53   : > { %v965_v5 = vrot.slane %v963_v45, 4  ;;  %v968_v58 = vrot.slane %v966_v47, 5  ;;  %v974_v4 = vrot.slane %v972_v49, 5  ;;  %v982_v15 = vshll.u32 %v7325_v33, 16  ;;  %v7352_v45 = vld [vmem:[#allocation2 + $0xb4] sm:$0xf] }
  0x54   : > { %v978_v6 = vrot.slane %v976_v50, 4  ;;  %6376 = vmatmul.mubr.bf16.gmra.mxu1 %v5749_v56  ;;  %v783_v25 = vsel %vm7080_vm2, %v778_v55, %v782_v39  ;;  %v788_v9 = vrot.slane %v787_v0, 4  ;;  %v795_v29 = vshrl.u32 %v7338_v57, 16  ;;  %9510 = vst [vmem:[#allocation5_spill] sm:$0xff] %v7352_v45  ;;  %v7357_v39 = vld [vmem:[#allocation2 + $0xb8] sm:$0xf] }
  0x55   : > { %v798_v3 = vshll.u32 %v7338_v57, 16  ;;  %v969_v31 = vor.u32 %v968_v58, %v965_v5  ;;  %v984_v28 = vrot.slane %v982_v15, 5  ;;  %v804_v22 = vshll.u32 %v7341_v1, 16  ;;  %v7359_v5 = vld [vmem:[#allocation2 + $0xbc] sm:$0x1] }
  0x56   : > { %v979_v35 = vor.u32 %v978_v6, %v974_v4  ;;  %v793_v36 = vsel %vm7080_vm2, %v788_v9, %v792_v40  ;;  %v797_v47 = vrot.slane %v795_v29, 4  ;;  %v808_v50 = vshrl.u32 %v7341_v1, 16  ;;  %v1605_v58 = vld [vmem:[#allocation2] sm:$0xe]  ;;  %v1607_v33 = vld [vmem:[#allocation2 + $0x18] sm:$0xe] }
  0x57   : > { %v800_v49 = vrot.slane %v798_v3, 5  ;;  %v5742_v56 = vcombine.low %v783_v25, %v793_v36  ;;  %v970_v55 = vrot.slane %v969_v31, 4  ;;  %v806_v11 = vrot.slane %v804_v22, 5  ;;  %v1606_v36 = vld [vmem:[#allocation2 + $0xc] sm:$0xe] }
  0x58   : > { %v980_v0 = vrot.slane %v979_v35, 4  ;;  %v810_v15 = vrot.slane %v808_v50, 4  ;;  %v814_v13 = vshll.u32 %v7344_v21, 16  ;;  %v987_v57 = vshrl.u32 %v7352_v45, 16 }
  0x59   : > { %v801_v6 = vor.u32 %v800_v49, %v797_v47  ;;  %6363 = vmatprep.mubr.bf16.mxu0 %v5742_v56  ;;  %v975_v40 = vsel %vm7080_vm2, %v970_v55, %v974_v4  ;;  %v990_v25 = vshll.u32 %v7352_v45, 16  ;;  %v996_v29 = vshll.u32 %v7357_v39, 16 }
  0x5a   : > { %v985_v9 = vsel %vm7080_vm2, %v980_v0, %v984_v28  ;;  %v811_v35 = vor.u32 %v810_v15, %v806_v11  ;;  %v816_v22 = vrot.slane %v814_v13, 5  ;;  %v989_v47 = vrot.slane %v987_v57, 4 }
  0x5b   : > { %v5750_v3 = vcombine.low %v975_v40, %v985_v9  ;;  %v802_v31 = vrot.slane %v801_v6, 4  ;;  %v992_v49 = vrot.slane %v990_v25, 5  ;;  %v998_v50 = vrot.slane %v996_v29, 5 }
  0x5c   : > { %v1000_v56 = vshrl.u32 %v7357_v39, 16  ;;  %v812_v28 = vrot.slane %v811_v35, 4  ;;  %v1006_v55 = vshll.u32 %v7359_v5, 16  ;;  %v5784_v0 = vrot.slane %v1605_v58, 9  ;;  %v1608_v35 = vld [vmem:[#allocation2 + $0x24] sm:$0xe] }
  0x5d   : > { %6379 = vmatprep.mubr.bf16.mxu1 %v5750_v3  ;;  %v807_v4 = vsel %vm7080_vm2, %v802_v31, %v806_v11  ;;  %v993_v45 = vor.u32 %v992_v49, %v989_v47  ;;  %v1658_v57 = vrot.slane %v7062_v18, 5  ;;  %v5785_v6 = vrot.slane %v1606_v36, 9 }
  0x5e   : > { %v1002_v40 = vrot.slane %v1000_v56, 4  ;;  %v1668_v15 = vrot.slane %v7087_v53, 5  ;;  %v817_v11 = vsel %vm7080_vm2, %v812_v28, %v816_v22  ;;  %v1665_v9 = vrot.slane %v7076_v42, 5 }
  0x5f   : > { %v5762_v58 = vcombine.low %v7114_v20, %v7119_v26  ;;  %v5743_v25 = vcombine.low %v807_v4, %v817_v11  ;;  %v994_v29 = vrot.slane %v993_v45, 4  ;;  %v1008_v31 = vrot.slane %v1006_v55, 5  ;;  %v6844_v20 = vld [vmem:[%s9489_s3 + $0xe8] sm:$0xff]  }
  0x60   : > { %v1003_v3 = vor.u32 %v1002_v40, %v998_v50  ;;  %v1659_v47 = vsel %vm7375_vm5, %v5784_v0, %v1658_v57  ;;  %v1660_v49 = vrot.slane %v1658_v57, 4  ;;  %v1667_v36 = vrot.slane %v1665_v9, 4 }
  0x61   : > { %v5786_v56 = vrot.slane %v1607_v33, 9  ;;  %6364 = vmatmul.mubr.bf16.gmra.mxu0 %v5743_v25  ;;  %v999_v53 = vsel %vm7080_vm2, %v994_v29, %v998_v50  ;;  %v1666_v28 = vsel %vm7375_vm5, %v5785_v6, %v1665_v9  ;;  %v1672_v4 = vrot.slane %v7119_v26, 5  ;;  %v1609_v50 = vld [vmem:[#allocation2 + $0x30] sm:$0xe] }
  0x62   : > { %v1004_v22 = vrot.slane %v1003_v3, 4  ;;  %v9513_v45 = vrot.slane %v7064_v19, 5  ;;  %v1669_v0 = vsel %vm7375_vm5, %v1667_v36, %v1668_v15  ;;  %v1675_v33 = vrot.slane %v7125_v38, 5  ;;  %v1610_v36 = vld [vmem:[#allocation2 + $0x3c] sm:$0xe] }
  0x63   : > { %v5763_v40 = vcombine.low %v7139_v2, %v7148_v10  ;;  %v5760_v6 = vcombine.low %v7060_v17, %v7062_v18  ;;  %v5787_v19 = vrot.slane %v1608_v35, 9  ;;  %v1673_v25 = vsel %vm7375_vm5, %v5786_v56, %v1672_v4  ;;  %v7532_v2 = vld [vmem:[#allocation2 + $0x7c] sm:$0xf] }
  0x64   : > { %v1662_v55 = vsel %vm7375_vm5, %v1660_v49, %v9513_v45  ;;  %v1009_v57 = vsel %vm7080_vm2, %v1004_v22, %v1008_v31  ;;  %v1674_v29 = vrot.slane %v1672_v4, 4  ;;  %v1679_v15 = vrot.slane %v7148_v10, 5  ;;  %v1612_v45 = vld [vmem:[#allocation2 + $0x54] sm:$0xe] }
  0x65   : > { %v5816_v11 = vcombine.low %v1659_v47, %v1662_v55  ;;  %v5751_v9 = vcombine.low %v999_v53, %v1009_v57  ;;  %v5817_v38 = vcombine.low %v1666_v28, %v1669_v0  ;;  %v1682_v3 = vrot.slane %v7154_v23, 5  ;;  %v1611_v47 = vld [vmem:[#allocation2 + $0x48] sm:$0xe]  ;;  %v6841_v53 = vld [vmem:[%s9489_s3 + $0x130] sm:$0xff]  }
  0x66   : > { %v1686_v49 = vrot.slane %v7195_v16, 5  ;;  %v1676_v17 = vsel %vm7375_vm5, %v1674_v29, %v1675_v33  ;;  %v1681_v18 = vrot.slane %v1679_v15, 4  ;;  %v5788_v31 = vrot.slane %v1609_v50, 9  ;;  %v1613_v50 = vld [vmem:[#allocation2 + $0x60] sm:$0xe] }
  0x67   : > { %6447 = vmatprep.mubr.bf16.mxu0 %v5816_v11  ;;  %6380 = vmatmul.mubr.bf16.gmra.mxu1 %v5751_v9  ;;  %v1689_v35 = vrot.slane %v7209_v37, 5  ;;  %v5818_v56 = vcombine.low %v1673_v25, %v1676_v17  ;;  %v1680_v23 = vsel %vm7375_vm5, %v5787_v19, %v1679_v15  ;;  %v5789_v28 = vrot.slane %v1610_v36, 9  ;;  %v7430_v25 = vld [vmem:[#allocation2 + $0x68] sm:$0x1] }
  0x68   : > { %6399 = vmatprep.mubr.bf16.mxu1 %v5760_v6  ;;  %v1688_v22 = vrot.slane %v1686_v49, 4  ;;  %v1693_v4 = vrot.slane %v7227_v61, 5  ;;  %v1683_v55 = vsel %vm7375_vm5, %v1681_v18, %v1682_v3  ;;  %v1696_v37 = vrot.slane %v7240_v12, 5  ;;  %v6845_v15 = vld [vmem:[%s9489_s3 + $0x128] sm:$0xff]  }
  0x69   : > { %6448 = vmatmul.mubr.bf16.vlgmr.msra.gmra.mxu0 %v5817_v38  ;;  %v5790_v0 = vrot.slane %v1611_v47, 9  ;;  %v1700_v33 = vrot.slane %v7297_v48, 5  ;;  %v1687_v57 = vsel %vm7375_vm5, %v5788_v31, %v1686_v49  ;;  %v1703_v19 = vrot.slane %v7302_v63, 5 }
  0x6a   : > { %6528 = vmatpush3.bf16.msra.mxu0 %v7331_v46  ;;  %6451 = vmatprep.mubr.bf16.mxu0 %v5818_v56  ;;  %v1690_v6 = vsel %vm7375_vm5, %v1688_v22, %v1689_v35  ;;  %v1695_v11 = vrot.slane %v1693_v4, 4  ;;  %v1717_v12 = vrot.slane %v7430_v25, 5  ;;  %v5819_v29 = vcombine.low %v1680_v23, %v1683_v55  ;;  %v6840_v46 = vld [vmem:[%s9489_s3 + $0xf0] sm:$0xff]   ;;  %v7469_v56 = vld [vmem:[#allocation2 + $0x6c] sm:$0xe] }
  0x6b   : > { %6529 = vmatprep.subr.bf16.mxu0 %v6841_v53  ;;  %v1702_v9 = vrot.slane %v1700_v33, 4  ;;  %v5820_v38 = vcombine.low %v1687_v57, %v1690_v6  ;;  %v7441_v3 = vsel %vm7375_vm5, %v5789_v28, %v1693_v4  ;;  %v7445_v63 = vsel %vm7375_vm5, %v5790_v0, %v1700_v33  ;;  %v6848_v57 = vld [vmem:[%s9489_s3 + $0xe0] sm:$0xff]  }
  0x6c   : > { %v5791_v49 = vrot.slane %v1612_v45, 9  ;;  %v9514_v36 = vcombine.low %v7074_v41, %v7076_v42  ;;  %v7452_v17 = vsel %vm7375_vm5, %v1695_v11, %v1696_v37  ;;  %v1707_v31 = vrot.slane %v7341_v1, 5  ;;  %v6849_v41 = vld [vmem:[%s9489_s3 + $0x120] sm:$0xff]   ;;  %v7501_v11 = vld [vmem:[#allocation2 + $0x70] sm:$0xf] }
  0x6d   : > { %v7456_v18 = vsel %vm7375_vm5, %v1702_v9, %v1703_v19  ;;  %v5792_v35 = vrot.slane %v1613_v50, 9  ;;  %v7466_v42 = vld [vmem:[#allocation2 + $0x64] sm:$0xf]  ;;  %v5764_v22 = vcombine.low %v7190_v8, %v7195_v16  ;;  %v1710_v26 = vrot.slane %v7344_v21, 5  ;;  %v1618_v16 = vld [vmem:[#allocation2 + $0x9c] sm:$0xe] }
  0x6e   : > { %6530 = vmatpush3.bf16.msra.mxu0 %v6841_v53  ;;  %v1714_v47 = vrot.slane %v7466_v42, 5  ;;  %v1616_v53 = vld [vmem:[#allocation2 + $0x84] sm:$0xe]  ;;  %v5821_v23 = vcombine.low %v7441_v3, %v7452_v17  ;;  %v5766_v28 = vcombine.low %v7295_v51, %v7297_v48  ;;  %v5822_v8 = vcombine.low %v7445_v63, %v7456_v18  ;;  %v7504_v9 = vld [vmem:[#allocation2 + $0x74] sm:$0x1] }
  0x6f   : > { %6400 = vmatmul.mubr.bf16.vlgmr.msra.gmra.mxu1 %v9514_v36  ;;  %6531 = vmatprep.subr.bf16.mxu0 %v6845_v15  ;;  %v7487_v21 = vsel %vm7375_vm5, %v5791_v49, %v1707_v31  ;;  %v1709_v4 = vrot.slane %v1707_v31, 4  ;;  %v5795_v0 = vrot.slane %v1616_v53, 9  ;;  %v1735_v33 = vrot.slane %v7176_v54, 5  ;;  %v1619_v49 = vld [vmem:[#allocation2 + $0xa8] sm:$0xe] }
  0x70   : > { %6480 = vmatpush3.bf16.msra.mxu1 %v7321_v14  ;;  %6403 = vmatprep.mubr.bf16.mxu1 %v5762_v58  ;;  %v1617_v14 = vld [vmem:[#allocation2 + $0x90] sm:$0xe]  ;;  %v5765_v58 = vcombine.low %v7218_v52, %v7227_v61  ;;  %v7491_v45 = vsel %vm7375_vm5, %v5792_v35, %v1714_v47  ;;  %v1716_v37 = vrot.slane %v1714_v47, 4  ;;  %v1738_v50 = vrot.slane %v7180_v59, 5  ;;  %v6852_v35 = vld [vmem:[%s9489_s3 + $0xd8] sm:$0xff]   ;;  %v9517_v52 = vld [vmem:[#allocation4_spill] sm:$0xff] }
  0x71   : > { %6481 = vmatprep.subr.bf16.mxu1 %v6840_v46  ;;  %6452 = vmatmul.mubr.bf16.gmra.mxu0 %v5819_v29  ;;  %v5793_v6 = vrot.slane %v7469_v56, 9  ;;  %v1721_v19 = vrot.slane %v7501_v11, 5  ;;  %v1724_v29 = vrot.slane %v7504_v9, 5  ;;  %v5796_v3 = vrot.slane %v1617_v14, 9  ;;  %v7530_v47 = vld [vmem:[#allocation2 + $0x78] sm:$0xe] }
  0x72   : > { %6455 = vmatprep.mubr.bf16.mxu0 %v5820_v38  ;;  %6532 = vmatpush3.bf16.msra.mxu0 %v6845_v15  ;;  %v7514_v15 = vsel %vm7375_vm5, %v5795_v0, %v1735_v33  ;;  %v1737_v38 = vrot.slane %v1735_v33, 4  ;;  %v1742_v63 = vrot.slane %v7213_v44, 5  ;;  %v7522_v36 = vsel %vm7375_vm5, %v1709_v4, %v1710_v26  ;;  %v7611_v14 = vld [vmem:[#allocation2 + $0xb4] sm:$0xe]  ;;  %v7613_v18 = vld [vmem:[#allocation2 + $0x14] sm:$0x1] }
  0x73   : > { %6533 = vmatprep.subr.bf16.mxu0 %v6849_v41  ;;  %v1745_v17 = vrot.slane %v7224_v60, 5  ;;  %v5797_v31 = vrot.slane %v1618_v16, 9  ;;  %v1728_v10 = vrot.slane %v7532_v2, 5  ;;  %v6857_v60 = vld [vmem:[%s9489_s3 + $0x110] sm:$0xff]   ;;  %v1752_v26 = vrot.slane %v7265_v62, 5 }
  0x74   : > { %6482 = vmatpush3.bf16.msra.mxu1 %v6840_v46  ;;  %v6853_v46 = vld [vmem:[%s9489_s3 + $0x118] sm:$0xff]   ;;  %v1744_v53 = vrot.slane %v1742_v63, 4  ;;  %v2477_v16 = vld [vmem:[#allocation2 + $0xc] sm:$0xf]  ;;  %v5798_v0 = vrot.slane %v1619_v49, 9  ;;  %v1756_v33 = vrot.slane %v7316_v27, 5  ;;  %v1718_v49 = vsel %vm7375_vm5, %v1716_v37, %v1717_v12 }
  0x75   : > { %6483 = vmatprep.subr.bf16.mxu1 %v6844_v20  ;;  %v7585_v12 = vld [vmem:[#allocation2 + $0x10] sm:$0xf]  ;;  %v2526_v37 = vshrl.u32 %v2477_v16, 16  ;;  %v5767_v61 = vcombine.low %v9517_v52, %v7341_v1  ;;  %v1722_v51 = vsel %vm7375_vm5, %v5793_v6, %v1721_v19  ;;  %v2545_v9 = vshll.u32 %v7613_v18, 16 }
  0x76   : > { %6534 = vmatpush3.bf16.msra.mxu0 %v6849_v41  ;;  %v7544_v41 = vsel %vm7375_vm5, %v5796_v3, %v1742_v63  ;;  %v7554_v4 = vsel %vm7375_vm5, %v1744_v53, %v1745_v17  ;;  %v6861_v17 = vld [vmem:[%s9489_s3 + $0x108] sm:$0xff]   ;;  %v5823_v53 = vcombine.low %v7487_v21, %v7522_v36  ;;  %v5824_v21 = vcombine.low %v7491_v45, %v1718_v49 }
  0x77   : > { %6404 = vmatmul.mubr.bf16.gmra.mxu1 %v5763_v40  ;;  %v7537_v40 = vsel %vm7375_vm5, %v1737_v38, %v1738_v50  ;;  %6535 = vmatprep.subr.bf16.mxu0 %v6853_v46  ;;  %v9515_v50 = vld [vmem:[#allocation3_spill] sm:$0xff]  ;;  %v1730_v36 = vrot.slane %v1728_v10, 4  ;;  %v2539_v49 = vshrl.u32 %v7585_v12, 16 }
  0x78   : > { %6407 = vmatprep.mubr.bf16.mxu1 %v5764_v22  ;;  %6484 = vmatpush3.bf16.msra.mxu1 %v6844_v20  ;;  %v5827_v22 = vcombine.low %v7514_v15, %v7537_v40  ;;  %v1749_v20 = vrot.slane %v7250_v30, 5  ;;  %v1759_v38 = vrot.slane %v9515_v50, 5  ;;  %v2480_v50 = vld [vmem:[#allocation2 + $0x18] sm:$0xf]  ;;  %v9520_v15 = vrot.slane %v7357_v39, 5 }
  0x79   : > { %6485 = vmatprep.subr.bf16.mxu1 %v6848_v57  ;;  %6456 = vmatmul.mubr.bf16.gmra.mxu0 %v5821_v23  ;;  %v9516_v23 = vld [vmem:[#allocation5_spill] sm:$0xff]  ;;  %v2550_v59 = vshrl.u32 %v2480_v50, 16  ;;  %v2553_v55 = vshll.u32 %v2480_v50, 16  ;;  %v9521_v40 = vrot.slane %v7611_v14, 9 }
  0x7a   : > { %6459 = vmatprep.mubr.bf16.mxu0 %v5822_v8  ;;  %6536 = vmatpush3.bf16.msra.mxu0 %v6853_v46  ;;  %v7562_v62 = vsel %vm7375_vm5, %v5797_v31, %v1749_v20  ;;  %v1751_v63 = vrot.slane %v1749_v20, 4  ;;  %v5794_v8 = vrot.slane %v7530_v47, 9  ;;  %v6856_v46 = vld [vmem:[%s9489_s3 + $0xd0] sm:$0xff]   ;;  %v7579_v31 = vsel %vm7375_vm5, %v5798_v0, %v1756_v33 }
  0x7b   : > { %6537 = vmatprep.subr.bf16.mxu0 %v6857_v60  ;;  %v2529_v47 = vshll.u32 %v2477_v16, 16  ;;  %v1723_v20 = vrot.slane %v1721_v19, 4  ;;  %v6935_v16 = vld [vmem:[#allocation2 + $0x80] sm:$0x1]  ;;  %v2552_v50 = vrot.slane %v2550_v59, 4 }
  0x7c   : > { %6486 = vmatpush3.bf16.msra.mxu1 %v6848_v57  ;;  %v1758_v57 = vrot.slane %v1756_v33, 4  ;;  %v7583_v25 = vsel %vm7375_vm5, %v1751_v63, %v1752_v26  ;;  %v6865_v26 = vld [vmem:[%s9489_s3 + $0x100] sm:$0xff]   ;;  %v1731_v63 = vrot.slane %v6935_v16, 5  ;;  %v2481_v16 = vld [vmem:[#allocation2 + $0x1c] sm:$0xf] }
  0x7d   : > { %6487 = vmatprep.subr.bf16.mxu1 %v6852_v35  ;;  %v2531_v0 = vrot.slane %v2529_v47, 5  ;;  %v1725_v48 = vsel %vm7375_vm5, %v1723_v20, %v1724_v29  ;;  %v6864_v19 = vld [vmem:[%s9489_s3 + $0xc0] sm:$0xff]   ;;  %v7649_v29 = vld [vmem:[%s9489_s3 + $0x1b8] sm:$0xff]   ;;  %v2484_v47 = vld [vmem:[#allocation2 + $0x28] sm:$0xf] }
  0x7e   : > { %v7595_v33 = vsel %vm7375_vm5, %v1758_v57, %v1759_v38  ;;  %6538 = vmatpush3.bf16.msra.mxu0 %v6857_v60  ;;  %v6860_v38 = vld [vmem:[%s9489_s3 + $0xc8] sm:$0xff]   ;;  %v2535_v60 = vshll.u32 %v7585_v12, 16  ;;  %v2528_v57 = vrot.slane %v2526_v37, 4  ;;  %v1732_v56 = vsel %vm7375_vm5, %v1730_v36, %v1731_v63  ;;  %v2483_v37 = vld [vmem:[#allocation2 + $0x24] sm:$0xf] }
  0x7f   : > { %6408 = vmatmul.mubr.bf16.gmra.mxu1 %v5765_v58  ;;  %v6936_v58 = vld [vmem:[#allocation2 + $0x60] sm:$0xf]  ;;  %6539 = vmatprep.subr.bf16.mxu0 %v6861_v17  ;;  %v5825_v36 = vcombine.low %v1722_v51, %v1725_v48  ;;  %v2574_v63 = vshrl.u32 %v2483_v37, 16  ;;  %v2577_v52 = vshll.u32 %v2483_v37, 16  ;;  %v6938_v37 = vld [vmem:[#allocation2 + $0x78] sm:$0xf] }
  0x80   : > { %6411 = vmatprep.mubr.bf16.mxu1 %v5766_v28  ;;  %v5768_v45 = vcombine.low %v6936_v58, %v7466_v42  ;;  %6488 = vmatpush3.bf16.msra.mxu1 %v6852_v35  ;;  %v9497_v42 = vrot.slane %v7357_v39, 5  ;;  %v2482_v28 = vld [vmem:[#allocation2 + $0x20] sm:$0x1]  ;;  %v1729_v35 = vsel %vm7375_vm5, %v5794_v8, %v1728_v10  ;;  %v7651_v10 = vrot.slane %v2535_v60, 5  ;;  %v2486_v58 = vld [vmem:[#allocation2 + $0x30] sm:$0xf] }
  0x81   : > { %6489 = vmatprep.subr.bf16.mxu1 %v6856_v46  ;;  %6460 = vmatmul.mubr.bf16.gmra.mxu0 %v5823_v53  ;;  %v2541_v8 = vrot.slane %v2539_v49, 4  ;;  %v2563_v53 = vshrl.u32 %v2481_v16, 16  ;;  %v2532_v20 = vor.u32 %v2531_v0, %v2528_v57  ;;  %v5826_v6 = vcombine.low %v1729_v35, %v1732_v56  ;;  %v7657_v60 = vld [vmem:[#allocation2 + $0x34] sm:$0xf]  ;;  %v6937_v35 = vld [vmem:[#allocation2 + $0x6c] sm:$0xf] }
  0x82   : > { %6463 = vmatprep.mubr.bf16.mxu0 %v5824_v21  ;;  %6540 = vmatpush3.bf16.msra.mxu0 %v6861_v17  ;;  %v2559_v17 = vshll.u32 %v2481_v16, 16  ;;  %v2555_v21 = vrot.slane %v2553_v55, 5  ;;  %v7655_v1 = vrot.slane %v9497_v42, 4  ;;  %v2583_v55 = vshll.u32 %v2484_v47, 16  ;;  %v7695_v42 = vld [vmem:[#allocation2 + $0x44] sm:$0x1] }
  0x83   : > { %6541 = vmatprep.subr.bf16.mxu0 %v6865_v26  ;;  %v2565_v59 = vrot.slane %v2563_v53, 4  ;;  %v2587_v0 = vshrl.u32 %v2484_v47, 16  ;;  %v7661_v57 = vrot.slane %v2532_v20, 4  ;;  %v7664_v16 = vrot.slane %v2545_v9, 5 }
  0x84   : > { %6490 = vmatpush3.bf16.msra.mxu1 %v6856_v46  ;;  %v2569_v46 = vshll.u32 %v2482_v28, 16  ;;  %v7659_v49 = vrot.slane %v2559_v17, 5  ;;  %v2556_v51 = vor.u32 %v2555_v21, %v2552_v50  ;;  %v2598_v48 = vshrl.u32 %v2486_v58, 16  ;;  %v2489_v17 = vld [vmem:[#allocation2 + $0x3c] sm:$0xf] }
  0x85   : > { %6491 = vmatprep.subr.bf16.mxu1 %v6860_v38  ;;  %v2601_v28 = vshll.u32 %v2486_v58, 16  ;;  %v5769_v56 = vcombine.low %v6937_v35, %v7501_v11  ;;  %v5770_v9 = vcombine.low %v6938_v37, %v7532_v2  ;;  %v2607_v47 = vshll.u32 %v7657_v60, 16  ;;  %v2485_v50 = vld [vmem:[#allocation2 + $0x2c] sm:$0x1]  ;;  %v7686_v2 = vld [vmem:[#allocation2 + $0x38] sm:$0x1] }
  0x86   : > { %6542 = vmatpush3.bf16.msra.mxu0 %v6865_v26  ;;  %v7669_v26 = vld [vmem:[%s9489_s3 + $0x178] sm:$0xff]   ;;  %v2566_v53 = vor.u32 %v2565_v59, %v7659_v49  ;;  %v7677_v20 = vrot.slane %v2569_v46, 5  ;;  %v7679_v21 = vrot.slane %v2583_v55, 5  ;;  %v7683_v11 = vrot.slane %v2556_v51, 4  ;;  %v2492_v37 = vld [vmem:[#allocation2 + $0x48] sm:$0xf] }
  0x87   : > { %6412 = vmatmul.mubr.bf16.gmra.mxu1 %v5767_v61  ;;  %v2542_v61 = vor.u32 %v2541_v8, %v7651_v10  ;;  %6623 = vmatprep.subr.bf16.mxu0 %v7649_v29  ;;  %v2611_v8 = vshrl.u32 %v7657_v60, 16  ;;  %v2622_v58 = vshrl.u32 %v2489_v17, 16  ;;  %v2625_v59 = vshll.u32 %v2489_v17, 16 }
  0x88   : > { %6415 = vmatprep.mubr.bf16.mxu1 %v5768_v45  ;;  %6492 = vmatpush3.bf16.msra.mxu1 %v6860_v38  ;;  %v2576_v38 = vrot.slane %v2574_v63, 4  ;;  %v2579_v45 = vrot.slane %v2577_v52, 5  ;;  %v2600_v52 = vrot.slane %v2598_v48, 4  ;;  %v7690_v35 = vrot.slane %v2607_v47, 5 }
  0x89   : > { %6493 = vmatprep.subr.bf16.mxu1 %v6864_v19  ;;  %6464 = vmatmul.mubr.bf16.gmra.mxu0 %v5825_v36  ;;  %v2589_v36 = vrot.slane %v2587_v0, 4  ;;  %v7681_v63 = vrot.slane %v2542_v61, 4  ;;  %v2613_v55 = vrot.slane %v2611_v8, 4  ;;  %v7692_v0 = vrot.slane %v2566_v53, 4 }
  0x8a   : > { %6467 = vmatprep.mubr.bf16.mxu0 %v5826_v6  ;;  %v7688_v6 = vld [vmem:[#allocation2 + $0x40] sm:$0xf]  ;;  %v2580_v46 = vor.u32 %v2579_v45, %v2576_v38  ;;  %v2593_v51 = vshll.u32 %v2485_v50, 16  ;;  %v2617_v45 = vshll.u32 %v7686_v2, 16  ;;  %v9519_v47 = vcombine.low %v7544_v41, %v7554_v4 }
  0x8b   : > { %v2590_v61 = vor.u32 %v2589_v36, %v7679_v21  ;;  %v2631_v3 = vshll.u32 %v7688_v6, 16  ;;  %v2635_v48 = vshrl.u32 %v7688_v6, 16  ;;  %v2614_v17 = vor.u32 %v2613_v55, %v7690_v35  ;;  %v7734_v55 = vld [vmem:[#allocation2 + $0x58] sm:$0xf] }
  0x8c   : > { %6494 = vmatpush3.bf16.msra.mxu1 %v6864_v19  ;;  %v2603_v19 = vrot.slane %v2601_v28, 5  ;;  %v2624_v28 = vrot.slane %v2622_v58, 4  ;;  %v7708_v8 = vrot.slane %v2580_v46, 4  ;;  %v2646_v53 = vshrl.u32 %v2492_v37, 16 }
  0x8d   : > { %6575 = vmatprep.subr.bf16.mxu1 %v7669_v26  ;;  %v2649_v50 = vshll.u32 %v2492_v37, 16  ;;  %v9522_v36 = vrot.slane %v7359_v5, 5  ;;  %v7726_v4 = vrot.slane %v2590_v61, 4  ;;  %v7730_v58 = vrot.slane %v2631_v3, 5 }
  0x8e   : > { %v2604_v38 = vor.u32 %v2603_v19, %v2600_v52  ;;  %v7728_v52 = vrot.slane %v2593_v51, 5  ;;  %v2495_v19 = vld [vmem:[#allocation2 + $0x54] sm:$0xf]  ;;  %v7738_v37 = vrot.slane %v2617_v45, 5  ;;  %v2641_v61 = vshll.u32 %v7695_v42, 16 }
  0x8f   : > { %6416 = vmatmul.mubr.bf16.gmra.mxu1 %v5769_v56  ;;  %v2627_v56 = vrot.slane %v2625_v59, 5  ;;  %v7724_v41 = vsel %vm7375_vm5, %v7655_v1, %v9522_v36  ;;  %v2637_v59 = vrot.slane %v2635_v48, 4  ;;  %v9523_v3 = vcombine.low %v7160_v32, %v7176_v54 }
  0x90   : > { %6419 = vmatprep.mubr.bf16.mxu1 %v5770_v9  ;;  %v7703_v9 = vld [vmem:[#allocation2 + $0x4c] sm:$0xf]  ;;  %v7736_v5 = vrot.slane %v2604_v38, 4  ;;  %v7746_v51 = vrot.slane %v2614_v17, 4  ;;  %v2648_v48 = vrot.slane %v2646_v53, 4  ;;  %v9524_v38 = vcombine.low %v7205_v34, %v7213_v44 }
  0x91   : > { %6468 = vmatmul.mubr.bf16.gmra.mxu0 %v5827_v22  ;;  %9518 = vst [vmem:[#allocation3_spill] sm:$0xff] %v7703_v9  ;;  %v7717_v22 = vsel %vm7375_vm5, %v9521_v40, %v9520_v15  ;;  %v2655_v14 = vshll.u32 %v7703_v9, 16  ;;  %v2659_v46 = vshrl.u32 %v7703_v9, 16  ;;  %v2628_v1 = vor.u32 %v2627_v56, %v2624_v28  ;;  %v7753_v28 = vld [vmem:[#allocation2 + $0x5c] sm:$0x1] }
  0x92   : > { %6471 = vmatprep.mubr.bf16.mxu0 %v9519_v47  ;;  %v7741_v47 = vld [vmem:[#allocation2 + $0x50] sm:$0x1]  ;;  %v2651_v15 = vrot.slane %v2649_v50, 5  ;;  %v2670_v40 = vshrl.u32 %v2495_v19, 16  ;;  %v5831_v45 = vcombine.low %v7717_v22, %v7724_v41  ;;  %v2673_v56 = vshll.u32 %v2495_v19, 16 }
  0x93   : > { %v2679_v36 = vshll.u32 %v7734_v55, 16  ;;  %v2498_v9 = vld [vmem:[#allocation2 + $0x60] sm:$0xf]  ;;  %v2638_v32 = vor.u32 %v2637_v59, %v7730_v58  ;;  %v7757_v54 = vrot.slane %v2655_v14, 5  ;;  %v2661_v17 = vrot.slane %v2659_v46, 4 }
  0x94   : > { %v2683_v53 = vshrl.u32 %v7734_v55, 16  ;;  %v9525_v34 = vcombine.low %v7562_v62, %v7583_v25  ;;  %v2538_v44 = vsel %vm7080_vm2, %v7661_v57, %v7651_v10  ;;  %v2548_v50 = vsel %vm7080_vm2, %v7681_v63, %v7664_v16 }
  0x95   : > { %v7771_v22 = vrot.slane %v2628_v1, 4  ;;  %v7773_v41 = vrot.slane %v2641_v61, 5  ;;  %v9526_v19 = vcombine.low %v7579_v31, %v7595_v33  ;;  %v2652_v62 = vor.u32 %v2651_v15, %v2648_v48  ;;  %v7785_v61 = vld [vmem:[#allocation2 + $0x64] sm:$0xf]  ;;  %v7787_v31 = vld [vmem:[#allocation2 + $0x68] sm:$0x1] }
  0x96   : > { %v2665_v25 = vshll.u32 %v7741_v47, 16  ;;  %v2694_v59 = vshrl.u32 %v2498_v9, 16  ;;  %v2697_v14 = vshll.u32 %v2498_v9, 16  ;;  %v2672_v46 = vrot.slane %v2670_v40, 4  ;;  %v2501_v40 = vld [vmem:[#allocation2 + $0x6c] sm:$0xf] }
  0x97   : > { %6420 = vmatmul.mubr.bf16.gmra.mxu1 %v9523_v3  ;;  %v2675_v10 = vrot.slane %v2673_v56, 5  ;;  %v7779_v57 = vrot.slane %v2679_v36, 5  ;;  %v2685_v3 = vrot.slane %v2683_v53, 4  ;;  %v7781_v16 = vrot.slane %v2638_v32, 4  ;;  %v7818_v32 = vld [vmem:[#allocation2 + $0x70] sm:$0xf] }
  0x98   : > { %6423 = vmatprep.mubr.bf16.mxu1 %v9524_v38  ;;  %v5896_v38 = vcombine.low %v2538_v44, %v2548_v50  ;;  %v2662_v63 = vor.u32 %v2661_v17, %v7757_v54  ;;  %v2689_v1 = vshll.u32 %v7753_v28, 16  ;;  %v2562_v33 = vsel %vm7080_vm2, %v7683_v11, %v7659_v49  ;;  %v2504_v50 = vld [vmem:[#allocation2 + $0x78] sm:$0xf] }
  0x99   : > { %6472 = vmatmul.mubr.bf16.gmra.mxu0 %v9525_v34  ;;  %v2572_v9 = vsel %vm7080_vm2, %v7692_v0, %v7677_v20  ;;  %v2586_v48 = vsel %vm7080_vm2, %v7708_v8, %v7679_v21  ;;  %v2596_v15 = vsel %vm7080_vm2, %v7726_v4, %v7728_v52  ;;  %v9527_v56 = vcombine.low %v7242_v24, %v7250_v30  ;;  %v6866_v34 = vld [vmem:[#allocation2 + $0xc] sm:$0xff]  }
  0x9a   : > { %6475 = vmatprep.mubr.bf16.mxu0 %v9526_v19  ;;  %v7808_v49 = vrot.slane %v2652_v62, 4  ;;  %v7810_v11 = vrot.slane %v2665_v25, 5  ;;  %v2696_v20 = vrot.slane %v2694_v59, 4  ;;  %v2699_v0 = vrot.slane %v2697_v14, 5 }
  0x9b   : > { %v9528_v36 = vcombine.low %v7308_v7, %v7316_v27  ;;  %v2676_v21 = vor.u32 %v2675_v10, %v2672_v46  ;;  %v2686_v8 = vor.u32 %v2685_v3, %v7779_v57  ;;  %v2703_v4 = vshll.u32 %v7785_v61, 16 }
  0x9c   : > { %v2707_v52 = vshrl.u32 %v7785_v61, 16  ;;  %v7820_v24 = vrot.slane %v2662_v63, 4  ;;  %v7822_v30 = vrot.slane %v2689_v1, 5  ;;  %v2713_v17 = vshll.u32 %v7787_v31, 16 }
  0x9d   : > { %v2718_v53 = vshrl.u32 %v2501_v40, 16  ;;  %v5897_v7 = vcombine.low %v2562_v33, %v2572_v9  ;;  %v5898_v27 = vcombine.low %v2586_v48, %v2596_v15  ;;  %v2610_v44 = vsel %vm7080_vm2, %v7736_v5, %v7690_v35 }
  0x9e   : > { %v2620_v19 = vsel %vm7080_vm2, %v7746_v51, %v7738_v37  ;;  %v2700_v62 = vor.u32 %v2699_v0, %v2696_v20  ;;  %v2721_v25 = vshll.u32 %v2501_v40, 16  ;;  %v2727_v59 = vshll.u32 %v7818_v32, 16  ;;  %v7869_v40 = vld [vmem:[#allocation2 + $0x88] sm:$0xf] }
  0x9f   : > { %6424 = vmatmul.mubr.bf16.gmra.mxu1 %v9527_v56  ;;  %v7836_v14 = vrot.slane %v2676_v21, 4  ;;  %v7838_v46 = vrot.slane %v2686_v8, 4  ;;  %v7840_v10 = vrot.slane %v2703_v4, 5  ;;  %v2709_v35 = vrot.slane %v2707_v52, 4  ;;  %v7883_v8 = vld [vmem:[#allocation2 + $0x80] sm:$0x1] }
  0xa0   : > { %6427 = vmatprep.mubr.bf16.mxu1 %v9528_v36  ;;  %v2634_v5 = vsel %vm7080_vm2, %v7771_v22, %v7730_v58  ;;  %v2644_v37 = vsel %vm7080_vm2, %v7781_v16, %v7773_v41  ;;  %v2731_v51 = vshrl.u32 %v7818_v32, 16  ;;  %v2742_v3 = vshrl.u32 %v2504_v50, 16  ;;  %v2507_v58 = vld [vmem:[#allocation2 + $0x84] sm:$0xf]  ;;  %v6867_v36 = vld [vmem:[#allocation2 + $0x18] sm:$0xff]  }
  0xa1   : > { %6476 = vmatmul.mubr.bf16.gmra.mxu0 %v5831_v45  ;;  %v7834_v45 = vld [vmem:[#allocation2 + $0x7c] sm:$0xf]  ;;  %v7854_v63 = vrot.slane %v2713_v17, 5  ;;  %v2745_v1 = vshll.u32 %v2504_v50, 16  ;;  %v9529_v22 = vcombine.low %v9516_v23, %v7357_v39  ;;  %v7861_v41 = vrot.slane %v2700_v62, 4  ;;  %v6870_v17 = vld [vmem:[#allocation2 + $0x24] sm:$0xff]  }
  0xa2   : > { %6543 = vmatprep.mubr.bf16.mxu0 %v5896_v38  ;;  %v6873_v38 = vld [vmem:[%s9489_s3 + $0x1b0] sm:$0xff]   ;;  %v2751_v33 = vshll.u32 %v7834_v45, 16  ;;  %v2755_v9 = vshrl.u32 %v7834_v45, 16  ;;  %v7863_v16 = vrot.slane %v2718_v53, 4  ;;  %v7865_v48 = vrot.slane %v2721_v25, 5 }
  0xa3   : > { %v7867_v15 = vrot.slane %v2727_v59, 5  ;;  %v2658_v56 = vsel %vm7080_vm2, %v7808_v49, %v7757_v54  ;;  %v2668_v39 = vsel %vm7080_vm2, %v7820_v24, %v7810_v11  ;;  %v7879_v23 = vld [vmem:[#allocation2 + $0x74] sm:$0x1]  ;;  %v2766_v20 = vshrl.u32 %v2507_v58, 16  ;;  %v2510_v49 = vld [vmem:[#allocation2 + $0x90] sm:$0xf] }
  0xa4   : > { %v2769_v0 = vshll.u32 %v2507_v58, 16  ;;  %v7881_v21 = vrot.slane %v2731_v51, 4  ;;  %v7885_v4 = vrot.slane %v2742_v3, 4  ;;  %v2775_v52 = vshll.u32 %v7869_v40, 16  ;;  %v7892_v50 = vld [vmem:[#allocation2 + $0x8c] sm:$0x1] }
  0xa5   : > { %v2779_v54 = vshrl.u32 %v7869_v40, 16  ;;  %v2710_v11 = vor.u32 %v2709_v35, %v7840_v10  ;;  %v2747_v24 = vrot.slane %v2745_v1, 5  ;;  %v7890_v53 = vrot.slane %v2751_v33, 5  ;;  %v6872_v62 = vld [vmem:[%s9489_s3 + $0x170] sm:$0xff]  }
  0xa6   : > { %v2768_v25 = vrot.slane %v2766_v20, 4  ;;  %v2771_v59 = vrot.slane %v2769_v0, 5  ;;  %v7902_v35 = vrot.slane %v2775_v52, 5  ;;  %v7904_v3 = vld [vmem:[#allocation2 + $0x94] sm:$0xf]  ;;  %v2793_v1 = vshll.u32 %v2510_v49, 16 }
  0xa7   : > { %6428 = vmatmul.mubr.bf16.gmra.mxu1 %v9529_v22  ;;  %v2781_v51 = vrot.slane %v2779_v54, 4  ;;  %9530 = vst [vmem:[#allocation5_spill] sm:$0xff] %v7904_v3  ;;  %v5900_v33 = vcombine.low %v2634_v5, %v2644_v37  ;;  %v2682_v58 = vsel %vm7080_vm2, %v7836_v14, %v7779_v57  ;;  %v2737_v22 = vshll.u32 %v7879_v23, 16  ;;  %v545_v20 = vld [vmem:[%s7909_s27] sm:$0xff]   ;;  %v7926_v5 = vld [vmem:[#allocation2 + $0x98] sm:$0x1] }
  0xa8   : > { %6495 = vmatprep.mubr.bf16.mxu1 %v6866_v34  ;;  %v2757_v34 = vrot.slane %v2755_v9, 4  ;;  %v7911_v9 = vcombine.low %v2658_v56, %v2668_v39  ;;  %v7919_v0 = vrot.slane %v2710_v11, 4  ;;  %v2724_v52 = vor.u32 %v7865_v48, %v7863_v16  ;;  %9531 = vst [vmem:[#allocation4_spill] sm:$0xff] %v7926_v5  ;;  %549 = vst [vmem:[#allocation2 + $0xc0] sm:$0xff] %v545_v20   ;;  %v6876_v16 = vld [vmem:[%s9489_s3 + $0x168] sm:$0xff]   ;;  %v6881_v48 = vld [vmem:[%s9489_s3 + $0x1a0] sm:$0xff]  }
  0xa9   : > { %6544 = vmatmul.mubr.bf16.vlgmr.msra.gmra.mxu0 %v5897_v7  ;;  %v6877_v7 = vld [vmem:[%s9489_s3 + $0x1a8] sm:$0xff]   ;;  %v2748_v37 = vor.u32 %v2747_v24, %v7885_v4  ;;  %v2772_v39 = vor.u32 %v2771_v59, %v2768_v25  ;;  %v2785_v54 = vshll.u32 %v7892_v50, 16  ;;  %v2799_v4 = vshll.u32 %v7904_v3, 16  ;;  %v2513_v24 = vld [vmem:[#allocation2 + $0x9c] sm:$0xf] }
  0xaa   : > { %6624 = vmatpush3.bf16.msra.mxu0 %v7649_v29  ;;  %6547 = vmatprep.mubr.bf16.mxu0 %v5898_v27  ;;  %v5899_v29 = vcombine.low %v2610_v44, %v2620_v19  ;;  %v2790_v27 = vshrl.u32 %v2510_v49, 16  ;;  %v2734_v44 = vor.u32 %v7881_v21, %v7867_v15  ;;  %v2761_v19 = vshll.u32 %v7883_v8, 16 }
  0xab   : > { %6625 = vmatprep.subr.bf16.mxu0 %v6873_v38  ;;  %v2758_v56 = vor.u32 %v2757_v34, %v7890_v53  ;;  %v2795_v21 = vrot.slane %v2793_v1, 5  ;;  %v2706_v49 = vsel %vm7080_vm2, %v7861_v41, %v7840_v10  ;;  %v2809_v11 = vshll.u32 %v7926_v5, 16  ;;  %v6871_v34 = vld [vmem:[#allocation2 + $0x30] sm:$0xff]   ;;  %v7962_v1 = vld [vmem:[#allocation2 + $0xa0] sm:$0xf] }
  0xac   : > { %v2716_v25 = vsel %vm7080_vm2, %v7919_v0, %v7854_v63  ;;  %v2725_v59 = vrot.slane %v2724_v52, 4  ;;  %v7958_v41 = vrot.slane %v2761_v19, 5  ;;  %9532 = vst [vmem:[#allocation6_spill] sm:$0xff] %v7962_v1  ;;  %v6880_v63 = vld [vmem:[%s9489_s3 + $0x160] sm:$0xff]   ;;  %v2814_v0 = vshrl.u32 %v2513_v24, 16 }
  0xad   : > { %v7956_v10 = vrot.slane %v2758_v56, 4  ;;  %v7974_v52 = vrot.slane %v2799_v4, 5  ;;  %v2817_v19 = vshll.u32 %v2513_v24, 16  ;;  %v7998_v4 = vld [vmem:[#allocation2 + $0xac] sm:$0xf] }
  0xae   : > { %6626 = vmatpush3.bf16.msra.mxu0 %v6873_v38  ;;  %v2782_v38 = vor.u32 %v2781_v51, %v7902_v35  ;;  %v2735_v51 = vrot.slane %v2734_v44, 4  ;;  %v7978_v44 = vrot.slane %v2809_v11, 5  ;;  %9533 = vst [vmem:[#allocation7_spill] sm:$0xff] %v7998_v4  ;;  %v8002_v11 = vld [vmem:[#allocation2 + $0xa4] sm:$0x1]  ;;  %v8004_v24 = vrot.slane %v2814_v0, 4 }
  0xaf   : > { %6496 = vmatmul.mubr.bf16.vlgmr.msra.gmra.mxu1 %v6867_v36  ;;  %v2792_v36 = vrot.slane %v2790_v27, 4  ;;  %6627 = vmatprep.subr.bf16.mxu0 %v6877_v7  ;;  %v7960_v27 = vrot.slane %v2785_v54, 5  ;;  %v2823_v54 = vshll.u32 %v7962_v1, 16  ;;  %9534 = vst [vmem:[#allocation8_spill] sm:$0xff] %v8002_v11 }
  0xb0   : > { %6576 = vmatpush3.bf16.msra.mxu1 %v7669_v26  ;;  %6499 = vmatprep.mubr.bf16.mxu1 %v6870_v17  ;;  %v2692_v26 = vsel %vm7080_vm2, %v7838_v46, %v7822_v30  ;;  %v2803_v17 = vshrl.u32 %v7904_v3, 16  ;;  %v2739_v30 = vrot.slane %v2737_v22, 5  ;;  %v7954_v46 = vrot.slane %v2748_v37, 4 }
  0xb1   : > { %6577 = vmatprep.subr.bf16.mxu1 %v6872_v62  ;;  %6548 = vmatmul.mubr.bf16.gmra.mxu0 %v5899_v29  ;;  %v6874_v29 = vld [vmem:[#allocation2 + $0x3c] sm:$0xff]   ;;  %v7972_v22 = vrot.slane %v2782_v38, 4  ;;  %v2796_v20 = vor.u32 %v2795_v21, %v2792_v36  ;;  %v2730_v37 = vsel %vm7080_vm2, %v2725_v59, %v7867_v15  ;;  %v2827_v38 = vshrl.u32 %v7962_v1, 16  ;;  %v2516_v36 = vld [vmem:[#allocation2 + $0xa8] sm:$0xf] }
  0xb2   : > { %6551 = vmatprep.mubr.bf16.mxu0 %v5900_v33  ;;  %6628 = vmatpush3.bf16.msra.mxu0 %v6877_v7  ;;  %v6885_v7 = vld [vmem:[%s9489_s3 + $0x198] sm:$0xff]   ;;  %v7970_v33 = vrot.slane %v2772_v39, 4  ;;  %v2740_v56 = vsel %vm7080_vm2, %v2735_v51, %v2739_v30  ;;  %v6889_v39 = vld [vmem:[%s9489_s3 + $0x190] sm:$0xff]   ;;  %v5902_v21 = vcombine.low %v2682_v58, %v2692_v26  ;;  %v8006_v59 = vcombine.low %v2706_v49, %v2716_v25 }
  0xb3   : > { %6629 = vmatprep.subr.bf16.mxu0 %v6881_v48  ;;  %v6884_v15 = vld [vmem:[%s9489_s3 + $0x158] sm:$0xff]   ;;  %v8008_v57 = vcombine.low %v2730_v37, %v2740_v56  ;;  %v2838_v14 = vshrl.u32 %v2516_v36, 16  ;;  %v2841_v58 = vshll.u32 %v2516_v36, 16  ;;  %v2819_v26 = vrot.slane %v2817_v19, 5  ;;  %v8027_v37 = vld [vmem:[#allocation2 + $0xb0] sm:$0x1] }
  0xb4   : > { %6578 = vmatpush3.bf16.msra.mxu1 %v6872_v62  ;;  %v7976_v62 = vrot.slane %v2803_v17, 4  ;;  %v8000_v17 = vrot.slane %v2796_v20, 4  ;;  %v2847_v51 = vshll.u32 %v7998_v4, 16  ;;  %v2851_v30 = vshrl.u32 %v7998_v4, 16  ;;  %v6888_v20 = vld [vmem:[%s9489_s3 + $0x150] sm:$0xff]   ;;  %9536 = vst [vmem:[#allocation10_spill] sm:$0xff] %v8027_v37 }
  0xb5   : > { %6579 = vmatprep.subr.bf16.mxu1 %v6876_v16  ;;  %v8025_v0 = vrot.slane %v2823_v54, 5  ;;  %v2829_v19 = vrot.slane %v2827_v38, 4  ;;  %v6893_v56 = vld [vmem:[%s9489_s3 + $0x188] sm:$0xff]   ;;  %v2833_v54 = vshll.u32 %v8002_v11, 16  ;;  %v2840_v38 = vrot.slane %v2838_v14, 4  ;;  %v6879_v11 = vld [vmem:[#allocation2 + $0x60] sm:$0xff]  }
  0xb6   : > { %6630 = vmatpush3.bf16.msra.mxu0 %v6881_v48  ;;  %v2519_v48 = vld [vmem:[#allocation2 + $0xb4] sm:$0xf]  ;;  %v547_v36 = vld [vmem:[%s7909_s27 + $0x8] sm:$0x1]  ;;  %v2843_v49 = vrot.slane %v2841_v58, 5  ;;  %v3300_v4 = vrot.slane %v7613_v18, 5  ;;  %v2764_v14 = vsel %vm7080_vm2, %v7956_v10, %v7958_v41  ;;  %v2820_v18 = vor.u32 %v2819_v26, %v8004_v24 }
  0xb7   : > { %6500 = vmatmul.mubr.bf16.gmra.mxu1 %v6871_v34  ;;  %v6875_v34 = vld [vmem:[#allocation2 + $0x48] sm:$0xff]   ;;  %6631 = vmatprep.subr.bf16.mxu0 %v6885_v7  ;;  %551 = vst [vmem:[#allocation2 + $0xc8] sm:$0x1] %v547_v36  ;;  %v8037_v1 = vrot.slane %v2847_v51, 5  ;;  %v2853_v5 = vrot.slane %v2851_v30, 4  ;;  %v9537_v3 = vrot.slane %v7585_v12, 5  ;;  %v2830_v58 = vor.u32 %v2829_v19, %v8025_v0 }
  0xb8   : > { %6503 = vmatprep.mubr.bf16.mxu1 %v6874_v29  ;;  %6580 = vmatpush3.bf16.msra.mxu1 %v6876_v16  ;;  %v6878_v16 = vld [vmem:[#allocation2 + $0x54] sm:$0xff]   ;;  %v6892_v51 = vld [vmem:[%s9489_s3 + $0x148] sm:$0xff]   ;;  %v8054_v30 = vld [vmem:[#allocation2 + $0xbc] sm:$0x1]  ;;  %v2778_v10 = vsel %vm7080_vm2, %v7970_v33, %v7902_v35  ;;  %v2788_v41 = vsel %vm7080_vm2, %v7972_v22, %v7960_v27  ;;  %v2844_v19 = vor.u32 %v2843_v49, %v2840_v38  ;;  %v2821_v27 = vrot.slane %v2820_v18, 4  ;;  %s6118_s27 = sshll.u32 %s9707_s21, 8 }
  0xb9   : > { %6581 = vmatprep.subr.bf16.mxu1 %v6880_v63  ;;  %6552 = vmatmul.mubr.bf16.gmra.mxu0 %v7911_v9  ;;  %v8013_v29 = vld [vmem:[#allocation2 + $0xb8] sm:$0xf]  ;;  %v2806_v9 = vor.u32 %v7976_v62, %v7974_v52  ;;  %v2854_v35 = vor.u32 %v2853_v5, %v8037_v1  ;;  %v8072_v33 = vld [vmem:[#allocation2 + $0xc4] sm:$0xf]  ;;  %v2831_v22 = vrot.slane %v2830_v58, 4  ;;  %v9538_v49 = vsel %vm7080_vm2, %v7954_v46, %v7890_v53  ;;  %s9349_s30 = scalar_lea.vmem %s9490_s4, %s6118_s27 }
  0xba   : > { %9535 = vst [vmem:[#allocation9_spill] sm:$0xff] %v8013_v29  ;;  %6555 = vmatprep.mubr.bf16.mxu0 %v5902_v21  ;;  %6632 = vmatpush3.bf16.msra.mxu0 %v6885_v7  ;;  %v2862_v7 = vshrl.u32 %v2519_v48, 16  ;;  %v2865_v21 = vshll.u32 %v2519_v48, 16  ;;  %v2871_v62 = vshll.u32 %v8013_v29, 16  ;;  %v2875_v25 = vshrl.u32 %v8013_v29, 16  ;;  %v6897_v48 = vld [vmem:[%s9489_s3 + $0x180] sm:$0xff]  }
  0xbb   : > { %6633 = vmatprep.subr.bf16.mxu0 %v6889_v39  ;;  %v3299_v29 = vrot.slane %v9537_v3, 4  ;;  %v2807_v26 = vrot.slane %v2806_v9, 4  ;;  %v6896_v5 = vld [vmem:[%s9489_s3 + $0x140] sm:$0xff]   ;;  %v8099_v38 = vrot.slane %v2844_v19, 4  ;;  %v2899_v18 = vshrl.u32 %v8072_v33, 16 }
  0xbc   : > { %6582 = vmatpush3.bf16.msra.mxu1 %v6880_v63  ;;  %v2857_v63 = vshll.u32 %v8027_v37, 16  ;;  %v2864_v3 = vrot.slane %v2862_v7, 4  ;;  %v8056_v36 = vrot.slane %v2871_v62, 5  ;;  %v2877_v37 = vrot.slane %v2875_v25, 4 }
  0xbd   : > { %6583 = vmatprep.subr.bf16.mxu1 %v6884_v15  ;;  %v8068_v24 = vsel %vm7375_vm5, %v3299_v29, %v3300_v4  ;;  %v2835_v25 = vrot.slane %v2833_v54, 5  ;;  %v2881_v7 = vshll.u32 %v8054_v30, 16  ;;  %v9539_v62 = vrot.slane %v7585_v12, 5 }
  0xbe   : > { %6634 = vmatpush3.bf16.msra.mxu0 %v6889_v39  ;;  %v2522_v39 = vld [vmem:[#allocation2 + $0xc0] sm:$0xf]  ;;  %v8076_v4 = vrot.slane %v2857_v63, 5  ;;  %v2878_v29 = vor.u32 %v2877_v37, %v8056_v36  ;;  %v2895_v37 = vshll.u32 %v8072_v33, 16  ;;  %v8101_v63 = vrot.slane %v2854_v35, 4 }
  0xbf   : > { %6504 = vmatmul.mubr.bf16.gmra.mxu1 %v6875_v34  ;;  %v2867_v34 = vrot.slane %v2865_v21, 5  ;;  %6635 = vmatprep.subr.bf16.mxu0 %v6893_v56  ;;  %v2886_v9 = vshrl.u32 %v2522_v39, 16  ;;  %v5906_v46 = vcombine.low %v2778_v10, %v2788_v41  ;;  %v2802_v12 = vsel %vm7080_vm2, %v8000_v17, %v7974_v52  ;;  %v6883_v17 = vld [vmem:[#allocation2 + $0x78] sm:$0xff]  }
  0xc0   : > { %6507 = vmatprep.mubr.bf16.mxu1 %v6878_v16  ;;  %6584 = vmatpush3.bf16.msra.mxu1 %v6884_v15  ;;  %v3231_v15 = vld [vmem:[#allocation2 + $0xc] sm:$0xe]  ;;  %v8113_v58 = vrot.slane %v2881_v7, 5  ;;  %v3318_v52 = vrot.slane %v7657_v60, 5  ;;  %v3321_v19 = vrot.slane %v7686_v2, 5 }
  0xc1   : > { %6585 = vmatprep.subr.bf16.mxu1 %v6888_v20  ;;  %6556 = vmatmul.mubr.bf16.gmra.mxu0 %v8006_v59  ;;  %v6882_v16 = vld [vmem:[#allocation2 + $0x6c] sm:$0xff]   ;;  %v5920_v21 = vrot.slane %v3231_v15, 9  ;;  %v2868_v59 = vor.u32 %v2867_v34, %v2864_v3  ;;  %v8118_v3 = vld [vmem:[%s9489_s3 + $0x1f8] sm:$0xff]   ;;  %v8122_v34 = vrot.slane %v2878_v29, 4  ;;  %v8124_v10 = vrot.slane %v2886_v9, 4  ;;  %v6886_v15 = vld [vmem:[#allocation2 + $0x84] sm:$0xff]  }
  0xc2   : > { %6559 = vmatprep.mubr.bf16.mxu0 %v8008_v57  ;;  %6636 = vmatpush3.bf16.msra.mxu0 %v6893_v56  ;;  %v8085_v57 = vld [vmem:[%s9489_s3 + $0x238] sm:$0xff]   ;;  %v2889_v56 = vshll.u32 %v2522_v39, 16  ;;  %v8132_v39 = vrot.slane %v2895_v37, 5  ;;  %v3320_v60 = vrot.slane %v3318_v52, 4  ;;  %v8144_v7 = vld [vmem:[#allocation2 + $0xc8] sm:$0x1]  ;;  %v2850_v9 = vsel %vm7080_vm2, %v8099_v38, %v8037_v1 }
  0xc3   : > { %6637 = vmatprep.subr.bf16.mxu0 %v6897_v48  ;;  %v8097_v54 = vsel %vm7375_vm5, %v5920_v21, %v9539_v62  ;;  %v3328_v29 = vrot.slane %v7695_v42, 5  ;;  %v3335_v37 = vrot.slane %v7741_v47, 5  ;;  %v8174_v38 = vld [vmem:[#allocation2 + $0x1c] sm:$0xf] }
  0xc4   : > { %6586 = vmatpush3.bf16.msra.mxu1 %v6888_v20  ;;  %v5905_v20 = vcombine.low %v9538_v49, %v2764_v14  ;;  %v5952_v53 = vcombine.low %v8097_v54, %v8068_v24  ;;  %v2812_v14 = vsel %vm7080_vm2, %v2807_v26, %v7978_v44  ;;  %v2826_v44 = vsel %vm7080_vm2, %v2821_v27, %v8025_v0  ;;  %v3236_v49 = vld [vmem:[#allocation2 + $0x48] sm:$0xe] }
  0xc5   : > { %6587 = vmatprep.subr.bf16.mxu1 %v6892_v51  ;;  %v2891_v41 = vrot.slane %v2889_v56, 5  ;;  %v5907_v35 = vcombine.low %v2802_v12, %v2812_v14  ;;  %v8142_v27 = vsel %vm7375_vm5, %v3320_v60, %v3321_v19  ;;  %v5925_v62 = vrot.slane %v3236_v49, 9  ;;  %v3238_v60 = vld [vmem:[#allocation2 + $0x60] sm:$0xe]  ;;  %v3239_v49 = vld [vmem:[#allocation2 + $0x6c] sm:$0xe] }
  0xc6   : > { %6638 = vmatpush3.bf16.msra.mxu0 %v6897_v48  ;;  %v2836_v48 = vsel %vm7080_vm2, %v2831_v22, %v2835_v25  ;;  %v3235_v22 = vld [vmem:[#allocation2 + $0x3c] sm:$0xe]  ;;  %v3349_v19 = vrot.slane %v7787_v31, 5  ;;  %v3402_v24 = vrot.slane %v8072_v33, 5  ;;  %v3405_v54 = vrot.slane %v8144_v7, 5 }
  0xc7   : > { %6508 = vmatmul.mubr.bf16.gmra.mxu1 %v6879_v11  ;;  %v8120_v11 = vrot.slane %v2868_v59, 4  ;;  %6719 = vmatprep.subr.bf16.mxu0 %v8085_v57  ;;  %v5908_v0 = vcombine.low %v2826_v44, %v2836_v48  ;;  %v5924_v21 = vrot.slane %v3235_v22, 9  ;;  %v3325_v59 = vrot.slane %v7688_v6, 5  ;;  %v6890_v44 = vld [vmem:[#allocation2 + $0x9c] sm:$0xff]  }
  0xc8   : > { %6511 = vmatprep.mubr.bf16.mxu1 %v6882_v16  ;;  %6588 = vmatpush3.bf16.msra.mxu1 %v6892_v51  ;;  %v3234_v51 = vld [vmem:[#allocation2 + $0x30] sm:$0xe]  ;;  %v2901_v16 = vrot.slane %v2899_v18, 4  ;;  %v2892_v47 = vor.u32 %v2891_v41, %v8124_v10 }
  0xc9   : > { %6589 = vmatprep.subr.bf16.mxu1 %v6896_v5  ;;  %6560 = vmatmul.mubr.bf16.gmra.mxu0 %v5905_v20  ;;  %v5923_v26 = vrot.slane %v3234_v51, 9  ;;  %v9540_v20 = vld [vmem:[#allocation3_spill] sm:$0xff]  ;;  %v2874_v42 = vsel %vm7080_vm2, %v8120_v11, %v8056_v36  ;;  %v8167_v6 = vsel %vm7375_vm5, %v5924_v21, %v3325_v59  ;;  %v3327_v1 = vrot.slane %v3325_v59, 4  ;;  %v6887_v36 = vld [vmem:[#allocation2 + $0x90] sm:$0xff]  }
  0xca   : > { %6563 = vmatprep.mubr.bf16.mxu0 %v5906_v46  ;;  %v3332_v56 = vrot.slane %v9540_v20, 5  ;;  %v2902_v46 = vor.u32 %v2901_v16, %v8132_v39  ;;  %v2905_v11 = vshll.u32 %v8144_v7, 16  ;;  %v3346_v51 = vrot.slane %v7785_v61, 5 }
  0xcb   : > { %v8138_v25 = vsel %vm7375_vm5, %v5923_v26, %v3318_v52  ;;  %v8180_v12 = vsel %vm7375_vm5, %v3327_v1, %v3328_v29  ;;  %v3237_v52 = vld [vmem:[#allocation2 + $0x54] sm:$0xe]  ;;  %v2893_v16 = vrot.slane %v2892_v47, 4  ;;  %v8198_v26 = vld [vmem:[#allocation2 + $0x18] sm:$0xe]  ;;  %v3353_v29 = vrot.slane %v7818_v32, 5 }
  0xcc   : > { %6590 = vmatpush3.bf16.msra.mxu1 %v6896_v5  ;;  %v5955_v2 = vcombine.low %v8138_v25, %v8142_v27  ;;  %v2860_v5 = vsel %vm7080_vm2, %v8101_v63, %v8076_v4  ;;  %v2884_v4 = vsel %vm7080_vm2, %v8122_v34, %v8113_v58  ;;  %v3304_v63 = vrot.slane %v8174_v38, 5  ;;  %v6891_v32 = vld [vmem:[#allocation2 + $0xa8] sm:$0xff]  }
  0xcd   : > { %6671 = vmatprep.subr.bf16.mxu1 %v8118_v3  ;;  %v3334_v18 = vrot.slane %v3332_v56, 4  ;;  %v8184_v14 = vsel %vm7375_vm5, %v5925_v62, %v3332_v56  ;;  %v3339_v58 = vrot.slane %v7734_v55, 5  ;;  %v5956_v34 = vcombine.low %v8167_v6, %v8180_v12  ;;  %v6916_v6 = vld [vmem:[%s9489_s3 + $0x1d8] sm:$0xff]  }
  0xce   : > { %v5926_v41 = vrot.slane %v3237_v52, 9  ;;  %v3348_v22 = vrot.slane %v3346_v51, 4  ;;  %v5910_v21 = vcombine.low %v2874_v42, %v2884_v4  ;;  %v2903_v59 = vrot.slane %v2902_v46, 4  ;;  %v3240_v4 = vld [vmem:[#allocation2 + $0x78] sm:$0xe] }
  0xcf   : > { %6512 = vmatmul.mubr.bf16.gmra.mxu1 %v6883_v17  ;;  %v8192_v10 = vsel %vm7375_vm5, %v3334_v18, %v3335_v37  ;;  %v3342_v17 = vrot.slane %v7753_v28, 5  ;;  %v3341_v55 = vrot.slane %v3339_v58, 4  ;;  %v3356_v20 = vrot.slane %v7879_v23, 5  ;;  %v8230_v23 = vld [vmem:[#allocation2 + $0x20] sm:$0x1]  ;;  %v6894_v52 = vld [vmem:[#allocation2 + $0xb4] sm:$0xff]  }
  0xd0   : > { %6515 = vmatprep.mubr.bf16.mxu1 %v6886_v15  ;;  %v5957_v48 = vcombine.low %v8184_v14, %v8192_v10  ;;  %v5909_v15 = vcombine.low %v2850_v9, %v2860_v5  ;;  %v2907_v9 = vrot.slane %v2905_v11, 5  ;;  %v8218_v5 = vsel %vm7375_vm5, %v3348_v22, %v3349_v19  ;;  %v8397_v22 = vld [vmem:[#allocation2 + $0x34] sm:$0xf]  ;;  %v6924_v14 = vld [vmem:[%s9489_s3 + $0x1c8] sm:$0xff]   ;;  %v6929_v10 = vld [vmem:[%s9489_s3 + $0x200] sm:$0xff]  }
  0xd1   : > { %6564 = vmatmul.mubr.bf16.gmra.mxu0 %v5907_v35  ;;  %v8203_v35 = vsel %vm7375_vm5, %v5926_v41, %v3339_v58  ;;  %v8207_v28 = vsel %vm7375_vm5, %v3341_v55, %v3342_v17  ;;  %v5928_v37 = vrot.slane %v3239_v49, 9  ;;  %v3355_v42 = vrot.slane %v3353_v29, 4  ;;  %v3241_v55 = vld [vmem:[#allocation2 + $0x84] sm:$0xe]  ;;  %v8454_v17 = vld [vmem:[#allocation2 + $0x40] sm:$0xf] }
  0xd2   : > { %6567 = vmatprep.mubr.bf16.mxu0 %v5908_v0  ;;  %v5927_v0 = vrot.slane %v3238_v60, 9  ;;  %v5921_v1 = vrot.slane %v8198_v26, 9  ;;  %v8226_v62 = vrot.slane %v3304_v63, 4  ;;  %v3360_v47 = vrot.slane %v7834_v45, 5 }
  0xd3   : > { %v3363_v18 = vrot.slane %v7883_v8, 5  ;;  %v8235_v46 = vsel %vm7375_vm5, %v5928_v37, %v3353_v29  ;;  %v8239_v58 = vsel %vm7375_vm5, %v3355_v42, %v3356_v20  ;;  %v5929_v11 = vrot.slane %v3240_v4, 9 }
  0xd4   : > { %v8214_v31 = vsel %vm7375_vm5, %v5927_v0, %v3346_v51  ;;  %v2898_v45 = vsel %vm7080_vm2, %v2893_v16, %v8132_v39  ;;  %v2908_v8 = vsel %vm7080_vm2, %v2903_v59, %v2907_v9  ;;  %v6898_v51 = vld [vmem:[#allocation2 + $0x18] sm:$0xff]   ;;  %v5930_v19 = vrot.slane %v3241_v55, 9  ;;  %v9541_v59 = vld [vmem:[#allocation5_spill] sm:$0xff]  ;;  %v9542_v9 = vld [vmem:[#allocation4_spill] sm:$0xff] }
  0xd5   : > { %v8250_v41 = vsel %vm7375_vm5, %v5929_v11, %v3360_v47  ;;  %v3367_v39 = vrot.slane %v7869_v40, 5  ;;  %v3370_v16 = vrot.slane %v7892_v50, 5  ;;  %v5911_v0 = vcombine.low %v2898_v45, %v2908_v8  ;;  %v6941_v40 = vld [vmem:[#allocation2 + $0x28] sm:$0xf] }
  0xd6   : > { %v3374_v29 = vrot.slane %v9541_v59, 5  ;;  %v3377_v49 = vrot.slane %v9542_v9, 5  ;;  %v3311_v4 = vrot.slane %v6941_v40, 5  ;;  %v3244_v40 = vld [vmem:[#allocation2 + $0xa8] sm:$0xe]  ;;  %v6902_v59 = vld [vmem:[#allocation2 + $0x30] sm:$0xff]  }
  0xd7   : > { %6516 = vmatmul.mubr.bf16.gmra.mxu1 %v6887_v36  ;;  %v3307_v36 = vrot.slane %v8230_v23, 5  ;;  %v8264_v20 = vsel %vm7375_vm5, %v5930_v19, %v3367_v39  ;;  %v3369_v37 = vrot.slane %v3367_v39, 4  ;;  %v3243_v19 = vld [vmem:[#allocation2 + $0x9c] sm:$0xe]  ;;  %v9544_v39 = vld [vmem:[#allocation8_spill] sm:$0xff]  ;;  %v3398_v38 = vrot.slane %v8054_v30, 5 }
  0xd8   : > { %6519 = vmatprep.mubr.bf16.mxu1 %v6890_v44  ;;  %v3362_v44 = vrot.slane %v3360_v47, 4  ;;  %v3376_v50 = vrot.slane %v3374_v29, 4  ;;  %v6942_v47 = vld [vmem:[#allocation2 + $0x2c] sm:$0x1]  ;;  %v3404_v7 = vrot.slane %v3402_v24, 4 }
  0xd9   : > { %6568 = vmatmul.mubr.bf16.gmra.mxu0 %v5909_v15  ;;  %v3233_v15 = vld [vmem:[#allocation2 + $0x24] sm:$0xe]  ;;  %v8268_v11 = vsel %vm7375_vm5, %v3369_v37, %v3370_v16  ;;  %v9545_v37 = vld [vmem:[#allocation7_spill] sm:$0xff] }
  0xda   : > { %6571 = vmatprep.mubr.bf16.mxu0 %v5910_v21  ;;  %v8254_v60 = vsel %vm7375_vm5, %v3362_v44, %v3363_v18  ;;  %v3242_v21 = vld [vmem:[#allocation2 + $0x90] sm:$0xe]  ;;  %v3314_v18 = vrot.slane %v6942_v47, 5  ;;  %v5922_v44 = vrot.slane %v3233_v15, 9  ;;  %v8279_v55 = vsel %vm7375_vm5, %v3376_v50, %v3377_v49  ;;  %v6895_v16 = vld [vmem:[#allocation2 + $0xc0] sm:$0xff]  }
  0xdb   : > { %v5931_v42 = vrot.slane %v3242_v21, 9  ;;  %v3384_v21 = vrot.slane %v9544_v39, 5  ;;  %v6899_v15 = vld [vmem:[#allocation2 + $0x24] sm:$0xff]   ;;  %v9546_v47 = vld [vmem:[#allocation10_spill] sm:$0xff] }
  0xdd   : > { %v8272_v45 = vsel %vm7375_vm5, %v5931_v42, %v3374_v29  ;;  %v5932_v29 = vrot.slane %v3243_v19, 9  ;;  %v3313_v42 = vrot.slane %v3311_v4, 4 }
  0xdf   : > { %6520 = vmatmul.mubr.bf16.gmra.mxu1 %v6891_v32  ;;  %v9543_v32 = vld [vmem:[#allocation6_spill] sm:$0xff]  ;;  %v3315_v30 = vsel %vm7375_vm5, %v3313_v42, %v3314_v18  ;;  %v554_v18 = vld [vmem:[%s423_s17 + $0x8] sm:$0x1]  ;;  %v8358_v42 = vsel %vm7375_vm5, %v3404_v7, %v3405_v54 }
  0xe0   : > { %6523 = vmatprep.mubr.bf16.mxu1 %v6894_v52  ;;  %v3381_v8 = vrot.slane %v9543_v32, 5  ;;  %v3391_v32 = vrot.slane %v9546_v47, 5  ;;  %v3246_v47 = vld [vmem:[#allocation2 + $0xc0] sm:$0xe]  ;;  %558 = vst [vmem:[#allocation2 + $0xd4] sm:$0x1] %v554_v18 }
  0xe1   : > { %6572 = vmatmul.mubr.bf16.gmra.mxu0 %v5911_v0  ;;  %v3388_v0 = vrot.slane %v9545_v37, 5  ;;  %v9547_v37 = vld [vmem:[#allocation9_spill] sm:$0xff]  ;;  %v5935_v23 = vrot.slane %v3246_v47, 9  ;;  %v4118_v47 = vld [vmem:[#allocation2 + $0x20] sm:$0x1] }
  0xe2   : > { %6639 = vmatprep.mubr.bf16.mxu0 %v6898_v51  ;;  %v3383_v9 = vrot.slane %v3381_v8, 4  ;;  %v8288_v49 = vsel %vm7375_vm5, %v5932_v29, %v3381_v8  ;;  %v5933_v51 = vrot.slane %v3244_v40, 9  ;;  %v3395_v52 = vrot.slane %v9547_v37, 5  ;;  %v6903_v37 = vld [vmem:[#allocation2 + $0x3c] sm:$0xff]  }
  0xe3   : > { %v3390_v39 = vrot.slane %v3388_v0, 4  ;;  %v3305_v8 = vsel %vm7375_vm5, %v5921_v1, %v3304_v63  ;;  %v3308_v63 = vsel %vm7375_vm5, %v8226_v62, %v3307_v36  ;;  %v3312_v40 = vsel %vm7375_vm5, %v5922_v44, %v3311_v4  ;;  %v552_v4 = vld [vmem:[%s423_s17] sm:$0xff]  }
  0xe4   : > { %v8292_v50 = vsel %vm7375_vm5, %v3383_v9, %v3384_v21  ;;  %v6905_v21 = vld [vmem:[%s9489_s3 + $0x230] sm:$0xff]   ;;  %v8308_v29 = vsel %vm7375_vm5, %v5933_v51, %v3388_v0  ;;  %v3397_v0 = vrot.slane %v3395_v52, 4  ;;  %v5953_v36 = vcombine.low %v3305_v8, %v3308_v63  ;;  %556 = vst [vmem:[#allocation2 + $0xcc] sm:$0xff] %v552_v4   ;;  %v6906_v63 = vld [vmem:[#allocation2 + $0x48] sm:$0xff]  }
  0xe5   : > { %v8312_v9 = vsel %vm7375_vm5, %v3390_v39, %v3391_v32  ;;  %v5954_v44 = vcombine.low %v3312_v40, %v3315_v30  ;;  %v8360_v32 = vld [vmem:[#allocation2 + $0x1c] sm:$0xf]  ;;  %v4119_v30 = vld [vmem:[#allocation2 + $0x24] sm:$0xf]  ;;  %v6907_v8 = vld [vmem:[#allocation2 + $0x54] sm:$0xff]  }
  0xe6   : > { %v8338_v62 = vsel %vm7375_vm5, %v3397_v0, %v3398_v38  ;;  %v4178_v38 = vshrl.u32 %v8360_v32, 16  ;;  %v4936_v7 = vrot.slane %v8360_v32, 5  ;;  %v4189_v4 = vshrl.u32 %v4119_v30, 16 }
  0xe7   : > { %6524 = vmatmul.mubr.bf16.gmra.mxu1 %v6895_v16  ;;  %v3245_v16 = vld [vmem:[#allocation2 + $0xb4] sm:$0xe] }
  0xe8   : > { %6591 = vmatprep.mubr.bf16.mxu1 %v5952_v53  ;;  %v5934_v1 = vrot.slane %v3245_v16, 9  ;;  %v4174_v16 = vshll.u32 %v8360_v32, 16  ;;  %v4180_v54 = vrot.slane %v4178_v38, 4  ;;  %v6912_v32 = vld [vmem:[%s9489_s3 + $0x1e0] sm:$0xff]  }
  0xe9   : > { %6640 = vmatmul.mubr.bf16.vlgmr.msra.gmra.mxu0 %v6899_v15  ;;  %v4116_v15 = vld [vmem:[#allocation2 + $0x18] sm:$0xf] }
  0xea   : > { %v8334_v53 = vsel %vm7375_vm5, %v5934_v1, %v3395_v52  ;;  %6720 = vmatpush3.bf16.msra.mxu0 %v8085_v57  ;;  %6643 = vmatprep.mubr.bf16.mxu0 %v6902_v59  ;;  %v8348_v52 = vsel %vm7375_vm5, %v5935_v23, %v3402_v24  ;;  %v6904_v57 = vld [vmem:[%s9489_s3 + $0x1f0] sm:$0xff]   ;;  %v6909_v59 = vld [vmem:[%s9489_s3 + $0x228] sm:$0xff]   ;;  %v4165_v51 = vshrl.u32 %v4116_v15, 16  ;;  %v4168_v39 = vshll.u32 %v4116_v15, 16  ;;  %v6913_v1 = vld [vmem:[%s9489_s3 + $0x220] sm:$0xff]  }
  0xeb   : > { %6721 = vmatprep.subr.bf16.mxu0 %v6905_v21  ;;  %v8370_v24 = vrot.slane %v4174_v16, 5  ;;  %v8372_v23 = vld [vmem:[#allocation2 + $0x28] sm:$0xf]  ;;  %v4184_v16 = vshll.u32 %v4118_v47, 16 }
  0xec   : > { %v4167_v0 = vrot.slane %v4165_v51, 4  ;;  %v4170_v40 = vrot.slane %v4168_v39, 5  ;;  %v4198_v15 = vshll.u32 %v8372_v23, 16  ;;  %v4202_v51 = vshrl.u32 %v8372_v23, 16 }
  0xed   : > { %v4181_v39 = vor.u32 %v4180_v54, %v8370_v24  ;;  %v4122_v54 = vld [vmem:[#allocation2 + $0x30] sm:$0xf] }
  0xee   : > { %6722 = vmatpush3.bf16.msra.mxu0 %v6905_v21  ;;  %v6908_v21 = vld [vmem:[%s9489_s3 + $0x1e8] sm:$0xff]   ;;  %v8378_v18 = vpop.f32.mrf.mxu0  ;;  %v8395_v26 = vrot.slane %v4198_v15, 5  ;;  %v4204_v19 = vrot.slane %v4202_v51, 4  ;;  %v4213_v15 = vshrl.u32 %v4122_v54, 16 }
  0xef   : > { %6592 = vmatmul.mubr.bf16.vlgmr.msra.gmra.mxu1 %v5953_v36  ;;  %6723 = vmatprep.subr.bf16.mxu0 %v6909_v59  ;;  %v4870_v36 = vld [vmem:[#allocation2 + $0x18] sm:$0xe] }
  0xf0   : > { %6672 = vmatpush3.bf16.msra.mxu1 %v8118_v3  ;;  %6595 = vmatprep.mubr.bf16.mxu1 %v5954_v44  ;;  %v4171_v3 = vor.u32 %v4170_v40, %v4167_v0  ;;  %v4192_v44 = vshll.u32 %v4119_v30, 16  ;;  %v6056_v38 = vrot.slane %v4870_v36, 9  ;;  %v4191_v0 = vrot.slane %v4189_v4, 4  ;;  %v6910_v36 = vld [vmem:[#allocation2 + $0x60] sm:$0xff]  }
  0xf1   : > { %6673 = vmatprep.subr.bf16.mxu1 %v6904_v57  ;;  %6644 = vmatmul.mubr.bf16.gmra.mxu0 %v6903_v37  ;;  %v6917_v37 = vld [vmem:[%s9489_s3 + $0x218] sm:$0xff]   ;;  %v4938_v30 = vrot.slane %v4936_v7, 4  ;;  %v8404_v4 = vrot.slane %v4181_v39, 4 }
  0xf2   : > { %6647 = vmatprep.mubr.bf16.mxu0 %v6906_v63  ;;  %6724 = vmatpush3.bf16.msra.mxu0 %v6909_v59  ;;  %v4194_v40 = vrot.slane %v4192_v44, 5  ;;  %v4939_v63 = vrot.slane %v4118_v47, 5  ;;  %v8389_v59 = vld [vmem:[#allocation2 + $0x2c] sm:$0x1]  ;;  %v8393_v33 = vrot.slane %v4171_v3, 4  ;;  %v8406_v44 = vrot.slane %v4184_v16, 5 }
  0xf3   : > { %6725 = vmatprep.subr.bf16.mxu0 %v6913_v1  ;;  %v8402_v47 = vpop.f32.mrf.mxu1  ;;  %v6921_v3 = vld [vmem:[%s9489_s3 + $0x210] sm:$0xff]   ;;  %v8416_v25 = vsel %vm7375_vm5, %v6056_v38, %v4936_v7  ;;  %v4226_v7 = vshrl.u32 %v8397_v22, 16  ;;  %v4205_v16 = vor.u32 %v4204_v19, %v8395_v26  ;;  %v4943_v38 = vrot.slane %v8372_v23, 5 }
  0xf4   : > { %6674 = vmatpush3.bf16.msra.mxu1 %v6904_v57  ;;  %v8391_v57 = vpop.f32.mrf.mxu0  ;;  %9548 = vst [vmem:[#allocation3_spill] sm:$0xff] %v8402_v47  ;;  %v4195_v27 = vor.u32 %v4194_v40, %v4191_v0  ;;  %v8426_v12 = vsel %vm7375_vm5, %v4938_v30, %v4939_v63  ;;  %v4177_v39 = vsel %vm7080_vm2, %v8393_v33, %v8370_v24  ;;  %v8438_v0 = vld [vmem:[#allocation2 + $0x38] sm:$0x1]  ;;  %v4215_v40 = vrot.slane %v4213_v15, 4  ;;  %v4125_v30 = vld [vmem:[#allocation2 + $0x3c] sm:$0xf] }
  0xf5   : > { %6675 = vmatprep.subr.bf16.mxu1 %v6908_v21  ;;  %v8440_v63 = vpop.f32.mrf.mxu1  ;;  %v4872_v19 = vld [vmem:[#allocation2 + $0x30] sm:$0xe]  ;;  %v4240_v61 = vshll.u32 %v4125_v30, 16 }
  0xf6   : > { %6726 = vmatpush3.bf16.msra.mxu0 %v6913_v1  ;;  %v8419_v1 = vld [vmem:[#allocation2 + $0x24] sm:$0xe]  ;;  %v8430_v51 = vpop.f32.mrf.mxu0  ;;  %9549 = vst [vmem:[#allocation5_spill] sm:$0xff] %v8440_v63  ;;  %v8449_v23 = vrot.slane %v4195_v27, 4  ;;  %v4232_v27 = vshll.u32 %v8438_v0, 16  ;;  %v6914_v63 = vld [vmem:[#allocation2 + $0x78] sm:$0xff]  }
  0xf7   : > { %6596 = vmatmul.mubr.bf16.gmra.mxu1 %v5955_v2  ;;  %v4208_v2 = vshll.u32 %v8389_v59, 16  ;;  %6727 = vmatprep.subr.bf16.mxu0 %v6917_v37  ;;  %v8470_v47 = vpop.f32.mrf.mxu1 }
  0xf8   : > { %6599 = vmatprep.mubr.bf16.mxu1 %v5956_v34  ;;  %6676 = vmatpush3.bf16.msra.mxu1 %v6908_v21  ;;  %v4216_v34 = vshll.u32 %v4122_v54, 16  ;;  %v4222_v21 = vshll.u32 %v8397_v22, 16  ;;  %v6057_v54 = vrot.slane %v8419_v1, 9  ;;  %v4237_v1 = vshrl.u32 %v4125_v30, 16  ;;  %9551 = vst [vmem:[#allocation6_spill] sm:$0xff] %v8470_v47 }
  0xf9   : > { %6677 = vmatprep.subr.bf16.mxu1 %v6912_v32  ;;  %6648 = vmatmul.mubr.bf16.gmra.mxu0 %v6907_v8  ;;  %v4187_v8 = vsel %vm7080_vm2, %v8404_v4, %v8406_v44  ;;  %v8451_v15 = vrot.slane %v4208_v2, 5  ;;  %v6920_v4 = vld [vmem:[%s9489_s3 + $0x1d0] sm:$0xff]   ;;  %v6925_v44 = vld [vmem:[%s9489_s3 + $0x208] sm:$0xff]   ;;  %v4950_v2 = vrot.slane %v8397_v22, 5  ;;  %v6058_v22 = vrot.slane %v4872_v19, 9 }
  0xfa   : > { %6651 = vmatprep.mubr.bf16.mxu0 %v6910_v36  ;;  %6728 = vmatpush3.bf16.msra.mxu0 %v6917_v37  ;;  %v4218_v33 = vrot.slane %v4216_v34, 5  ;;  %v8447_v24 = vrot.slane %v4222_v21, 5  ;;  %v4946_v36 = vrot.slane %v8389_v59, 5  ;;  %v4228_v37 = vrot.slane %v4226_v7, 4  ;;  %v6911_v34 = vld [vmem:[#allocation2 + $0x6c] sm:$0xff]   ;;  %v8464_v59 = vpop.f32.mrf.mxu0 }
  0xfb   : > { %6729 = vmatprep.subr.bf16.mxu0 %v6921_v3  ;;  %9550 = vst [vmem:[#allocation4_spill] sm:$0xff] %v8464_v59  ;;  %v4206_v21 = vrot.slane %v4205_v16, 4  ;;  %v4945_v7 = vrot.slane %v4943_v38, 4  ;;  %v4250_v59 = vshrl.u32 %v8454_v17, 16  ;;  %v9552_v16 = vcombine.low %v8203_v35, %v8207_v28 }
  0xfc   : > { %6678 = vmatpush3.bf16.msra.mxu1 %v6912_v32  ;;  %v4219_v32 = vor.u32 %v4218_v33, %v4215_v40  ;;  %v4229_v56 = vor.u32 %v4228_v37, %v8447_v24  ;;  %v4246_v33 = vshll.u32 %v8454_v17, 16  ;;  %v4952_v30 = vrot.slane %v4950_v2, 4  ;;  %v8490_v37 = vld [vmem:[#allocation2 + $0x44] sm:$0x1] }
  0xfd   : > { %6679 = vmatprep.subr.bf16.mxu1 %v6916_v6  ;;  %v4953_v19 = vrot.slane %v8438_v0, 5  ;;  %v4234_v28 = vrot.slane %v4232_v27, 5  ;;  %v4211_v0 = vsel %vm7080_vm2, %v4206_v21, %v8451_v15  ;;  %v8511_v27 = vpop.f32.mrf.mxu1  ;;  %v4256_v15 = vshll.u32 %v8490_v37, 16 }
  0xfe   : > { %6730 = vmatpush3.bf16.msra.mxu0 %v6921_v3  ;;  %v8472_v40 = vrot.slane %v4219_v32, 4  ;;  %v4230_v35 = vrot.slane %v4229_v56, 4  ;;  %v4242_v32 = vrot.slane %v4240_v61, 5  ;;  %v8507_v61 = vsel %vm7375_vm5, %v4945_v7, %v4946_v36  ;;  %v8509_v56 = vld [vmem:[#allocation2 + $0x4c] sm:$0xf]  ;;  %9553 = vst [vmem:[#allocation8_spill] sm:$0xff] %v8511_v27 }
  0xff   : > { %6600 = vmatmul.mubr.bf16.gmra.mxu1 %v5957_v48  ;;  %v8485_v48 = vcombine.low %v4177_v39, %v4187_v8  ;;  %6731 = vmatprep.subr.bf16.mxu0 %v6925_v44  ;;  %v4201_v39 = vsel %vm7080_vm2, %v8449_v23, %v8395_v26  ;;  %v8503_v8 = vsel %vm7375_vm5, %v6057_v54, %v4943_v38  ;;  %v8521_v38 = vrot.slane %v4246_v33, 5  ;;  %v8541_v33 = vld [vmem:[#allocation2 + $0x50] sm:$0x1]  ;;  %v8552_v3 = vld [vmem:[#allocation2 + $0x58] sm:$0xf] }
 0x100   : > { %6603 = vmatprep.mubr.bf16.mxu1 %v9552_v16  ;;  %6680 = vmatpush3.bf16.msra.mxu1 %v6916_v6  ;;  %v4239_v6 = vrot.slane %v4237_v1, 4  ;;  %v4128_v16 = vld [vmem:[#allocation2 + $0x48] sm:$0xf]  ;;  %v8492_v47 = vpop.f32.mrf.mxu0  ;;  %v4225_v26 = vsel %vm7080_vm2, %v8472_v40, %v8447_v24  ;;  %v8519_v23 = vsel %vm7375_vm5, %v6058_v22, %v4950_v2  ;;  %v4252_v54 = vrot.slane %v4250_v59, 4  ;;  %v6928_v24 = vld [vmem:[%s9489_s3 + $0x1c0] sm:$0xff]  }
 0x101   : > { %6681 = vmatprep.subr.bf16.mxu1 %v6920_v4  ;;  %6652 = vmatmul.mubr.bf16.gmra.mxu0 %v6911_v34  ;;  %v4261_v36 = vshrl.u32 %v4128_v16, 16  ;;  %v6915_v1 = vld [vmem:[#allocation2 + $0x84] sm:$0xff]   ;;  %v4235_v2 = vsel %vm7080_vm2, %v4230_v35, %v4234_v28  ;;  %v4270_v59 = vshll.u32 %v8509_v56, 16  ;;  %v4274_v21 = vshrl.u32 %v8509_v56, 16  ;;  %v6918_v28 = vld [vmem:[#allocation2 + $0x90] sm:$0xff]  }
 0x102   : > { %6655 = vmatprep.mubr.bf16.mxu0 %v6914_v63  ;;  %6732 = vmatpush3.bf16.msra.mxu0 %v6925_v44  ;;  %v8525_v63 = vsel %vm7375_vm5, %v4952_v30, %v4953_v19  ;;  %v4264_v44 = vshll.u32 %v4128_v16, 16  ;;  %v4243_v34 = vor.u32 %v4242_v32, %v4239_v6  ;;  %v8535_v7 = vpop.f32.mrf.mxu0  ;;  %v8537_v40 = vcombine.low %v4201_v39, %v4211_v0  ;;  %v4131_v16 = vld [vmem:[#allocation2 + $0x54] sm:$0xf] }
 0x103   : > { %6733 = vmatprep.subr.bf16.mxu0 %v6929_v10  ;;  %v4263_v30 = vrot.slane %v4261_v36, 4  ;;  %v9554_v35 = vcombine.low %v8214_v31, %v8218_v5  ;;  %v8546_v6 = vpop.f32.mrf.mxu1  ;;  %v4253_v32 = vor.u32 %v4252_v54, %v8521_v38  ;;  %v4957_v39 = vrot.slane %v8454_v17, 5 }
 0x104   : > { %6682 = vmatpush3.bf16.msra.mxu1 %v6920_v4  ;;  %v4873_v4 = vld [vmem:[#allocation2 + $0x3c] sm:$0xe]  ;;  %v4266_v19 = vrot.slane %v4264_v44, 5  ;;  %9555 = vst [vmem:[#allocation7_spill] sm:$0xff] %v8546_v6  ;;  %v8550_v0 = vrot.slane %v4270_v59, 5  ;;  %v4276_v22 = vrot.slane %v4274_v21, 4  ;;  %v9556_v36 = vcombine.low %v8235_v46, %v8239_v58  ;;  %v8564_v6 = vpop.f32.mrf.mxu0 }
 0x105   : > { %6683 = vmatprep.subr.bf16.mxu1 %v6924_v14  ;;  %v8557_v31 = vcombine.low %v4225_v26, %v4235_v2  ;;  %v6059_v54 = vrot.slane %v4873_v4, 9  ;;  %v4874_v44 = vld [vmem:[#allocation2 + $0x48] sm:$0xe]  ;;  %v4244_v17 = vrot.slane %v4243_v34, 4  ;;  %v4280_v21 = vshll.u32 %v8541_v33, 16  ;;  %9557 = vst [vmem:[#allocation10_spill] sm:$0xff] %v8564_v6 }
 0x106   : > { %6734 = vmatpush3.bf16.msra.mxu0 %v6929_v10  ;;  %v8561_v10 = vrot.slane %v4256_v15, 5  ;;  %v4267_v59 = vor.u32 %v4266_v19, %v4263_v30  ;;  %v4277_v46 = vor.u32 %v4276_v22, %v8550_v0  ;;  %v4964_v58 = vrot.slane %v8509_v56, 5  ;;  %v8569_v15 = vpop.f32.mrf.mxu1 }
 0x107   : > { %6604 = vmatmul.mubr.bf16.gmra.mxu1 %v9554_v35  ;;  %v4285_v35 = vshrl.u32 %v4131_v16, 16  ;;  %v4294_v26 = vshll.u32 %v8552_v3, 16  ;;  %9558 = vst [vmem:[#allocation9_spill] sm:$0xff] %v8569_v15  ;;  %v4254_v2 = vrot.slane %v4253_v32, 4  ;;  %v4959_v4 = vrot.slane %v4957_v39, 4 }
 0x108   : > { %6607 = vmatprep.mubr.bf16.mxu1 %v9556_v36  ;;  %6684 = vmatpush3.bf16.msra.mxu1 %v6924_v14  ;;  %v4288_v14 = vshll.u32 %v4131_v16, 16  ;;  %v4960_v34 = vrot.slane %v8490_v37, 5  ;;  %v6060_v30 = vrot.slane %v4874_v44, 9  ;;  %v4298_v56 = vshrl.u32 %v8552_v3, 16  ;;  %v4134_v16 = vld [vmem:[#allocation2 + $0x60] sm:$0xf]  ;;  %v8585_v44 = vpop.f32.mrf.mxu0  ;;  %v8590_v6 = vpop.f32.mrf.mxu1 }
 0x109   : > { %6685 = vmatprep.subr.bf16.mxu1 %v6928_v24  ;;  %6656 = vmatmul.mubr.bf16.gmra.mxu0 %v6915_v1  ;;  %v8574_v1 = vsel %vm7375_vm5, %v6059_v54, %v4957_v39  ;;  %v4287_v19 = vrot.slane %v4285_v35, 4  ;;  %v6919_v36 = vld [vmem:[#allocation2 + $0x9c] sm:$0xff]   ;;  %v4268_v32 = vrot.slane %v4267_v59, 4  ;;  %v4967_v5 = vrot.slane %v8541_v33, 5  ;;  %9560 = vst [vmem:[#allocation11_spill] sm:$0xff] %v8590_v6 }
 0x10a   : > { %6659 = vmatprep.mubr.bf16.mxu0 %v6918_v28  ;;  %v4290_v22 = vrot.slane %v4288_v14, 5  ;;  %v4249_v28 = vsel %vm7080_vm2, %v4244_v17, %v8521_v38  ;;  %v8581_v37 = vrot.slane %v4294_v26, 5  ;;  %v4278_v39 = vrot.slane %v4277_v46, 4  ;;  %v4133_v14 = vld [vmem:[#allocation2 + $0x5c] sm:$0x1]  ;;  %v6922_v38 = vld [vmem:[#allocation2 + $0xa8] sm:$0xff]  }
 0x10b   : > { %v4282_v54 = vrot.slane %v4280_v21, 5  ;;  %v4966_v35 = vrot.slane %v4964_v58, 4  ;;  %v4300_v15 = vrot.slane %v4298_v56, 4  ;;  %v9559_v27 = vcombine.low %v8250_v41, %v8254_v60  ;;  %v8627_v56 = vld [vmem:[#allocation2 + $0x68] sm:$0x1] }
 0x10c   : > { %6686 = vmatpush3.bf16.msra.mxu1 %v6928_v24  ;;  %v8583_v24 = vld [vmem:[#allocation2 + $0x64] sm:$0xf]  ;;  %v4259_v33 = vsel %vm7080_vm2, %v4254_v2, %v8561_v10  ;;  %v8597_v17 = vsel %vm7375_vm5, %v4959_v4, %v4960_v34  ;;  %v8601_v59 = vsel %vm7375_vm5, %v6060_v30, %v4964_v58  ;;  %v4309_v21 = vshrl.u32 %v4134_v16, 16  ;;  %v4875_v58 = vld [vmem:[#allocation2 + $0x54] sm:$0xe] }
 0x10d   : > { %v9561_v41 = vcombine.low %v8264_v20, %v8268_v11  ;;  %v4291_v60 = vor.u32 %v4290_v22, %v4287_v19  ;;  %v4312_v46 = vshll.u32 %v4134_v16, 16  ;;  %v4318_v26 = vshll.u32 %v8583_v24, 16  ;;  %v8621_v22 = vpop.f32.mrf.mxu1 }
 0x10e   : > { %v4273_v10 = vsel %vm7080_vm2, %v4268_v32, %v8550_v0  ;;  %v4301_v2 = vor.u32 %v4300_v15, %v8581_v37  ;;  %v4304_v4 = vshll.u32 %v4133_v14, 16  ;;  %v4322_v34 = vshrl.u32 %v8583_v24, 16  ;;  %9562 = vst [vmem:[#allocation12_spill] sm:$0xff] %v8621_v22  ;;  %v4137_v32 = vld [vmem:[#allocation2 + $0x6c] sm:$0xf] }
 0x10f   : > { %6608 = vmatmul.mubr.bf16.gmra.mxu1 %v9559_v27  ;;  %v4971_v27 = vrot.slane %v8552_v3, 5  ;;  %v4283_v20 = vsel %vm7080_vm2, %v4278_v39, %v4282_v54  ;;  %v8619_v11 = vsel %vm7375_vm5, %v4966_v35, %v4967_v5  ;;  %v4311_v3 = vrot.slane %v4309_v21, 4  ;;  %v8633_v21 = vld [vmem:[#allocation2 + $0x70] sm:$0xf] }
 0x110   : > { %6611 = vmatprep.mubr.bf16.mxu1 %v9561_v41  ;;  %v4314_v19 = vrot.slane %v4312_v46, 5  ;;  %v8623_v0 = vcombine.low %v4249_v28, %v4259_v33  ;;  %v8629_v16 = vrot.slane %v4318_v26, 5  ;;  %v8631_v39 = vrot.slane %v4291_v60, 4  ;;  %v6923_v46 = vld [vmem:[#allocation2 + $0xb4] sm:$0xff]   ;;  %v4876_v60 = vld [vmem:[#allocation2 + $0x60] sm:$0xe] }
 0x111   : > { %6660 = vmatmul.mubr.bf16.gmra.mxu0 %v6919_v36  ;;  %v8613_v30 = vpop.f32.mrf.mxu0  ;;  %v4324_v36 = vrot.slane %v4322_v34, 4  ;;  %v6061_v5 = vrot.slane %v4875_v58, 9  ;;  %v4973_v54 = vrot.slane %v4971_v27, 4  ;;  %v4974_v35 = vrot.slane %v4133_v14, 5 }
 0x112   : > { %6663 = vmatprep.mubr.bf16.mxu0 %v6922_v38  ;;  %v8635_v41 = vcombine.low %v4273_v10, %v4283_v20  ;;  %v4302_v38 = vrot.slane %v4301_v2, 4  ;;  %v4306_v33 = vrot.slane %v4304_v4, 5  ;;  %v4315_v26 = vor.u32 %v4314_v19, %v4311_v3  ;;  %v6926_v20 = vld [vmem:[#allocation2 + $0xc0] sm:$0xff]  }
 0x113   : > { %v8639_v15 = vpop.f32.mrf.mxu0  ;;  %v4328_v34 = vshll.u32 %v8627_v56, 16  ;;  %v4978_v58 = vrot.slane %v8583_v24, 5  ;;  %v4333_v22 = vshrl.u32 %v4137_v32, 16  ;;  %v9564_v14 = vcombine.low %v8272_v45, %v8279_v55 }
 0x114   : > { %9563 = vst [vmem:[#allocation13_spill] sm:$0xff] %v8639_v15  ;;  %v8646_v10 = vpop.f32.mrf.mxu1  ;;  %v4325_v2 = vor.u32 %v4324_v36, %v8629_v16  ;;  %v4336_v4 = vshll.u32 %v4137_v32, 16  ;;  %v4342_v28 = vshll.u32 %v8633_v21, 16  ;;  %v4346_v3 = vshrl.u32 %v8633_v21, 16  ;;  %v4140_v32 = vld [vmem:[#allocation2 + $0x78] sm:$0xf] }
 0x115   : > { %9565 = vst [vmem:[#allocation14_spill] sm:$0xff] %v8646_v10  ;;  %v9566_v19 = vcombine.low %v8288_v49, %v8292_v50  ;;  %v4297_v45 = vsel %vm7080_vm2, %v8631_v39, %v8581_v37  ;;  %v8660_v55 = vsel %vm7375_vm5, %v6061_v5, %v4971_v27  ;;  %v8664_v24 = vsel %vm7375_vm5, %v4973_v54, %v4974_v35  ;;  %v8670_v10 = vld [vmem:[#allocation2 + $0x7c] sm:$0xf]  ;;  %v8672_v37 = vpop.f32.mrf.mxu0  ;;  %v4139_v54 = vld [vmem:[#allocation2 + $0x74] sm:$0x1] }
 0x116   : > { %v4335_v36 = vrot.slane %v4333_v22, 4  ;;  %v6062_v49 = vrot.slane %v4876_v60, 9  ;;  %v4338_v50 = vrot.slane %v4336_v4, 5  ;;  %9567 = vst [vmem:[#allocation15_spill] sm:$0xff] %v8672_v37  ;;  %v4330_v27 = vrot.slane %v4328_v34, 5  ;;  %v8675_v22 = vpop.f32.mrf.mxu1 }
 0x117   : > { %6612 = vmatmul.mubr.bf16.gmra.mxu1 %v9564_v14  ;;  %v4307_v14 = vsel %vm7080_vm2, %v4302_v38, %v4306_v33  ;;  %v4980_v39 = vrot.slane %v4978_v58, 4  ;;  %v4981_v5 = vrot.slane %v8627_v56, 5  ;;  %v4348_v35 = vrot.slane %v4346_v3, 4  ;;  %9568 = vst [vmem:[#allocation16_spill] sm:$0xff] %v8675_v22 }
 0x118   : > { %6615 = vmatprep.mubr.bf16.mxu1 %v9566_v19  ;;  %v8668_v19 = vrot.slane %v4342_v28, 5  ;;  %v4316_v6 = vrot.slane %v4315_v26, 4  ;;  %v4326_v38 = vrot.slane %v4325_v2, 4  ;;  %v4339_v33 = vor.u32 %v4338_v50, %v4335_v36  ;;  %v4877_v28 = vld [vmem:[#allocation2 + $0x6c] sm:$0xe]  ;;  %v8685_v26 = vpop.f32.mrf.mxu0 }
 0x119   : > { %6664 = vmatmul.mubr.bf16.gmra.mxu0 %v6923_v46  ;;  %v4357_v60 = vshrl.u32 %v4140_v32, 16  ;;  %v4985_v4 = vrot.slane %v8633_v21, 5  ;;  %v4360_v15 = vshll.u32 %v4140_v32, 16  ;;  %v4366_v46 = vshll.u32 %v8670_v10, 16  ;;  %v6927_v2 = vld [vmem:[#allocation2 + $0xcc] sm:$0xff]  }
 0x11a   : > { %6667 = vmatprep.mubr.bf16.mxu0 %v6926_v20  ;;  %v4370_v34 = vshrl.u32 %v8670_v10, 16  ;;  %v8682_v56 = vsel %vm7375_vm5, %v6062_v49, %v4978_v58  ;;  %v4349_v3 = vor.u32 %v4348_v35, %v8668_v19  ;;  %v4352_v22 = vshll.u32 %v4139_v54, 16  ;;  %v8696_v58 = vpop.f32.mrf.mxu1 }
 0x11b   : > { %v4359_v20 = vrot.slane %v4357_v60, 4  ;;  %v8689_v36 = vsel %vm7375_vm5, %v4980_v39, %v4981_v5  ;;  %v4362_v21 = vrot.slane %v4360_v15, 5  ;;  %v8691_v32 = vrot.slane %v4366_v46, 5  ;;  %9570 = vst [vmem:[#allocation17_spill] sm:$0xff] %v8696_v58  ;;  %v8705_v15 = vld [vmem:[#allocation2 + $0x80] sm:$0x1] }
 0x11c   : > { %v4372_v50 = vrot.slane %v4370_v34, 4  ;;  %v9569_v37 = vcombine.low %v8308_v29, %v8312_v9  ;;  %v8698_v49 = vcombine.low %v4297_v45, %v4307_v14  ;;  %v4321_v39 = vsel %vm7080_vm2, %v4316_v6, %v8629_v16  ;;  %v4143_v60 = vld [vmem:[#allocation2 + $0x84] sm:$0xf]  ;;  %v9609_v13 = vld [vmem:[#allocation14_spill] sm:$0xff] }
 0x11d   : > { %v6063_v5 = vrot.slane %v4877_v28, 9  ;;  %v9571_v46 = vcombine.low %v8334_v53, %v8338_v62  ;;  %v4331_v29 = vsel %vm7080_vm2, %v4326_v38, %v4330_v27  ;;  %v8712_v9 = vrot.slane %v4339_v33, 4  ;;  %v8722_v33 = vpop.f32.mrf.mxu1 }
 0x11e   : > { %v4987_v45 = vrot.slane %v4985_v4, 4  ;;  %v4988_v14 = vrot.slane %v4139_v54, 5  ;;  %v4350_v16 = vrot.slane %v4349_v3, 4  ;;  %v4354_v28 = vrot.slane %v4352_v22, 5  ;;  %9573 = vst [vmem:[#allocation19_spill] sm:$0xff] %v8722_v33 }
 0x11f   : > { %6616 = vmatmul.mubr.bf16.gmra.mxu1 %v9569_v37  ;;  %v8714_v37 = vld [vmem:[#allocation2 + $0x88] sm:$0xf]  ;;  %v4363_v34 = vor.u32 %v4362_v21, %v4359_v20  ;;  %v4373_v53 = vor.u32 %v4372_v50, %v8691_v32  ;;  %v4376_v62 = vshll.u32 %v8705_v15, 16  ;;  %v4381_v27 = vshrl.u32 %v4143_v60, 16  ;;  %v4878_v3 = vld [vmem:[#allocation2 + $0x78] sm:$0xe] }
 0x120   : > { %6619 = vmatprep.mubr.bf16.mxu1 %v9571_v46  ;;  %v4384_v38 = vshll.u32 %v4143_v60, 16  ;;  %v9574_v54 = vcombine.low %v8416_v25, %v8426_v12  ;;  %v8727_v46 = vcombine.low %v4321_v39, %v4331_v29  ;;  %v8731_v22 = vsel %vm7375_vm5, %v6063_v5, %v4985_v4  ;;  %v8745_v12 = vld [vmem:[#allocation2 + $0x8c] sm:$0x1]  ;;  %v4146_v5 = vld [vmem:[#allocation2 + $0x90] sm:$0xf] }
 0x121   : > { %v8718_v35 = vpop.f32.mrf.mxu0  ;;  %6668 = vmatmul.mubr.bf16.gmra.mxu0 %v6927_v2  ;;  %v4390_v20 = vshll.u32 %v8714_v37, 16  ;;  %v4394_v2 = vshrl.u32 %v8714_v37, 16  ;;  %v4345_v50 = vsel %vm7080_vm2, %v8712_v9, %v8668_v19  ;;  %v8743_v25 = vsel %vm7375_vm5, %v4987_v45, %v4988_v14  ;;  %v8750_v33 = vld [vmem:[#allocation2 + $0x94] sm:$0xf] }
 0x122   : > { %9572 = vst [vmem:[#allocation18_spill] sm:$0xff] %v8718_v35  ;;  %6735 = vmatprep.mubr.bf16.mxu0 %v9574_v54  ;;  %v4383_v4 = vrot.slane %v4381_v27, 4  ;;  %v4386_v39 = vrot.slane %v4384_v38, 5  ;;  %v4364_v60 = vrot.slane %v4363_v34, 4  ;;  %v4992_v29 = vrot.slane %v8670_v10, 5 }
 0x123   : > { %v8735_v21 = vpop.f32.mrf.mxu0  ;;  %v8748_v54 = vrot.slane %v4390_v20, 5  ;;  %v4396_v6 = vrot.slane %v4394_v2, 4  ;;  %v4355_v19 = vsel %vm7080_vm2, %v4350_v16, %v4354_v28  ;;  %v4374_v9 = vrot.slane %v4373_v53, 4  ;;  %v4879_v20 = vld [vmem:[#allocation2 + $0x84] sm:$0xe] }
 0x124   : > { %9575 = vst [vmem:[#allocation20_spill] sm:$0xff] %v8735_v21  ;;  %v4378_v45 = vrot.slane %v4376_v62, 5  ;;  %v6064_v14 = vrot.slane %v4878_v3, 9  ;;  %v9578_v34 = vcombine.low %v8348_v52, %v8358_v42  ;;  %v4387_v27 = vor.u32 %v4386_v39, %v4383_v4 }
 0x125   : > { %v8752_v58 = vpop.f32.mrf.mxu0  ;;  %v4400_v38 = vshll.u32 %v8745_v12, 16  ;;  %v4405_v2 = vshrl.u32 %v4146_v5, 16  ;;  %v4397_v16 = vor.u32 %v4396_v6, %v8748_v54  ;;  %v4999_v28 = vrot.slane %v8714_v37, 5 }
 0x126   : > { %9576 = vst [vmem:[#allocation21_spill] sm:$0xff] %v8752_v58  ;;  %v4408_v53 = vshll.u32 %v4146_v5, 16  ;;  %v4414_v52 = vshll.u32 %v8750_v33, 16  ;;  %v4369_v62 = vsel %vm7080_vm2, %v4364_v60, %v8691_v32  ;;  %v4994_v3 = vrot.slane %v4992_v29, 4  ;;  %v8781_v5 = vld [vmem:[#allocation2 + $0x98] sm:$0x1] }
 0x127   : > { %v8756_v21 = vpop.f32.mrf.mxu1  ;;  %6620 = vmatmul.mubr.bf16.gmra.mxu1 %v9578_v34  ;;  %v8764_v58 = vpop.f32.mrf.mxu0  ;;  %v4995_v4 = vrot.slane %v8705_v15, 5  ;;  %v4407_v39 = vrot.slane %v4405_v2, 4  ;;  %v4379_v37 = vsel %vm7080_vm2, %v4374_v9, %v4378_v45  ;;  %v6065_v6 = vrot.slane %v4879_v20, 9  ;;  %v4149_v9 = vld [vmem:[#allocation2 + $0x9c] sm:$0xf] }
 0x128   : > { %9577 = vst [vmem:[#allocation22_spill] sm:$0xff] %v8756_v21  ;;  %9579 = vst [vmem:[#allocation23_spill] sm:$0xff] %v8764_v58  ;;  %6687 = vmatprep.mubr.bf16.mxu1 %v8485_v48  ;;  %v9581_v48 = vcombine.low %v8503_v8, %v8507_v61  ;;  %v4410_v10 = vrot.slane %v4408_v53, 5  ;;  %v9583_v32 = vcombine.low %v8519_v23, %v8525_v63  ;;  %v4388_v60 = vrot.slane %v4387_v27, 4  ;;  %v8794_v58 = vld [vmem:[#allocation2 + $0xa0] sm:$0xf] }
 0x129   : > { %v8770_v42 = vpop.f32.mrf.mxu1  ;;  %v6449_v34 = vpop.f32.mrf.mxu0  ;;  %v8789_v15 = vcombine.low %v4345_v50, %v4355_v19  ;;  %v5002_v8 = vrot.slane %v8745_v12, 5  ;;  %v8792_v61 = vrot.slane %v4414_v52, 5  ;;  %v4398_v20 = vrot.slane %v4397_v16, 4 }
 0x12a   : > { %9580 = vst [vmem:[#allocation24_spill] sm:$0xff] %v8770_v42  ;;  %6736 = vmatmul.mubr.bf16.vlgmr.msra.gmra.mxu0 %v9581_v48  ;;  %v4418_v42 = vshrl.u32 %v8750_v33, 16  ;;  %v4402_v2 = vrot.slane %v4400_v38, 5  ;;  %v5001_v53 = vrot.slane %v4999_v28, 4  ;;  %v8798_v35 = vcombine.low %v4369_v62, %v4379_v37  ;;  %v4880_v38 = vld [vmem:[#allocation2 + $0x90] sm:$0xe] }
 0x12b   : > { %v8784_v21 = vpop.f32.mrf.mxu1  ;;  %6739 = vmatprep.mubr.bf16.mxu0 %v9583_v32  ;;  %v1931_v45 = vpop.f32.mrf.mxu0  ;;  %v8802_v23 = vsel %vm7375_vm5, %v6064_v14, %v4992_v29  ;;  %v4411_v63 = vor.u32 %v4410_v10, %v4407_v39  ;;  %v4424_v50 = vshll.u32 %v8781_v5, 16  ;;  %v8807_v19 = vsel %vm7375_vm5, %v4994_v3, %v4995_v4 }
 0x12c   : > { %9582 = vst [vmem:[#allocation25_spill] sm:$0xff] %v8784_v21  ;;  %v4420_v48 = vrot.slane %v4418_v42, 4  ;;  %v8811_v27 = vsel %vm7375_vm5, %v6065_v6, %v4999_v28  ;;  %v4429_v16 = vshrl.u32 %v4149_v9, 16  ;;  %v4432_v52 = vshll.u32 %v4149_v9, 16 }
 0x12d   : > { %v8796_v21 = vpop.f32.mrf.mxu1  ;;  %v6450_v12 = vpop.f32.mrf.mxu0  ;;  %v5006_v14 = vrot.slane %v8750_v33, 5  ;;  %v4438_v10 = vshll.u32 %v8794_v58, 16  ;;  %v4442_v62 = vshrl.u32 %v8794_v58, 16  ;;  %v4393_v28 = vsel %vm7080_vm2, %v4388_v60, %v8748_v54 }
 0x12e   : > { %v4421_v29 = vor.u32 %v4420_v48, %v8792_v61  ;;  %v8827_v39 = vsel %vm7375_vm5, %v5001_v53, %v5002_v8  ;;  %v8829_v37 = vrot.slane %v4411_v63, 4  ;;  %v8831_v6 = vrot.slane %v4424_v50, 5  ;;  %v4152_v53 = vld [vmem:[#allocation2 + $0xa8] sm:$0xf] }
 0x12f   : > { %v6401_v42 = vpop.f32.mrf.mxu1  ;;  %6688 = vmatmul.mubr.bf16.vlgmr.msra.gmra.mxu1 %v8537_v40  ;;  %v1934_v4 = vpop.f32.mrf.mxu0  ;;  %v4403_v40 = vsel %vm7080_vm2, %v4398_v20, %v4402_v2  ;;  %v5009_v32 = vrot.slane %v8781_v5, 5  ;;  %v9584_v20 = vcombine.low %v8574_v1, %v8597_v17  ;;  %v4431_v8 = vrot.slane %v4429_v16, 4 }
 0x130   : > { %v1487_v3 = vadd.f32 %v6401_v42, %v8378_v18  ;;  %6691 = vmatprep.mubr.bf16.mxu1 %v8557_v31  ;;  %v6066_v18 = vrot.slane %v4880_v38, 9  ;;  %v8834_v31 = vld [vmem:[#allocation2 + $0xa4] sm:$0x1]  ;;  %v4434_v2 = vrot.slane %v4432_v52, 5  ;;  %v9585_v63 = vcombine.low %v8601_v59, %v8619_v11 }
 0x131   : > { %v1478_v33 = vpop.f32.mrf.mxu1  ;;  %v6453_v60 = vpop.f32.mrf.mxu0  ;;  %v8845_v5 = vrot.slane %v4421_v29, 4  ;;  %v5008_v50 = vrot.slane %v5006_v14, 4  ;;  %v4444_v38 = vrot.slane %v4442_v62, 4  ;;  %v4448_v16 = vshll.u32 %v8834_v31, 16 }
 0x132   : > { %v8836_v9 = vadd.f32 %v6449_v34, %v1487_v3  ;;  %v1479_v54 = vadd.f32 %v1478_v33, %v8391_v57  ;;  %6740 = vmatmul.mubr.bf16.gmra.mxu0 %v9584_v20  ;;  %v8847_v34 = vrot.slane %v4438_v10, 5  ;;  %v8855_v3 = vcombine.low %v4393_v28, %v4403_v40  ;;  %v8870_v40 = vld [vmem:[#allocation2 + $0xac] sm:$0xf]  ;;  %v4881_v20 = vld [vmem:[#allocation2 + $0x9c] sm:$0xe] }
 0x133   : > { %v6402_v48 = vpop.f32.mrf.mxu1  ;;  %6743 = vmatprep.mubr.bf16.mxu0 %v9585_v63  ;;  %v1947_v1 = vpop.f32.mrf.mxu0  ;;  %v8861_v11 = vsel %vm7375_vm5, %v6066_v18, %v5006_v14  ;;  %v4435_v28 = vor.u32 %v4434_v2, %v4431_v8  ;;  %v8879_v14 = vsel %vm7375_vm5, %v5008_v50, %v5009_v32  ;;  %v4462_v32 = vshll.u32 %v8870_v40, 16 }
 0x134   : > { %v8849_v57 = vadd.f32 %v1931_v45, %v1479_v54  ;;  %v1490_v42 = vadd.f32 %v6402_v48, %v8430_v51  ;;  %v4453_v45 = vshrl.u32 %v4152_v53, 16  ;;  %v9586_v51 = vld [vmem:[#allocation4_spill] sm:$0xff]  ;;  %v4445_v18 = vor.u32 %v4444_v38, %v8847_v34 }
 0x135   : > { %v1481_v52 = vpop.f32.mrf.mxu1  ;;  %v6454_v62 = vpop.f32.mrf.mxu0  ;;  %v4456_v48 = vshll.u32 %v4152_v53, 16  ;;  %v4466_v50 = vshrl.u32 %v8870_v40, 16  ;;  %v8900_v33 = vrot.slane %v4462_v32, 5 }
 0x136   : > { %v8863_v29 = vadd.f32 %v6450_v12, %v1490_v42  ;;  %v1482_v10 = vadd.f32 %v1481_v52, %v9586_v51  ;;  %v5013_v42 = vrot.slane %v8794_v58, 5  ;;  %v4455_v51 = vrot.slane %v4453_v45, 4  ;;  %v4882_v58 = vld [vmem:[#allocation2 + $0xa8] sm:$0xe] }
 0x137   : > { %v6405_v54 = vpop.f32.mrf.mxu1  ;;  %6692 = vmatmul.mubr.bf16.gmra.mxu1 %v8623_v0  ;;  %v1950_v2 = vpop.f32.mrf.mxu0  ;;  %v8886_v0 = vrot.slane %v4448_v16, 5  ;;  %v4458_v59 = vrot.slane %v4456_v48, 5  ;;  %v6067_v16 = vrot.slane %v4881_v20, 9  ;;  %v9588_v45 = vcombine.low %v8682_v56, %v8689_v36 }
 0x138   : > { %v8882_v63 = vadd.f32 %v1934_v4, %v1482_v10  ;;  %v1503_v8 = vadd.f32 %v6405_v54, %v8492_v47  ;;  %6695 = vmatprep.mubr.bf16.mxu1 %v8635_v41  ;;  %v9587_v47 = vcombine.low %v8660_v55, %v8664_v24  ;;  %v4436_v41 = vrot.slane %v4435_v28, 4  ;;  %v4154_v10 = vld [vmem:[#allocation2 + $0xb0] sm:$0x1] }
 0x139   : > { %v1494_v52 = vpop.f32.mrf.mxu1  ;;  %v6457_v53 = vpop.f32.mrf.mxu0  ;;  %v4446_v48 = vrot.slane %v4445_v18, 4  ;;  %v5015_v28 = vrot.slane %v5013_v42, 4  ;;  %v5016_v20 = vrot.slane %v8834_v31, 5  ;;  %v4459_v17 = vor.u32 %v4458_v59, %v4455_v51 }
 0x13a   : > { %v8891_v38 = vadd.f32 %v6453_v60, %v1503_v8  ;;  %v1495_v4 = vadd.f32 %v1494_v52, %v8535_v7  ;;  %6744 = vmatmul.mubr.bf16.gmra.mxu0 %v9587_v47  ;;  %v4468_v60 = vrot.slane %v4466_v50, 4  ;;  %v5020_v7 = vrot.slane %v8870_v40, 5  ;;  %v9589_v52 = vld [vmem:[#allocation10_spill] sm:$0xff] }
 0x13b   : > { %v6406_v54 = vpop.f32.mrf.mxu1  ;;  %6747 = vmatprep.mubr.bf16.mxu0 %v9588_v45  ;;  %v1963_v24 = vpop.f32.mrf.mxu0  ;;  %v4155_v47 = vld [vmem:[#allocation2 + $0xb4] sm:$0xf]  ;;  %v4472_v36 = vshll.u32 %v4154_v10, 16  ;;  %v6068_v18 = vrot.slane %v4882_v58, 9  ;;  %v6098_v31 = vcombine.low %v8861_v11, %v8879_v14  ;;  %v8916_v59 = vsel %vm7375_vm5, %v6067_v16, %v5013_v42 }
 0x13c   : > { %v8903_v8 = vadd.f32 %v1947_v1, %v1495_v4  ;;  %v1506_v55 = vadd.f32 %v6406_v54, %v9589_v52  ;;  %v4469_v56 = vor.u32 %v4468_v60, %v8900_v33  ;;  %v5022_v1 = vrot.slane %v5020_v7, 4 }
 0x13d   : > { %v1497_v12 = vpop.f32.mrf.mxu1  ;;  %v6458_v40 = vpop.f32.mrf.mxu0  ;;  %v5023_v4 = vrot.slane %v4154_v10, 5  ;;  %v4477_v51 = vshrl.u32 %v4155_v47, 16  ;;  %v4480_v54 = vshll.u32 %v4155_v47, 16  ;;  %v8928_v10 = vld [vmem:[#allocation2 + $0xb8] sm:$0xf]  ;;  %v4460_v16 = vrot.slane %v4459_v17, 4 }
 0x13e   : > { %v8908_v32 = vadd.f32 %v6454_v62, %v1506_v55  ;;  %v1498_v50 = vadd.f32 %v1497_v12, %v8585_v44  ;;  %v4451_v12 = vsel %vm7080_vm2, %v4446_v48, %v8886_v0  ;;  %v4474_v60 = vrot.slane %v4472_v36, 5 }
 0x13f   : > { %v6409_v45 = vpop.f32.mrf.mxu1  ;;  %6696 = vmatmul.mubr.bf16.gmra.mxu1 %v8698_v49  ;;  %v1966_v44 = vpop.f32.mrf.mxu0  ;;  %v4441_v49 = vsel %vm7080_vm2, %v4436_v41, %v8847_v34  ;;  %v9591_v34 = vcombine.low %v8731_v22, %v8743_v25  ;;  %v8942_v0 = vsel %vm7375_vm5, %v6068_v18, %v5020_v7  ;;  %v8946_v41 = vsel %vm7375_vm5, %v5022_v1, %v5023_v4  ;;  %v8972_v1 = vld [vmem:[#allocation2 + $0xc4] sm:$0xf] }
 0x140   : > { %v8918_v58 = vadd.f32 %v1950_v2, %v1498_v50  ;;  %v1519_v62 = vadd.f32 %v6409_v45, %v8613_v30  ;;  %6699 = vmatprep.mubr.bf16.mxu1 %v8727_v46  ;;  %v8932_v2 = vsel %vm7375_vm5, %v5015_v28, %v5016_v20  ;;  %v4470_v30 = vrot.slane %v4469_v56, 4  ;;  %v9590_v46 = vld [vmem:[#allocation13_spill] sm:$0xff]  ;;  %v4158_v56 = vld [vmem:[#allocation2 + $0xc0] sm:$0xf] }
 0x141   : > { %v1510_v42 = vpop.f32.mrf.mxu1  ;;  %v6461_v47 = vpop.f32.mrf.mxu0  ;;  %v9593_v48 = vsel %vm7080_vm2, %v8845_v5, %v8831_v6  ;;  %v9594_v22 = vsel %vm7080_vm2, %v8829_v37, %v8792_v61  ;;  %v4479_v7 = vrot.slane %v4477_v51, 4  ;;  %v4482_v28 = vrot.slane %v4480_v54, 5  ;;  %v8969_v6 = vld [vmem:[#allocation2 + $0xbc] sm:$0x1]  ;;  %v4883_v51 = vld [vmem:[#allocation2 + $0xb4] sm:$0xe] }
 0x142   : > { %v8934_v52 = vadd.f32 %v6457_v53, %v1519_v62  ;;  %v1511_v55 = vadd.f32 %v1510_v42, %v9590_v46  ;;  %6748 = vmatmul.mubr.bf16.gmra.mxu0 %v9591_v34  ;;  %v9592_v53 = vcombine.low %v8802_v23, %v8807_v19  ;;  %v8961_v25 = vcombine.low %v9594_v22, %v9593_v48  ;;  %v9595_v23 = vld [vmem:[#allocation15_spill] sm:$0xff] }
 0x143   : > { %v6410_v17 = vpop.f32.mrf.mxu1  ;;  %v4486_v20 = vshll.u32 %v8928_v10, 16  ;;  %v1979_v18 = vpop.f32.mrf.mxu0  ;;  %v8967_v50 = vcombine.low %v4441_v49, %v4451_v12  ;;  %v4490_v5 = vshrl.u32 %v8928_v10, 16  ;;  %v6099_v37 = vcombine.low %v8916_v59, %v8932_v2  ;;  %v9603_v59 = vld [vmem:[#allocation6_spill] sm:$0xff] }
 0x144   : > { %6751 = vmatprep.mubr.bf16.mxu0 %v9592_v53  ;;  %v8964_v36 = vadd.f32 %v1963_v24, %v1511_v55  ;;  %v1522_v19 = vadd.f32 %v6410_v17, %v9595_v23  ;;  %v4465_v24 = vsel %vm7080_vm2, %v4460_v16, %v8900_v33  ;;  %v4475_v4 = vsel %vm7080_vm2, %v4470_v30, %v4474_v60  ;;  %v9596_v60 = vld [vmem:[#allocation18_spill] sm:$0xff] }
 0x145   : > { %v1513_v61 = vpop.f32.mrf.mxu1  ;;  %v6100_v45 = vcombine.low %v8942_v0, %v8946_v41  ;;  %v6462_v49 = vpop.f32.mrf.mxu0  ;;  %v4501_v12 = vshrl.u32 %v4158_v56, 16  ;;  %v4504_v42 = vshll.u32 %v4158_v56, 16  ;;  %v4483_v55 = vor.u32 %v4482_v28, %v4479_v7  ;;  %v9597_v56 = vld [vmem:[#allocation20_spill] sm:$0xff] }
 0x146   : > { %v8983_v54 = vadd.f32 %v6458_v40, %v1522_v19  ;;  %v1514_v62 = vadd.f32 %v1513_v61, %v8685_v26  ;;  %v8987_v34 = vrot.slane %v4486_v20, 5  ;;  %v4496_v33 = vshll.u32 %v8969_v6, 16 }
 0x147   : > { %v6413_v46 = vpop.f32.mrf.mxu1  ;;  %6700 = vmatmul.mubr.bf16.gmra.mxu1 %v8789_v15  ;;  %v4510_v16 = vshll.u32 %v8972_v1, 16  ;;  %v1982_v17 = vpop.f32.mrf.mxu0  ;;  %v4492_v26 = vrot.slane %v4490_v5, 4  ;;  %v6069_v53 = vrot.slane %v4883_v51, 9  ;;  %v5027_v22 = vrot.slane %v8928_v10, 5 }
 0x148   : > { %v8991_v30 = vadd.f32 %v1966_v44, %v1514_v62  ;;  %v1535_v40 = vadd.f32 %v6413_v46, %v9596_v60  ;;  %6703 = vmatprep.mubr.bf16.mxu1 %v8798_v35  ;;  %v4503_v15 = vrot.slane %v4501_v12, 4  ;;  %v4506_v7 = vrot.slane %v4504_v42, 5  ;;  %v4160_v35 = vld [vmem:[#allocation2 + $0xc8] sm:$0x1]  ;;  %v4884_v12 = vld [vmem:[#allocation2 + $0xc0] sm:$0xe] }
 0x149   : > { %v1526_v48 = vpop.f32.mrf.mxu1  ;;  %v4514_v28 = vshrl.u32 %v8972_v1, 16  ;;  %v6465_v44 = vpop.f32.mrf.mxu0  ;;  %v9598_v19 = vcombine.low %v8811_v27, %v8827_v39  ;;  %v9003_v61 = vcombine.low %v4465_v24, %v4475_v4  ;;  %v9005_v5 = vrot.slane %v4510_v16, 5  ;;  %v9599_v39 = vld [vmem:[#allocation21_spill] sm:$0xff] }
 0x14a   : > { %v8997_v20 = vadd.f32 %v6461_v47, %v1535_v40  ;;  %v1527_v23 = vadd.f32 %v1526_v48, %v9597_v56  ;;  %v9010_v10 = vrot.slane %v4496_v33, 5  ;;  %v5030_v47 = vrot.slane %v8969_v6, 5  ;;  %v4161_v60 = vld [vmem:[#allocation2 + $0xcc] sm:$0xf]  ;;  %v9024_v40 = vld [vmem:[#allocation2 + $0xd0] sm:$0xf] }
 0x14b   : > { %6752 = vmatmul.mubr.bf16.gmra.mxu0 %v9598_v19  ;;  %v6414_v51 = vpop.f32.mrf.mxu1  ;;  %v4516_v62 = vrot.slane %v4514_v28, 4  ;;  %v5034_v42 = vrot.slane %v8972_v1, 5  ;;  %v1995_v4 = vpop.f32.mrf.mxu0  ;;  %v9017_v46 = vrot.slane %v4483_v55, 4  ;;  %v4493_v16 = vor.u32 %v4492_v26, %v8987_v34  ;;  %v9600_v1 = vld [vmem:[#allocation23_spill] sm:$0xff] }
 0x14c   : > { %6755 = vmatprep.mubr.bf16.mxu0 %v6098_v31  ;;  %v9014_v27 = vadd.f32 %v1979_v18, %v1527_v23  ;;  %v1538_v24 = vadd.f32 %v6414_v51, %v9599_v39  ;;  %v9022_v14 = vsel %vm7375_vm5, %v6069_v53, %v5027_v22  ;;  %v5029_v31 = vrot.slane %v5027_v22, 4 }
 0x14d   : > { %v1529_v11 = vpop.f32.mrf.mxu1  ;;  %v4507_v6 = vor.u32 %v4506_v7, %v4503_v15  ;;  %v4520_v33 = vshll.u32 %v4160_v35, 16  ;;  %v6466_v28 = vpop.f32.mrf.mxu0  ;;  %v4517_v55 = vor.u32 %v4516_v62, %v9005_v5  ;;  %v6070_v56 = vrot.slane %v4884_v12, 9  ;;  %v9601_v15 = vld [vmem:[#allocation3_spill] sm:$0xff] }
 0x14e   : > { %v9026_v18 = vadd.f32 %v6462_v49, %v1538_v24  ;;  %v1530_v48 = vadd.f32 %v1529_v11, %v9600_v1  ;;  %v5036_v23 = vrot.slane %v5034_v42, 4  ;;  %v5037_v19 = vrot.slane %v4160_v35, 5 }
 0x14f   : > { %v6417_v26 = vpop.f32.mrf.mxu1  ;;  %6704 = vmatmul.mubr.bf16.gmra.mxu1 %v8855_v3  ;;  %v4525_v53 = vshrl.u32 %v4161_v60, 16  ;;  %v4528_v51 = vshll.u32 %v4161_v60, 16  ;;  %v1998_v39 = vpop.f32.mrf.mxu0  ;;  %v4494_v49 = vrot.slane %v4493_v16, 4  ;;  %v4534_v24 = vshll.u32 %v9024_v40, 16 }
 0x150   : > { %v9031_v22 = vadd.f32 %v1982_v17, %v1530_v48  ;;  %v1551_v7 = vadd.f32 %v6417_v26, %v9601_v15  ;;  %6707 = vmatprep.mubr.bf16.mxu1 %v8961_v25  ;;  %v5031_v62 = vsel %vm7375_vm5, %v5029_v31, %v5030_v47  ;;  %v4508_v12 = vrot.slane %v4507_v6, 4  ;;  %v9602_v17 = vld [vmem:[#allocation5_spill] sm:$0xff] }
 0x151   : > { %v1542_v11 = vpop.f32.mrf.mxu1  ;;  %v4522_v3 = vrot.slane %v4520_v33, 5  ;;  %v4538_v35 = vshrl.u32 %v9024_v40, 16  ;;  %v6469_v48 = vpop.f32.mrf.mxu0  ;;  %v4518_v25 = vrot.slane %v4517_v55, 4  ;;  %v5035_v16 = vsel %vm7375_vm5, %v6070_v56, %v5034_v42  ;;  %v4163_v55 = vld [vmem:[#allocation2 + $0xd4] sm:$0x1] }
 0x152   : > { %v9039_v1 = vadd.f32 %v6465_v44, %v1551_v7  ;;  %v1543_v60 = vadd.f32 %v1542_v11, %v9602_v17  ;;  %v5038_v44 = vsel %vm7375_vm5, %v5036_v23, %v5037_v19  ;;  %v4527_v47 = vrot.slane %v4525_v53, 4  ;;  %v4885_v56 = vld [vmem:[#allocation2 + $0xcc] sm:$0xe]  ;;  %v9604_v23 = vld [vmem:[#allocation8_spill] sm:$0xff] }
 0x153   : > { %6756 = vmatmul.mubr.bf16.gmra.mxu0 %v6099_v37  ;;  %v6418_v26 = vpop.f32.mrf.mxu1  ;;  %v4530_v31 = vrot.slane %v4528_v51, 5  ;;  %v5041_v6 = vrot.slane %v9024_v40, 5  ;;  %v2011_v37 = vpop.f32.mrf.mxu0  ;;  %v4536_v15 = vrot.slane %v4534_v24, 5  ;;  %v4540_v42 = vrot.slane %v4538_v35, 4 }
 0x154   : > { %6759 = vmatprep.mubr.bf16.mxu0 %v6100_v45  ;;  %v9053_v33 = vadd.f32 %v1995_v4, %v1543_v60  ;;  %v1554_v2 = vadd.f32 %v6418_v26, %v9603_v59  ;;  %v4489_v0 = vsel %vm7080_vm2, %v9017_v46, %v8987_v34  ;;  %v4499_v41 = vsel %vm7080_vm2, %v4494_v49, %v9010_v10 }
 0x155   : > { %v1545_v7 = vpop.f32.mrf.mxu1  ;;  %v6101_v45 = vcombine.low %v9022_v14, %v5031_v62  ;;  %v4513_v4 = vsel %vm7080_vm2, %v4508_v12, %v9005_v5  ;;  %v6470_v53 = vpop.f32.mrf.mxu0  ;;  %v4523_v51 = vsel %vm7080_vm2, %v4518_v25, %v4522_v3  ;;  %v6102_v24 = vcombine.low %v5035_v16, %v5038_v44  ;;  %v9605_v62 = vld [vmem:[#allocation7_spill] sm:$0xff]  ;;  %v9606_v3 = vld [vmem:[#allocation9_spill] sm:$0xff] }
 0x156   : > { %v9067_v40 = vadd.f32 %v6466_v28, %v1554_v2  ;;  %v1546_v19 = vadd.f32 %v1545_v7, %v9604_v23  ;;  %v4544_v46 = vshll.u32 %v4163_v55, 16  ;;  %v6071_v10 = vrot.slane %v4885_v56, 9 }
 0x157   : > { %v6421_v34 = vpop.f32.mrf.mxu1  ;;  %6708 = vmatmul.mubr.bf16.gmra.mxu1 %v8967_v50  ;;  %v5043_v49 = vrot.slane %v5041_v6, 4  ;;  %v5044_v14 = vrot.slane %v4163_v55, 5  ;;  %v2014_v28 = vpop.f32.mrf.mxu0  ;;  %v4531_v12 = vor.u32 %v4530_v31, %v4527_v47  ;;  %v4541_v35 = vor.u32 %v4540_v42, %v4536_v15  ;;  %v9607_v31 = vld [vmem:[#allocation11_spill] sm:$0xff] }
 0x158   : > { %v9073_v11 = vadd.f32 %v1998_v39, %v1546_v19  ;;  %v1567_v5 = vadd.f32 %v6421_v34, %v9605_v62  ;;  %6711 = vmatprep.mubr.bf16.mxu1 %v9003_v61  ;;  %v6045_v50 = vcombine.low %v4489_v0, %v4499_v41  ;;  %v6046_v44 = vcombine.low %v4513_v4, %v4523_v51  ;;  %v9608_v0 = vld [vmem:[#allocation12_spill] sm:$0xff] }
 0x159   : > { %v1558_v17 = vpop.f32.mrf.mxu1  ;;  %v6473_v16 = vpop.f32.mrf.mxu0  ;;  %v4546_v39 = vrot.slane %v4544_v46, 5  ;;  %v5042_v59 = vsel %vm7375_vm5, %v6071_v10, %v5041_v6  ;;  %v5045_v61 = vsel %vm7375_vm5, %v5043_v49, %v5044_v14  ;;  %v4532_v55 = vrot.slane %v4531_v12, 4  ;;  %v9610_v46 = vld [vmem:[#allocation16_spill] sm:$0xff] }
 0x15a   : > { %v9077_v60 = vadd.f32 %v6469_v48, %v1567_v5  ;;  %v1559_v25 = vadd.f32 %v1558_v17, %v9606_v3  ;;  %v4542_v42 = vrot.slane %v4541_v35, 4  ;;  %v6103_v4 = vcombine.low %v5042_v59, %v5045_v61 }
 0x15b   : > { %6760 = vmatmul.mubr.bf16.gmra.mxu0 %v6101_v45  ;;  %v6422_v26 = vpop.f32.mrf.mxu1  ;;  %v2027_v2 = vpop.f32.mrf.mxu0  ;;  %v4537_v51 = vsel %vm7080_vm2, %v4532_v55, %v4536_v15  ;;  %v9612_v15 = vld [vmem:[#allocation19_spill] sm:$0xff] }
 0x15c   : > { %6763 = vmatprep.mubr.bf16.mxu0 %v6102_v24  ;;  %v9084_v47 = vadd.f32 %v2011_v37, %v1559_v25  ;;  %v1570_v48 = vadd.f32 %v6422_v26, %v9607_v31  ;;  %v4547_v24 = vsel %vm7080_vm2, %v4542_v42, %v4546_v39  ;;  %v9613_v26 = vld [vmem:[#allocation22_spill] sm:$0xff]  ;;  %v9614_v31 = vld [vmem:[#allocation24_spill] sm:$0xff] }
 0x15d   : > { %v1561_v56 = vpop.f32.mrf.mxu1  ;;  %v6474_v45 = vpop.f32.mrf.mxu0  ;;  %v6047_v62 = vcombine.low %v4537_v51, %v4547_v24 }
 0x15e   : > { %v9087_v7 = vadd.f32 %v6470_v53, %v1570_v48  ;;  %v1562_v41 = vadd.f32 %v1561_v56, %v9608_v0  ;;  %v9615_v56 = vld [vmem:[#allocation25_spill] sm:$0xff] }
 0x15f   : > { %v6425_v23 = vpop.f32.mrf.mxu1  ;;  %6712 = vmatmul.mubr.bf16.gmra.mxu1 %v6045_v50  ;;  %v2030_v37 = vpop.f32.mrf.mxu0 }
 0x160   : > { %v9090_v6 = vadd.f32 %v2014_v28, %v1562_v41  ;;  %v1583_v19 = vadd.f32 %v6425_v23, %v9609_v13  ;;  %6715 = vmatprep.mubr.bf16.mxu1 %v6046_v44  ;;  %v9611_v28 = vld [vmem:[#allocation17_spill] sm:$0xff] }
 0x161   : > { %v1574_v53 = vpop.f32.mrf.mxu1  ;;  %v6477_v49 = vpop.f32.mrf.mxu0 }
 0x162   : > { %v9097_v34 = vadd.f32 %v6473_v16, %v1583_v19  ;;  %v1575_v10 = vadd.f32 %v1574_v53, %v9610_v46 }
 0x163   : > { %6764 = vmatmul.mubr.bf16.gmra.mxu0 %v6103_v4  ;;  %v6426_v14 = vpop.f32.mrf.mxu1  ;;  %v2043_v35 = vpop.f32.mrf.mxu0 }
 0x164   : > { %v9100_v5 = vadd.f32 %v2027_v2, %v1575_v10  ;;  %v1586_v12 = vadd.f32 %v6426_v14, %v9611_v28 }
 0x165   : > { %v1577_v17 = vpop.f32.mrf.mxu1  ;;  %v6478_v25 = vpop.f32.mrf.mxu0 }
 0x166   : > { %v9103_v3 = vadd.f32 %v6474_v45, %v1586_v12  ;;  %v1578_v43 = vadd.f32 %v1577_v17, %v9612_v15 }
 0x167   : > { %v6429_v50 = vpop.f32.mrf.mxu1  ;;  %6716 = vmatmul.mubr.bf16.gmra.mxu1 %v6047_v62  ;;  %v2046_v39 = vpop.f32.mrf.mxu0 }
 0x168   : > { %v9106_v16 = vadd.f32 %v2030_v37, %v1578_v43  ;;  %v1599_v44 = vadd.f32 %v6429_v50, %v9613_v26 }
 0x169   : > { %v1590_v59 = vpop.f32.mrf.mxu1  ;;  %v6545_v2 = vpop.f32.mrf.mxu0 }
 0x16a   : > { %v9109_v61 = vadd.f32 %v6477_v49, %v1599_v44  ;;  %v1591_v48 = vadd.f32 %v1590_v59, %v9614_v31 }
 0x16b   : > { %v6430_v55 = vpop.f32.mrf.mxu1  ;;  %v3072_v41 = vpop.f32.mrf.mxu0 }
 0x16c   : > { %v9112_v42 = vadd.f32 %v2043_v35, %v1591_v48  ;;  %v1602_v0 = vadd.f32 %v6430_v55, %v9615_v56 }
 0x16d   : > { %v1593_v45 = vpop.f32.mrf.mxu1  ;;  %v6546_v13 = vpop.f32.mrf.mxu0 }
 0x16e   : > { %v9115_v4 = vadd.f32 %v6478_v25, %v1602_v0  ;;  %v1594_v23 = vadd.f32 %v1593_v45, %v8796_v21 }
 0x16f   : > { %v6497_v19 = vpop.f32.mrf.mxu1  ;;  %v3075_v24 = vpop.f32.mrf.mxu0 }
 0x170   : > { %v9118_v37 = vadd.f32 %v2046_v39, %v1594_v23  ;;  %v2447_v51 = vadd.f32 %v6497_v19, %v8836_v9 }
 0x171   : > { %v2318_v53 = vpop.f32.mrf.mxu1  ;;  %v6549_v49 = vpop.f32.mrf.mxu0 }
 0x172   : > { %v9121_v46 = vadd.f32 %v6545_v2, %v2447_v51  ;;  %v2445_v10 = vadd.f32 %v2318_v53, %v8849_v57 }
 0x173   : > { %v6498_v14 = vpop.f32.mrf.mxu1  ;;  %v3088_v12 = vpop.f32.mrf.mxu0 }
 0x174   : > { %v9124_v62 = vadd.f32 %v3072_v41, %v2445_v10  ;;  %v2448_v28 = vadd.f32 %v6498_v14, %v8863_v29 }
 0x175   : > { %v2321_v21 = vpop.f32.mrf.mxu1  ;;  %v6550_v15 = vpop.f32.mrf.mxu0 }
 0x176   : > { %v9127_v35 = vadd.f32 %v6546_v13, %v2448_v28  ;;  %v2446_v17 = vadd.f32 %v2321_v21, %v8882_v63 }
 0x177   : > { %v6501_v9 = vpop.f32.mrf.mxu1  ;;  %v3091_v50 = vpop.f32.mrf.mxu0 }
 0x178   : > { %v9130_v43 = vadd.f32 %v3075_v24, %v2446_v17  ;;  %v2451_v25 = vadd.f32 %v6501_v9, %v8891_v38 }
 0x179   : > { %v2334_v57 = vpop.f32.mrf.mxu1  ;;  %v6553_v39 = vpop.f32.mrf.mxu0 }
 0x17a   : > { %v9133_v26 = vadd.f32 %v6549_v49, %v2451_v25  ;;  %v2449_v44 = vadd.f32 %v2334_v57, %v8903_v8 }
 0x17b   : > { %v6502_v29 = vpop.f32.mrf.mxu1  ;;  %v3104_v48 = vpop.f32.mrf.mxu0 }
 0x17c   : > { %v9136_v59 = vadd.f32 %v3088_v12, %v2449_v44  ;;  %v2452_v31 = vadd.f32 %v6502_v29, %v8908_v32 }
 0x17d   : > { %v2337_v63 = vpop.f32.mrf.mxu1  ;;  %v6554_v56 = vpop.f32.mrf.mxu0 }
 0x17e   : > { %v9139_v2 = vadd.f32 %v6550_v15, %v2452_v31  ;;  %v2450_v55 = vadd.f32 %v2337_v63, %v8918_v58 }
 0x17f   : > { %v6505_v38 = vpop.f32.mrf.mxu1  ;;  %v3107_v45 = vpop.f32.mrf.mxu0 }
 0x180   : > { %v9142_v0 = vadd.f32 %v3091_v50, %v2450_v55  ;;  %v2455_v41 = vadd.f32 %v6505_v38, %v8934_v52 }
 0x181   : > { %v2350_v8 = vpop.f32.mrf.mxu1  ;;  %v6557_v19 = vpop.f32.mrf.mxu0 }
 0x182   : > { %v9145_v23 = vadd.f32 %v6553_v39, %v2455_v41  ;;  %v2453_v13 = vadd.f32 %v2350_v8, %v8964_v36 }
 0x183   : > { %v6506_v32 = vpop.f32.mrf.mxu1  ;;  %v3120_v53 = vpop.f32.mrf.mxu0 }
 0x184   : > { %v9148_v51 = vadd.f32 %v3104_v48, %v2453_v13  ;;  %v2456_v24 = vadd.f32 %v6506_v32, %v8983_v54 }
 0x185   : > { %v2353_v58 = vpop.f32.mrf.mxu1  ;;  %v6558_v14 = vpop.f32.mrf.mxu0 }
 0x186   : > { %v9151_v10 = vadd.f32 %v6554_v56, %v2456_v24  ;;  %v2454_v49 = vadd.f32 %v2353_v58, %v8991_v30 }
 0x187   : > { %v6509_v52 = vpop.f32.mrf.mxu1  ;;  %v3123_v21 = vpop.f32.mrf.mxu0 }
 0x188   : > { %v9154_v28 = vadd.f32 %v3107_v45, %v2454_v49  ;;  %v2459_v12 = vadd.f32 %v6509_v52, %v8997_v20 }
 0x189   : > { %v2366_v36 = vpop.f32.mrf.mxu1  ;;  %v6561_v9 = vpop.f32.mrf.mxu0 }
 0x18a   : > { %v9157_v17 = vadd.f32 %v6557_v19, %v2459_v12  ;;  %v2457_v15 = vadd.f32 %v2366_v36, %v9014_v27 }
 0x18b   : > { %v6510_v54 = vpop.f32.mrf.mxu1  ;;  %v3136_v57 = vpop.f32.mrf.mxu0 }
 0x18c   : > { %v9160_v25 = vadd.f32 %v3120_v53, %v2457_v15  ;;  %v2460_v50 = vadd.f32 %v6510_v54, %v9026_v18 }
 0x18d   : > { %v2369_v30 = vpop.f32.mrf.mxu1  ;;  %v6562_v29 = vpop.f32.mrf.mxu0 }
 0x18e   : > { %v9163_v44 = vadd.f32 %v6558_v14, %v2460_v50  ;;  %v2458_v39 = vadd.f32 %v2369_v30, %v9031_v22 }
 0x18f   : > { %v6513_v20 = vpop.f32.mrf.mxu1  ;;  %v3139_v63 = vpop.f32.mrf.mxu0 }
 0x190   : > { %v9166_v31 = vadd.f32 %v3123_v21, %v2458_v39  ;;  %v2463_v48 = vadd.f32 %v6513_v20, %v9039_v1 }
 0x191   : > { %v2382_v27 = vpop.f32.mrf.mxu1  ;;  %v6565_v38 = vpop.f32.mrf.mxu0 }
 0x192   : > { %v9169_v55 = vadd.f32 %v6561_v9, %v2463_v48  ;;  %v2461_v56 = vadd.f32 %v2382_v27, %v9053_v33 }
 0x193   : > { %v6514_v18 = vpop.f32.mrf.mxu1  ;;  %v3152_v8 = vpop.f32.mrf.mxu0 }
 0x194   : > { %v9172_v41 = vadd.f32 %v3136_v57, %v2461_v56  ;;  %v2464_v45 = vadd.f32 %v6514_v18, %v9067_v40 }
 0x195   : > { %v2385_v22 = vpop.f32.mrf.mxu1  ;;  %v6566_v32 = vpop.f32.mrf.mxu0 }
 0x196   : > { %v9175_v13 = vadd.f32 %v6562_v29, %v2464_v45  ;;  %v2462_v19 = vadd.f32 %v2385_v22, %v9073_v11 }
 0x197   : > { %v6517_v1 = vpop.f32.mrf.mxu1  ;;  %v3155_v58 = vpop.f32.mrf.mxu0 }
 0x198   : > { %9616 = vst [vmem:[#allocation4_spill] sm:$0xff] %v9175_v13  ;;  %v9178_v24 = vadd.f32 %v3139_v63, %v2462_v19  ;;  %v2467_v53 = vadd.f32 %v6517_v1, %v9077_v60 }
 0x199   : > { %v2398_v33 = vpop.f32.mrf.mxu1  ;;  %v6569_v52 = vpop.f32.mrf.mxu0 }
 0x19a   : > { %9617 = vst [vmem:[#allocation10_spill] sm:$0xff] %v9178_v24  ;;  %v9181_v49 = vadd.f32 %v6565_v38, %v2467_v53  ;;  %v2465_v14 = vadd.f32 %v2398_v33, %v9084_v47 }
 0x19b   : > { %v6518_v40 = vpop.f32.mrf.mxu1  ;;  %v3168_v36 = vpop.f32.mrf.mxu0 }
 0x19c   : > { %9618 = vst [vmem:[#allocation13_spill] sm:$0xff] %v9181_v49  ;;  %v9184_v12 = vadd.f32 %v3152_v8, %v2465_v14  ;;  %v2468_v21 = vadd.f32 %v6518_v40, %v9087_v7 }
 0x19d   : > { %v2401_v11 = vpop.f32.mrf.mxu1  ;;  %v6570_v54 = vpop.f32.mrf.mxu0 }
 0x19e   : > { %9619 = vst [vmem:[#allocation15_spill] sm:$0xff] %v9184_v12  ;;  %v9187_v15 = vadd.f32 %v6566_v32, %v2468_v21  ;;  %v2466_v9 = vadd.f32 %v2401_v11, %v9090_v6 }
 0x19f   : > { %v6521_v60 = vpop.f32.mrf.mxu1  ;;  %v3171_v30 = vpop.f32.mrf.mxu0 }
 0x1a0   : > { %9620 = vst [vmem:[#allocation18_spill] sm:$0xff] %v9187_v15  ;;  %v9190_v50 = vadd.f32 %v3155_v58, %v2466_v9  ;;  %v2471_v57 = vadd.f32 %v6521_v60, %v9097_v34 }
 0x1a1   : > { %v2414_v47 = vpop.f32.mrf.mxu1  ;;  %v6573_v20 = vpop.f32.mrf.mxu0 }
 0x1a2   : > { %9621 = vst [vmem:[#allocation20_spill] sm:$0xff] %v9190_v50  ;;  %v9193_v39 = vadd.f32 %v6569_v52, %v2471_v57  ;;  %v2469_v29 = vadd.f32 %v2414_v47, %v9100_v5 }
 0x1a3   : > { %v6522_v7 = vpop.f32.mrf.mxu1  ;;  %v3184_v27 = vpop.f32.mrf.mxu0 }
 0x1a4   : > { %9622 = vst [vmem:[#allocation21_spill] sm:$0xff] %v9193_v39  ;;  %v9196_v48 = vadd.f32 %v3168_v36, %v2469_v29  ;;  %v2472_v63 = vadd.f32 %v6522_v7, %v9103_v3 }
 0x1a5   : > { %v2417_v6 = vpop.f32.mrf.mxu1  ;;  %v6574_v18 = vpop.f32.mrf.mxu0 }
 0x1a6   : > { %9623 = vst [vmem:[#allocation23_spill] sm:$0xff] %v9196_v48  ;;  %v9199_v56 = vadd.f32 %v6570_v54, %v2472_v63  ;;  %v2470_v38 = vadd.f32 %v2417_v6, %v9106_v16 }
 0x1a7   : > { %v6525_v34 = vpop.f32.mrf.mxu1  ;;  %v3187_v22 = vpop.f32.mrf.mxu0 }
 0x1a8   : > { %9624 = vst [vmem:[#allocation3_spill] sm:$0xff] %v9199_v56  ;;  %v9202_v45 = vadd.f32 %v3171_v30, %v2470_v38  ;;  %v2475_v8 = vadd.f32 %v6525_v34, %v9109_v61 }
 0x1a9   : > { %v2430_v5 = vpop.f32.mrf.mxu1  ;;  %v9208_v1 = vpop.f32.mrf.mxu0 }
 0x1aa   : > { %9625 = vst [vmem:[#allocation5_spill] sm:$0xff] %v9202_v45  ;;  %v9205_v19 = vadd.f32 %v6573_v20, %v2475_v8  ;;  %v2473_v32 = vadd.f32 %v2430_v5, %v9112_v42 }
 0x1ab   : > { %v6526_v3 = vpop.f32.mrf.mxu1  ;;  %v9213_v16 = vpop.f32.mrf.mxu0 }
 0x1ac   : > { %9626 = vst [vmem:[#allocation6_spill] sm:$0xff] %v9205_v19  ;;  %v9210_v53 = vadd.f32 %v3184_v27, %v2473_v32  ;;  %v2476_v58 = vadd.f32 %v6526_v3, %v9115_v4 }
 0x1ad   : > { %v2433_v33 = vpop.f32.mrf.mxu1  ;;  %v9218_v52 = vpop.f32.mrf.mxu0 }
 0x1ae   : > { %9627 = vst [vmem:[#allocation8_spill] sm:$0xff] %v9210_v53  ;;  %v9215_v14 = vadd.f32 %v6574_v18, %v2476_v58  ;;  %v2474_v61 = vadd.f32 %v2433_v33, %v9118_v37 }
 0x1af   : > { %v6593_v40 = vpop.f32.mrf.mxu1  ;;  %v9222_v42 = vpop.f32.mrf.mxu0 }
 0x1b0   : > { %9628 = vst [vmem:[#allocation7_spill] sm:$0xff] %v9215_v14  ;;  %v9220_v21 = vadd.f32 %v3187_v22, %v2474_v61 }
 0x1b1   : > { %v3570_v36 = vpop.f32.mrf.mxu1  ;;  %v9224_v11 = vpop.f32.mrf.mxu0 }
 0x1b2   : > { %9629 = vst [vmem:[#allocation9_spill] sm:$0xff] %v9220_v21 }
 0x1b3   : > { %v6594_v9 = vpop.f32.mrf.mxu1  ;;  %v9226_v54 = vpop.f32.mrf.mxu0 }
 0x1b5   : > { %v9228_v4 = vpop.f32.mrf.mxu1  ;;  %v9230_v60 = vpop.f32.mrf.mxu0 }
 0x1b7   : > { %v9232_v57 = vpop.f32.mrf.mxu1  ;;  %v9234_v37 = vpop.f32.mrf.mxu0 }
 0x1b9   : > { %v9236_v30 = vpop.f32.mrf.mxu1  ;;  %v9238_v47 = vpop.f32.mrf.mxu0 }
 0x1bb   : > { %v9240_v29 = vpop.f32.mrf.mxu1  ;;  %v9242_v20 = vpop.f32.mrf.mxu0 }
 0x1bd   : > { %v9244_v7 = vpop.f32.mrf.mxu1  ;;  %v9246_v63 = vpop.f32.mrf.mxu0 }
 0x1bf   : > { %v9248_v27 = vpop.f32.mrf.mxu1  ;;  %v9250_v6 = vpop.f32.mrf.mxu0 }
 0x1c1   : > { %v9252_v38 = vpop.f32.mrf.mxu1  ;;  %v9254_v18 = vpop.f32.mrf.mxu0 }
 0x1c3   : > { %v9256_v34 = vpop.f32.mrf.mxu1  ;;  %v9258_v8 = vpop.f32.mrf.mxu0 }
 0x1c5   : > { %v9260_v22 = vpop.f32.mrf.mxu1  ;;  %v9262_v5 = vpop.f32.mrf.mxu0 }
 0x1c7   : > { %v9264_v32 = vpop.f32.mrf.mxu1  ;;  %v9266_v3 = vpop.f32.mrf.mxu0 }
 0x1c9   : > { %v9268_v58 = vpop.f32.mrf.mxu1  ;;  %v9270_v33 = vpop.f32.mrf.mxu0 }
 0x1ca   : > { %9630 = vst [vmem:[#allocation11_spill] sm:$0xff] %v9270_v33 }
 0x1cb   : > { %v9272_v61 = vpop.f32.mrf.mxu1  ;;  %v9274_v21 = vpop.f32.mrf.mxu0 }
 0x1cc   : > { %9631 = vst [vmem:[#allocation12_spill] sm:$0xff] %v9274_v21 }
 0x1cd   : > { %v9276_v14 = vpop.f32.mrf.mxu1  ;;  %v9278_v53 = vpop.f32.mrf.mxu0 }
 0x1ce   : > { %9632 = vst [vmem:[#allocation14_spill] sm:$0xff] %v9278_v53 }
 0x1cf   : > { %v9280_v19 = vpop.f32.mrf.mxu1  ;;  %v9282_v45 = vpop.f32.mrf.mxu0 }
 0x1d0   : > { %9633 = vst [vmem:[#allocation16_spill] sm:$0xff] %v9282_v45 }
 0x1d1   : > { %v9284_v56 = vpop.f32.mrf.mxu1  ;;  %v9286_v48 = vpop.f32.mrf.mxu0 }
 0x1d2   : > { %9634 = vst [vmem:[#allocation17_spill] sm:$0xff] %v9286_v48 }
 0x1d3   : > { %v9288_v39 = vpop.f32.mrf.mxu1  ;;  %v9290_v50 = vpop.f32.mrf.mxu0 }
 0x1d4   : > { %9635 = vst [vmem:[#allocation19_spill] sm:$0xff] %v9288_v39  ;;  %9636 = vst [vmem:[#allocation22_spill] sm:$0xff] %v9290_v50 }
 0x1d5   : > { %v9292_v15 = vpop.f32.mrf.mxu1  ;;  %v9294_v12 = vpop.f32.mrf.mxu0 }
 0x1d6   : > { %9637 = vst [vmem:[#allocation24_spill] sm:$0xff] %v9292_v15  ;;  %9638 = vst [vmem:[#allocation25_spill] sm:$0xff] %v9294_v12 }
 0x1d7   : > { %v9296_v49 = vpop.f32.mrf.mxu1  ;;  %v9298_v24 = vpop.f32.mrf.mxu0 }
 0x1d8   : > { %9639 = vst [vmem:[#allocation26_spill] sm:$0xff] %v9296_v49  ;;  %9640 = vst [vmem:[#allocation27_spill] sm:$0xff] %v9298_v24 }
 0x1d9   : > { %v9300_v53 = vpop.f32.mrf.mxu1  ;;  %v9302_v21 = vpop.f32.mrf.mxu0 }
 0x1da   : > { %9641 = vst [vmem:[#allocation28_spill] sm:$0xff] %v9300_v53  ;;  %9642 = vst [vmem:[#allocation29_spill] sm:$0xff] %v9302_v21 }
 0x1db   : > { %v9304_v45 = vpop.f32.mrf.mxu1  ;;  %v9306_v13 = vpop.f32.mrf.mxu0 }
 0x1dc   : > { %9643 = vst [vmem:[#allocation30_spill] sm:$0xff] %v9304_v45  ;;  %9644 = vst [vmem:[#allocation31_spill] sm:$0xff] %v9306_v13 }
 0x1dd   : > { %v9308_v48 = vpop.f32.mrf.mxu1  ;;  %v9310_v39 = vpop.f32.mrf.mxu0 }
 0x1de   : > { %9645 = vst [vmem:[#allocation32_spill] sm:$0xff] %v9308_v48  ;;  %9646 = vst [vmem:[#allocation33_spill] sm:$0xff] %v9310_v39 }
 0x1df   : > { %v9312_v50 = vpop.f32.mrf.mxu1  ;;  %v9314_v15 = vpop.f32.mrf.mxu0 }
 0x1e0   : > { %9647 = vst [vmem:[#allocation34_spill] sm:$0xff] %v9312_v50  ;;  %9648 = vst [vmem:[#allocation35_spill] sm:$0xff] %v9314_v15  ;;  %v3699_v15 = vadd.f32 %v6593_v40, %v9121_v46  ;;  %v3698_v46 = vadd.f32 %v9228_v4, %v9130_v43 }
 0x1e1   : > { %v9316_v12 = vpop.f32.mrf.mxu1  ;;  %v9318_v49 = vpop.f32.mrf.mxu0 }
 0x1e2   : > { %9649 = vst [vmem:[#allocation36_spill] sm:$0xff] %v9316_v12  ;;  %9650 = vst [vmem:[#allocation37_spill] sm:$0xff] %v9318_v49  ;;  %v3697_v49 = vadd.f32 %v3570_v36, %v9124_v62  ;;  %v4085_v43 = vadd.f32 %v9222_v42, %v3698_v46  ;;  %v3702_v42 = vadd.f32 %v9244_v7, %v9142_v0 }
 0x1e3   : > { %v9320_v24 = vpop.f32.mrf.mxu1  ;;  %v9322_v21 = vpop.f32.mrf.mxu0 }
 0x1e4   : > { %9651 = vst [vmem:[#allocation38_spill] sm:$0xff] %v9320_v24  ;;  %9652 = vst [vmem:[#allocation39_spill] sm:$0xff] %v9322_v21  ;;  %v4086_v21 = vadd.f32 %v9208_v1, %v3699_v15  ;;  %v3703_v15 = vadd.f32 %v9232_v57, %v9133_v26 }
 0x1e5   : > { %v9324_v45 = vpop.f32.mrf.mxu1  ;;  %v9326_v13 = vpop.f32.mrf.mxu0 }
 0x1e6   : > { %9653 = vst [vmem:[#allocation40_spill] sm:$0xff] %v9324_v45  ;;  %9654 = vst [vmem:[#allocation41_spill] sm:$0xff] %v9326_v13  ;;  %v3700_v13 = vadd.f32 %v6594_v9, %v9127_v35 }
 0x1e7   : > { %v9328_v48 = vpop.f32.mrf.mxu1  ;;  %v9330_v39 = vpop.f32.mrf.mxu0 }
 0x1e8   : > { %9655 = vst [vmem:[#allocation42_spill] sm:$0xff] %v9328_v48  ;;  %9656 = vst [vmem:[#allocation43_spill] sm:$0xff] %v9330_v39  ;;  %v4084_v39 = vadd.f32 %v9213_v16, %v3697_v49  ;;  %v4087_v35 = vadd.f32 %v9218_v52, %v3700_v13  ;;  %v4090_v13 = vadd.f32 %v9224_v11, %v3703_v15 }
 0x1e9   : > { %v9332_v50 = vpop.f32.mrf.mxu1  ;;  %v3704_v52 = vadd.f32 %v9240_v29, %v9139_v2  ;;  %v3707_v11 = vadd.f32 %v9248_v27, %v9145_v23 }
 0x1ea   : > { %9657 = vst [vmem:[#allocation44_spill] sm:$0xff] %v9332_v50  ;;  %v6737_v12 = vpop.f32.mrf.mxu0 }
 0x1eb   : > { %v9335_v53 = vpop.f32.mrf.mxu1  ;;  %v4091_v0 = vadd.f32 %v9230_v60, %v3704_v52  ;;  %v4094_v27 = vadd.f32 %v9238_v47, %v3707_v11 }
 0x1ec   : > { %v5209_v24 = vpop.f32.mrf.mxu0 }
 0x1ed   : > { %v9338_v33 = vpop.f32.mrf.mxu1 }
 0x1ee   : > { %9658 = vst [vmem:[#allocation45_spill] sm:$0xff] %v9338_v33  ;;  %v6738_v48 = vpop.f32.mrf.mxu0 }
 0x1ef   : > { %v6689_v45 = vpop.f32.mrf.mxu1 }
 0x1f0   : > { %v4840_v40 = vadd.f32 %v6689_v45, %v4086_v21  ;;  %v5212_v50 = vpop.f32.mrf.mxu0  ;;  %v3701_v45 = vadd.f32 %v9236_v30, %v9136_v59 }
 0x1f1   : > { %v4711_v62 = vpop.f32.mrf.mxu1 }
 0x1f2   : > { %v5338_v1 = vadd.f32 %v6737_v12, %v4840_v40  ;;  %v4838_v49 = vadd.f32 %v4711_v62, %v4084_v39  ;;  %v6741_v16 = vpop.f32.mrf.mxu0  ;;  %v4088_v59 = vadd.f32 %v9226_v54, %v3701_v45  ;;  %v4089_v54 = vadd.f32 %v9234_v37, %v3702_v42 }
 0x1f3   : > { %v6690_v36 = vpop.f32.mrf.mxu1 }
 0x1f4   : > { %5370 = vst [vmem:[%s9349_s30 + $0x10] sm:$0xff] %v5338_v1  ;;  %v5336_v21 = vadd.f32 %v5209_v24, %v4838_v49  ;;  %v4841_v9 = vadd.f32 %v6690_v36, %v4087_v35  ;;  %v5225_v4 = vpop.f32.mrf.mxu0  ;;  %v5440_v7 = vmul.f32 %v5338_v1, %v5338_v1 }
 0x1f5   : > { %v4714_v33 = vpop.f32.mrf.mxu1 }
 0x1f6   : > { %5368 = vst [vmem:[%s9349_s30] sm:$0xff] %v5336_v21  ;;  %v5339_v26 = vadd.f32 %v6738_v48, %v4841_v9  ;;  %v4839_v12 = vadd.f32 %v4714_v33, %v4085_v43  ;;  %v6742_v39 = vpop.f32.mrf.mxu0  ;;  %v5438_v48 = vmul.f32 %v5336_v21, %v5336_v21  ;;  %v3705_v43 = vadd.f32 %v9252_v38, %v9148_v51 }
 0x1f7   : > { %v6693_v57 = vpop.f32.mrf.mxu1 }
 0x1f8   : > { %5371 = vst [vmem:[%s9349_s30 + $0x18] sm:$0xff] %v5339_v26  ;;  %v5337_v24 = vadd.f32 %v5212_v50, %v4839_v12  ;;  %v4844_v30 = vadd.f32 %v6693_v57, %v4090_v13  ;;  %v5228_v46 = vpop.f32.mrf.mxu0  ;;  %v4092_v57 = vadd.f32 %v9242_v20, %v3705_v43 }
 0x1f9   : > { %v4727_v33 = vpop.f32.mrf.mxu1 }
 0x1fa   : > { %5369 = vst [vmem:[%s9349_s30 + $0x8] sm:$0xff] %v5337_v24  ;;  %v5400_v40 = vadd.f32 %v5337_v24, %v5336_v21  ;;  %v5439_v62 = vmul.f32 %v5337_v24, %v5337_v24  ;;  %v5342_v2 = vadd.f32 %v6741_v16, %v4844_v30  ;;  %v4842_v29 = vadd.f32 %v4727_v33, %v4088_v59  ;;  %v6745_v35 = vpop.f32.mrf.mxu0 }
 0x1fb   : > { %v6694_v50 = vpop.f32.mrf.mxu1  ;;  %v3708_v16 = vadd.f32 %v9256_v34, %v9151_v10  ;;  %v5441_v21 = vmul.f32 %v5339_v26, %v5339_v26 }
 0x1fc   : > { %v5401_v15 = vadd.f32 %v5400_v40, %v5338_v1  ;;  %v5470_v49 = vadd.f32 %v5439_v62, %v5438_v48  ;;  %5374 = vst [vmem:[%s9349_s30 + $0x30] sm:$0xff] %v5342_v2  ;;  %v5340_v36 = vadd.f32 %v5225_v4, %v4842_v29  ;;  %v5241_v23 = vpop.f32.mrf.mxu0  ;;  %v4845_v45 = vadd.f32 %v6694_v50, %v4091_v0 }
 0x1fd   : > { %v4730_v60 = vpop.f32.mrf.mxu1  ;;  %v3706_v4 = vadd.f32 %v9260_v22, %v9154_v28  ;;  %v4095_v59 = vadd.f32 %v9246_v63, %v3708_v16  ;;  %v3709_v48 = vadd.f32 %v9268_v58, %v9160_v25  ;;  %v5444_v63 = vmul.f32 %v5342_v2, %v5342_v2 }
 0x1fe   : > { %v5471_v9 = vadd.f32 %v5470_v49, %v5440_v7  ;;  %5372 = vst [vmem:[%s9349_s30 + $0x20] sm:$0xff] %v5340_v36  ;;  %v5402_v37 = vadd.f32 %v5401_v15, %v5339_v26  ;;  %v4843_v1 = vadd.f32 %v4730_v60, %v4089_v54  ;;  %v6746_v13 = vpop.f32.mrf.mxu0  ;;  %v5442_v47 = vmul.f32 %v5340_v36, %v5340_v36 }
 0x1ff   : > { %v5343_v12 = vadd.f32 %v6742_v39, %v4845_v45  ;;  %v6697_v52 = vpop.f32.mrf.mxu1  ;;  %v4093_v39 = vadd.f32 %v9250_v6, %v3706_v4  ;;  %v3710_v16 = vadd.f32 %v9276_v14, %v9166_v31  ;;  %v3715_v45 = vadd.f32 %v9280_v19, %v9169_v55 }
 0x200   : > { %v5403_v51 = vadd.f32 %v5402_v37, %v5340_v36  ;;  %v5472_v38 = vadd.f32 %v5471_v9, %v5441_v21  ;;  %v5341_v42 = vadd.f32 %v5228_v46, %v4843_v1  ;;  %v4848_v10 = vadd.f32 %v6697_v52, %v4094_v27  ;;  %v5244_v34 = vpop.f32.mrf.mxu0 }
 0x201   : > { %5375 = vst [vmem:[%s9349_s30 + $0x38] sm:$0xff] %v5343_v12  ;;  %v4743_v26 = vpop.f32.mrf.mxu1  ;;  %v3711_v46 = vadd.f32 %v9264_v32, %v9157_v17  ;;  %v5445_v6 = vmul.f32 %v5343_v12, %v5343_v12  ;;  %v4097_v52 = vadd.f32 %v9266_v3, %v3710_v16 }
 0x202   : > { %v5473_v24 = vadd.f32 %v5472_v38, %v5442_v47  ;;  %5373 = vst [vmem:[%s9349_s30 + $0x28] sm:$0xff] %v5341_v42  ;;  %v5404_v30 = vadd.f32 %v5403_v51, %v5341_v42  ;;  %v5443_v11 = vmul.f32 %v5341_v42, %v5341_v42  ;;  %v5346_v28 = vadd.f32 %v6745_v35, %v4848_v10  ;;  %v6749_v22 = vpop.f32.mrf.mxu0  ;;  %v9659_v51 = vld [vmem:[#allocation11_spill] sm:$0xff]  ;;  %v9660_v42 = vld [vmem:[#allocation4_spill] sm:$0xff] }
 0x203   : > { %v4846_v20 = vadd.f32 %v4743_v26, %v4092_v57  ;;  %v6698_v33 = vpop.f32.mrf.mxu1  ;;  %v3712_v35 = vadd.f32 %v9272_v61, %v9163_v44  ;;  %v4098_v15 = vadd.f32 %v9254_v18, %v3711_v46  ;;  %v4102_v38 = vadd.f32 %v9659_v51, %v3715_v45  ;;  %v9661_v10 = vld [vmem:[#allocation19_spill] sm:$0xff]  ;;  %v9671_v45 = vld [vmem:[#allocation18_spill] sm:$0xff] }
 0x204   : > { %v5405_v40 = vadd.f32 %v5404_v30, %v5342_v2  ;;  %v5474_v62 = vadd.f32 %v5473_v24, %v5443_v11  ;;  %5378 = vst [vmem:[%s9349_s30 + $0x50] sm:$0xff] %v5346_v28  ;;  %v4849_v29 = vadd.f32 %v6698_v33, %v4095_v59  ;;  %v5257_v0 = vpop.f32.mrf.mxu0  ;;  %v4096_v2 = vadd.f32 %v9258_v8, %v3709_v48  ;;  %v9662_v30 = vld [vmem:[#allocation12_spill] sm:$0xff] }
 0x205   : > { %v5344_v54 = vadd.f32 %v5241_v23, %v4846_v20  ;;  %v4746_v50 = vpop.f32.mrf.mxu1  ;;  %v4099_v23 = vadd.f32 %v9262_v5, %v3712_v35  ;;  %v5448_v5 = vmul.f32 %v5346_v28, %v5346_v28 }
 0x206   : > { %v5475_v17 = vadd.f32 %v5474_v62, %v5444_v63  ;;  %v5406_v32 = vadd.f32 %v5405_v40, %v5343_v12  ;;  %v5347_v7 = vadd.f32 %v6746_v13, %v4849_v29  ;;  %v4847_v25 = vadd.f32 %v4746_v50, %v4093_v39  ;;  %v6750_v58 = vpop.f32.mrf.mxu0  ;;  %v9665_v62 = vld [vmem:[#allocation14_spill] sm:$0xff] }
 0x207   : > { %5376 = vst [vmem:[%s9349_s30 + $0x40] sm:$0xff] %v5344_v54  ;;  %v6701_v49 = vpop.f32.mrf.mxu1  ;;  %v5446_v27 = vmul.f32 %v5344_v54, %v5344_v54  ;;  %v3713_v13 = vadd.f32 %v9284_v56, %v9172_v41 }
 0x208   : > { %v5407_v36 = vadd.f32 %v5406_v32, %v5344_v54  ;;  %v5476_v43 = vadd.f32 %v5475_v17, %v5445_v6  ;;  %5379 = vst [vmem:[%s9349_s30 + $0x58] sm:$0xff] %v5347_v7  ;;  %v5345_v44 = vadd.f32 %v5244_v34, %v4847_v25  ;;  %v5260_v61 = vpop.f32.mrf.mxu0  ;;  %v4852_v18 = vadd.f32 %v6701_v49, %v4098_v15  ;;  %v9666_v6 = vld [vmem:[#allocation13_spill] sm:$0xff]  ;;  %v9667_v54 = vld [vmem:[#allocation26_spill] sm:$0xff]  ;;  %v9668_v49 = vld [vmem:[#allocation16_spill] sm:$0xff] }
 0x209   : > { %v4759_v60 = vpop.f32.mrf.mxu1  ;;  %v3716_v34 = vadd.f32 %v9661_v10, %v9660_v42  ;;  %v5449_v41 = vmul.f32 %v5347_v7, %v5347_v7  ;;  %v4100_v11 = vadd.f32 %v9662_v30, %v3713_v13  ;;  %v3719_v50 = vadd.f32 %v9667_v54, %v9666_v6  ;;  %v9676_v42 = vld [vmem:[#allocation32_spill] sm:$0xff] }
 0x20a   : > { %v5477_v21 = vadd.f32 %v5476_v43, %v5446_v27  ;;  %5377 = vst [vmem:[%s9349_s30 + $0x48] sm:$0xff] %v5345_v44  ;;  %v5408_v8 = vadd.f32 %v5407_v36, %v5345_v44  ;;  %v5447_v9 = vmul.f32 %v5345_v44, %v5345_v44  ;;  %v4850_v37 = vadd.f32 %v4759_v60, %v4096_v2  ;;  %v9669_v27 = vld [vmem:[#allocation15_spill] sm:$0xff]  ;;  %v9670_v43 = vld [vmem:[#allocation28_spill] sm:$0xff] }
 0x20b   : > { %v6753_v1 = vpop.f32.mrf.mxu0  ;;  %v5350_v4 = vadd.f32 %v6749_v22, %v4852_v18  ;;  %v6702_v47 = vpop.f32.mrf.mxu1  ;;  %v9664_v22 = vld [vmem:[#allocation24_spill] sm:$0xff]  ;;  %v4103_v29 = vadd.f32 %v9665_v62, %v3716_v34  ;;  %v3717_v44 = vadd.f32 %v9670_v43, %v9669_v27  ;;  %v9672_v18 = vld [vmem:[#allocation30_spill] sm:$0xff] }
 0x20c   : > { %v5409_v31 = vadd.f32 %v5408_v8, %v5346_v28  ;;  %v5478_v14 = vadd.f32 %v5477_v21, %v5447_v9  ;;  %v5348_v12 = vadd.f32 %v5257_v0, %v4850_v37  ;;  %v4853_v55 = vadd.f32 %v6702_v47, %v4099_v23  ;;  %v9663_v28 = vld [vmem:[#allocation10_spill] sm:$0xff] }
 0x20d   : > { %v5273_v19 = vpop.f32.mrf.mxu0  ;;  %5382 = vst [vmem:[%s9349_s30 + $0x70] sm:$0xff] %v5350_v4  ;;  %v4762_v57 = vpop.f32.mrf.mxu1  ;;  %v3714_v39 = vadd.f32 %v9664_v22, %v9663_v28  ;;  %v3720_v60 = vadd.f32 %v9672_v18, %v9671_v45  ;;  %v5452_v21 = vmul.f32 %v5350_v4, %v5350_v4  ;;  %v9678_v28 = vld [vmem:[#allocation21_spill] sm:$0xff]  ;;  %v9679_v22 = vld [vmem:[#allocation34_spill] sm:$0xff] }
 0x20e   : > { %v5479_v56 = vadd.f32 %v5478_v14, %v5448_v5  ;;  %5380 = vst [vmem:[%s9349_s30 + $0x60] sm:$0xff] %v5348_v12  ;;  %v5410_v59 = vadd.f32 %v5409_v31, %v5347_v7  ;;  %v5351_v26 = vadd.f32 %v6750_v58, %v4853_v55  ;;  %v4851_v3 = vadd.f32 %v4762_v57, %v4097_v52  ;;  %v9674_v52 = vld [vmem:[#allocation22_spill] sm:$0xff] }
 0x20f   : > { %v6754_v24 = vpop.f32.mrf.mxu0  ;;  %v6705_v46 = vpop.f32.mrf.mxu1  ;;  %v5450_v20 = vmul.f32 %v5348_v12, %v5348_v12  ;;  %v4101_v36 = vadd.f32 %v9668_v49, %v3714_v39  ;;  %v4104_v51 = vadd.f32 %v9674_v52, %v3717_v44  ;;  %v9690_v52 = vld [vmem:[#allocation6_spill] sm:$0xff] }
 0x210   : > { %v5411_v48 = vadd.f32 %v5410_v59, %v5348_v12  ;;  %v5480_v33 = vadd.f32 %v5479_v56, %v5449_v41  ;;  %5383 = vst [vmem:[%s9349_s30 + $0x78] sm:$0xff] %v5351_v26  ;;  %v4856_v63 = vadd.f32 %v6705_v46, %v4102_v38  ;;  %v5349_v0 = vadd.f32 %v5260_v61, %v4851_v3  ;;  %v9675_v38 = vld [vmem:[#allocation20_spill] sm:$0xff]  ;;  %v9677_v41 = vld [vmem:[#allocation25_spill] sm:$0xff] }
 0x211   : > { %v5276_v40 = vpop.f32.mrf.mxu0  ;;  %v4775_v35 = vpop.f32.mrf.mxu1  ;;  %v5453_v14 = vmul.f32 %v5351_v26, %v5351_v26  ;;  %v3718_v10 = vadd.f32 %v9676_v42, %v9675_v38  ;;  %v4107_v56 = vadd.f32 %v9677_v41, %v3720_v60  ;;  %v9686_v60 = vld [vmem:[#allocation31_spill] sm:$0xff] }
 0x212   : > { %v5481_v17 = vadd.f32 %v5480_v33, %v5450_v20  ;;  %v5354_v32 = vadd.f32 %v6753_v1, %v4856_v63  ;;  %v4854_v7 = vadd.f32 %v4775_v35, %v4100_v11  ;;  %5381 = vst [vmem:[%s9349_s30 + $0x68] sm:$0xff] %v5349_v0  ;;  %v5412_v58 = vadd.f32 %v5411_v48, %v5349_v0  ;;  %v9673_v1 = vld [vmem:[#allocation17_spill] sm:$0xff] }
 0x213   : > { %v6757_v25 = vpop.f32.mrf.mxu0  ;;  %v5451_v15 = vmul.f32 %v5349_v0, %v5349_v0  ;;  %v6706_v2 = vpop.f32.mrf.mxu1  ;;  %v4106_v13 = vadd.f32 %v9673_v1, %v3719_v50  ;;  %v9682_v0 = vld [vmem:[#allocation36_spill] sm:$0xff] }
 0x214   : > { %5386 = vst [vmem:[%s9349_s30 + $0x90] sm:$0xff] %v5354_v32  ;;  %v5352_v61 = vadd.f32 %v5273_v19, %v4854_v7  ;;  %v4857_v23 = vadd.f32 %v6706_v2, %v4103_v29  ;;  %v5413_v8 = vadd.f32 %v5412_v58, %v5350_v4  ;;  %v9681_v29 = vld [vmem:[#allocation23_spill] sm:$0xff]  ;;  %v9684_v7 = vld [vmem:[#allocation38_spill] sm:$0xff] }
 0x215   : > { %v5289_v16 = vpop.f32.mrf.mxu0  ;;  %v5482_v9 = vadd.f32 %v5481_v17, %v5451_v15  ;;  %v4778_v37 = vpop.f32.mrf.mxu1  ;;  %v3721_v35 = vadd.f32 %v9682_v0, %v9681_v29  ;;  %v9683_v17 = vld [vmem:[#allocation3_spill] sm:$0xff] }
 0x216   : > { %5384 = vst [vmem:[%s9349_s30 + $0x80] sm:$0xff] %v5352_v61  ;;  %v5355_v5 = vadd.f32 %v6754_v24, %v4857_v23  ;;  %v4855_v47 = vadd.f32 %v4778_v37, %v4101_v36  ;;  %v5414_v55 = vadd.f32 %v5413_v8, %v5351_v26  ;;  %v5454_v24 = vmul.f32 %v5352_v61, %v5352_v61  ;;  %v9685_v36 = vld [vmem:[#allocation29_spill] sm:$0xff] }
 0x217   : > { %v6758_v31 = vpop.f32.mrf.mxu0  ;;  %v5483_v12 = vadd.f32 %v5482_v9, %v5452_v21  ;;  %v6709_v19 = vpop.f32.mrf.mxu1  ;;  %v3723_v26 = vadd.f32 %v9679_v22, %v9678_v28  ;;  %v3724_v58 = vadd.f32 %v9684_v7, %v9683_v17  ;;  %v4108_v21 = vadd.f32 %v9686_v60, %v3721_v35  ;;  %v9687_v8 = vld [vmem:[#allocation5_spill] sm:$0xff]  ;;  %v9688_v9 = vld [vmem:[#allocation40_spill] sm:$0xff]  ;;  %v9697_v17 = vld [vmem:[#allocation39_spill] sm:$0xff] }
 0x218   : > { %5387 = vst [vmem:[%s9349_s30 + $0x98] sm:$0xff] %v5355_v5  ;;  %v5353_v4 = vadd.f32 %v5276_v40, %v4855_v47  ;;  %v4860_v34 = vadd.f32 %v6709_v19, %v4106_v13  ;;  %v5415_v59 = vadd.f32 %v5414_v55, %v5352_v61  ;;  %v9680_v40 = vld [vmem:[#allocation27_spill] sm:$0xff]  ;;  %v5457_v23 = vmul.f32 %v5355_v5, %v5355_v5  ;;  %v9689_v47 = vld [vmem:[#allocation33_spill] sm:$0xff] }
 0x219   : > { %v5292_v57 = vpop.f32.mrf.mxu0  ;;  %v5484_v30 = vadd.f32 %v5483_v12, %v5453_v14  ;;  %v4791_v11 = vpop.f32.mrf.mxu1  ;;  %v4105_v62 = vadd.f32 %v9680_v40, %v3718_v10  ;;  %v4110_v27 = vadd.f32 %v9685_v36, %v3723_v26  ;;  %v3722_v37 = vadd.f32 %v9688_v9, %v9687_v8  ;;  %v9701_v8 = vld [vmem:[#allocation43_spill] sm:$0xff] }
 0x21a   : > { %5385 = vst [vmem:[%s9349_s30 + $0x88] sm:$0xff] %v5353_v4  ;;  %v5455_v39 = vmul.f32 %v5353_v4, %v5353_v4  ;;  %v5358_v3 = vadd.f32 %v6757_v25, %v4860_v34  ;;  %v4858_v46 = vadd.f32 %v4791_v11, %v4104_v51  ;;  %v5416_v33 = vadd.f32 %v5415_v59, %v5353_v4  ;;  %v9691_v51 = vld [vmem:[#allocation42_spill] sm:$0xff] }
 0x21b   : > { %v6761_v48 = vpop.f32.mrf.mxu0  ;;  %v5485_v20 = vadd.f32 %v5484_v30, %v5454_v24  ;;  %v6710_v63 = vpop.f32.mrf.mxu1  ;;  %v5456_v25 = vmul.f32 %v5354_v32, %v5354_v32  ;;  %v4111_v14 = vadd.f32 %v9689_v47, %v3724_v58  ;;  %v9693_v24 = vld [vmem:[#allocation8_spill] sm:$0xff]  ;;  %v9698_v58 = vld [vmem:[#allocation9_spill] sm:$0xff] }
 0x21c   : > { %5390 = vst [vmem:[%s9349_s30 + $0xb0] sm:$0xff] %v5358_v3  ;;  %v5356_v6 = vadd.f32 %v5289_v16, %v4858_v46  ;;  %v4861_v54 = vadd.f32 %v6710_v63, %v4107_v56  ;;  %v5417_v15 = vadd.f32 %v5416_v33, %v5354_v32  ;;  %v9692_v56 = vld [vmem:[#allocation35_spill] sm:$0xff]  ;;  %v9694_v30 = vld [vmem:[#allocation44_spill] sm:$0xff]  ;;  %v5460_v26 = vmul.f32 %v5358_v3, %v5358_v3 }
 0x21d   : > { %v5305_v50 = vpop.f32.mrf.mxu0  ;;  %v5486_v2 = vadd.f32 %v5485_v20, %v5455_v39  ;;  %v4794_v49 = vpop.f32.mrf.mxu1  ;;  %v4109_v59 = vadd.f32 %v9692_v56, %v3722_v37  ;;  %v3725_v11 = vadd.f32 %v9694_v30, %v9693_v24  ;;  %v9696_v63 = vld [vmem:[#allocation7_spill] sm:$0xff] }
 0x21e   : > { %5388 = vst [vmem:[%s9349_s30 + $0xa0] sm:$0xff] %v5356_v6  ;;  %v5359_v43 = vadd.f32 %v6758_v31, %v4861_v54  ;;  %v4859_v44 = vadd.f32 %v4794_v49, %v4105_v62  ;;  %v5418_v16 = vadd.f32 %v5417_v15, %v5355_v5  ;;  %v5458_v12 = vmul.f32 %v5356_v6, %v5356_v6 }
 0x21f   : > { %v6762_v61 = vpop.f32.mrf.mxu0  ;;  %v5487_v45 = vadd.f32 %v5486_v2, %v5456_v25  ;;  %v6713_v18 = vpop.f32.mrf.mxu1  ;;  %v3727_v5 = vadd.f32 %v9691_v51, %v9690_v52  ;;  %v3728_v40 = vadd.f32 %v9335_v53, %v9696_v63  ;;  %v4112_v7 = vadd.f32 %v9697_v17, %v3725_v11 }
 0x220   : > { %5391 = vst [vmem:[%s9349_s30 + $0xb8] sm:$0xff] %v5359_v43  ;;  %v5357_v32 = vadd.f32 %v5292_v57, %v4859_v44  ;;  %v4864_v1 = vadd.f32 %v6713_v18, %v4110_v27  ;;  %v5419_v31 = vadd.f32 %v5418_v16, %v5356_v6  ;;  %v5461_v0 = vmul.f32 %v5359_v43, %v5359_v43  ;;  %v9700_v44 = vld [vmem:[#allocation41_spill] sm:$0xff] }
 0x221   : > { %v5308_v13 = vpop.f32.mrf.mxu0  ;;  %v5488_v55 = vadd.f32 %v5487_v45, %v5457_v23  ;;  %v4807_v19 = vpop.f32.mrf.mxu1 }
 0x222   : > { %5389 = vst [vmem:[%s9349_s30 + $0xa8] sm:$0xff] %v5357_v32  ;;  %v5459_v38 = vmul.f32 %v5357_v32, %v5357_v32  ;;  %v5362_v42 = vadd.f32 %v6761_v48, %v4864_v1  ;;  %v4862_v10 = vadd.f32 %v4807_v19, %v4108_v21  ;;  %v5420_v34 = vadd.f32 %v5419_v31, %v5357_v32  ;;  %v9695_v48 = vld [vmem:[#allocation37_spill] sm:$0xff] }
 0x223   : > { %v5489_v4 = vadd.f32 %v5488_v55, %v5458_v12  ;;  %v6714_v57 = vpop.f32.mrf.mxu1  ;;  %v6765_v41 = vpop.f32.mrf.mxu0  ;;  %v4114_v33 = vadd.f32 %v9695_v48, %v3727_v5 }
 0x224   : > { %5394 = vst [vmem:[%s9349_s30 + $0xd0] sm:$0xff] %v5362_v42  ;;  %v5360_v28 = vadd.f32 %v5305_v50, %v4862_v10  ;;  %v4865_v22 = vadd.f32 %v6714_v57, %v4111_v14  ;;  %v5421_v39 = vadd.f32 %v5420_v34, %v5358_v3  ;;  %v9699_v3 = vld [vmem:[#allocation45_spill] sm:$0xff]  ;;  %v5464_v1 = vmul.f32 %v5362_v42, %v5362_v42 }
 0x225   : > { %v5490_v46 = vadd.f32 %v5489_v4, %v5459_v38  ;;  %v4810_v20 = vpop.f32.mrf.mxu1  ;;  %v5321_v50 = vpop.f32.mrf.mxu0  ;;  %v3726_v25 = vadd.f32 %v9699_v3, %v9698_v58 }
 0x226   : > { %5392 = vst [vmem:[%s9349_s30 + $0xc0] sm:$0xff] %v5360_v28  ;;  %v5363_v62 = vadd.f32 %v6762_v61, %v4865_v22  ;;  %v4863_v29 = vadd.f32 %v4810_v20, %v4109_v59  ;;  %v5422_v6 = vadd.f32 %v5421_v39, %v5359_v43  ;;  %v5462_v53 = vmul.f32 %v5360_v28, %v5360_v28 }
 0x227   : > { %v5491_v35 = vadd.f32 %v5490_v46, %v5460_v26  ;;  %v6717_v54 = vpop.f32.mrf.mxu1  ;;  %v4115_v61 = vadd.f32 %v9700_v44, %v3728_v40  ;;  %v6766_v21 = vpop.f32.mrf.mxu0  ;;  %v4113_v9 = vadd.f32 %v9701_v8, %v3726_v25 }
 0x228   : > { %5395 = vst [vmem:[%s9349_s30 + $0xd8] sm:$0xff] %v5363_v62  ;;  %v5361_v15 = vadd.f32 %v5308_v13, %v4863_v29  ;;  %v4868_v2 = vadd.f32 %v6717_v54, %v4114_v33  ;;  %v5423_v49 = vadd.f32 %v5422_v6, %v5360_v28  ;;  %v5465_v55 = vmul.f32 %v5363_v62, %v5363_v62 }
 0x229   : > { %v5492_v36 = vadd.f32 %v5491_v35, %v5461_v0  ;;  %v4823_v27 = vpop.f32.mrf.mxu1  ;;  %v5324_v51 = vpop.f32.mrf.mxu0 }
 0x22a   : > { %5393 = vst [vmem:[%s9349_s30 + $0xc8] sm:$0xff] %v5361_v15  ;;  %v5463_v43 = vmul.f32 %v5361_v15, %v5361_v15  ;;  %v5366_v23 = vadd.f32 %v6765_v41, %v4868_v2  ;;  %v4866_v45 = vadd.f32 %v4823_v27, %v4112_v7  ;;  %v5424_v18 = vadd.f32 %v5423_v49, %v5361_v15 }
 0x22b   : > { %v5493_v16 = vadd.f32 %v5492_v36, %v5462_v53  ;;  %v6718_v60 = vpop.f32.mrf.mxu1 }
 0x22c   : > { %5398 = vst [vmem:[%s9349_s30 + $0xf0] sm:$0xff] %v5366_v23  ;;  %v5364_v37 = vadd.f32 %v5321_v50, %v4866_v45  ;;  %v4869_v32 = vadd.f32 %v6718_v60, %v4115_v61  ;;  %v5425_v13 = vadd.f32 %v5424_v18, %v5362_v42  ;;  %v5468_v56 = vmul.f32 %v5366_v23, %v5366_v23 }
 0x22d   : > { %v5494_v47 = vadd.f32 %v5493_v16, %v5463_v43  ;;  %v4826_v14 = vpop.f32.mrf.mxu1 }
 0x22e   : > { %5396 = vst [vmem:[%s9349_s30 + $0xe0] sm:$0xff] %v5364_v37  ;;  %v5367_v31 = vadd.f32 %v6766_v21, %v4869_v32  ;;  %v4867_v12 = vadd.f32 %v4826_v14, %v4113_v9  ;;  %v5426_v52 = vadd.f32 %v5425_v13, %v5363_v62  ;;  %v5466_v10 = vmul.f32 %v5364_v37, %v5364_v37 }
 0x22f   : > { %v5495_v19 = vadd.f32 %v5494_v47, %v5464_v1 }
 0x230   : > { %5399 = vst [vmem:[%s9349_s30 + $0xf8] sm:$0xff] %v5367_v31  ;;  %v5365_v5 = vadd.f32 %v5324_v51, %v4867_v12  ;;  %v5427_v38 = vadd.f32 %v5426_v52, %v5364_v37  ;;  %v5469_v24 = vmul.f32 %v5367_v31, %v5367_v31 }
 0x231   : > { %v5496_v4 = vadd.f32 %v5495_v19, %v5465_v55 }
 0x232   : > { %5397 = vst [vmem:[%s9349_s30 + $0xe8] sm:$0xff] %v5365_v5  ;;  %v5467_v34 = vmul.f32 %v5365_v5, %v5365_v5  ;;  %v5428_v41 = vadd.f32 %v5427_v38, %v5365_v5 }
 0x233   : > { %v5497_v57 = vadd.f32 %v5496_v4, %v5466_v10 }
 0x234   : > { %v5429_v42 = vadd.f32 %v5428_v41, %v5366_v23 }
 0x235   : > { %v5498_v59 = vadd.f32 %v5497_v57, %v5467_v34 }
 0x236   : > { %v5430_v30 = vadd.f32 %v5429_v42, %v5367_v31 }
 0x237   : > { %v5499_v11 = vadd.f32 %v5498_v59, %v5468_v56 }
 0x238   : > { %v5431_v28 = vrot.slane %v5430_v30, 4 }
 0x239   : > { %v5500_v22 = vadd.f32 %v5499_v11, %v5469_v24 }
 0x23a   : > { %v5432_v26 = vadd.f32 %v5431_v28, %v5430_v30 }
 0x23b   : > { %v5501_v39 = vrot.slane %v5500_v22, 4 }
 0x23c   : > { %v5433_v46 = vrot.slane %v5432_v26, 2 }
 0x23d   : > { %v5502_v20 = vadd.f32 %v5501_v39, %v5500_v22 }
 0x23e   : > { %v5434_v48 = vadd.f32 %v5433_v46, %v5432_v26 }
 0x23f   : > { %v5503_v33 = vrot.slane %v5502_v20, 2 }
 0x240   : > { %v5435_v63 = vrot.slane %v5434_v48, 1 }
 0x241   : > { %v5504_v40 = vadd.f32 %v5503_v33, %v5502_v20 }
 0x242   : > { %v5436_v62 = vadd.f32 %v5435_v63, %v5434_v48 }
 0x243   : > { %v5505_v29 = vrot.slane %v5504_v40, 1 }
 0x244   : > { %5437 = vst [vmem:[%s441_s10] sm:$0x1] %v5436_v62 }
 0x245   : > { %v5506_v0 = vadd.f32 %v5505_v29, %v5504_v40 }
 0x247   : > { %5507 = vst [vmem:[%s447_s13] sm:$0x1] %v5506_v0 }
 0x248 PF: > { %s17_s23 = sadd.s32 1, %s6965_s23   ;;  %s9702_s21 = smov %s6961_s22 }
 0x249   : > { %p14_p5 = scmp.ge.s32.totalorder %s17_s23, 4   ;;  %s9703_s22 = smov %s9705_s24 }
 0x24b   :  { %16 = sbr.rel (!%p14_p5) target bundleno = 2 (0x2), region = 108 }

</bundles_post_ra>
